<compile_context>
chip_gen: v6e
topology: v6e:2x2x1
jax: 0.10.0
libtpu: 0.0.40
codegen_flags: <defaults>
</compile_context>

<pallas_src>
import functools
import math

import jax
import jax.numpy as jnp
from jax.experimental import pallas as pl
from jax.experimental.pallas import tpu as pltpu

# ---------------- config ----------------
DIM = 32          # sampler.dim / transformer hidden dim
HEADS = 4
PATCH = 8         # backbone stride (nts[-1] is H/8 x W/8), matches interpolate 0.125
FFN = 128
IN_CH = 3
EPS = 1e-5


# ---------------- Pallas kernels ----------------

def _linear_kernel(x_ref, w_ref, b_ref, o_ref):
    o_ref[...] = (jnp.dot(x_ref[...], w_ref[...], preferred_element_type=jnp.float32)
                  + b_ref[...])


def pallas_linear(x2d, w, b):
    M, K = x2d.shape
    N = w.shape[1]
    return pl.pallas_call(
        _linear_kernel,
        grid=(1,),
        in_specs=[pl.BlockSpec((M, K), lambda i: (0, 0)),
                  pl.BlockSpec((K, N), lambda i: (0, 0)),
                  pl.BlockSpec((1, N), lambda i: (0, 0))],
        out_specs=pl.BlockSpec((M, N), lambda i: (0, 0)),
        out_shape=jax.ShapeDtypeStruct((M, N), jnp.float32),
    )(x2d, w, b)


def _mha_block_kernel(*refs, heads, scale, eps, has_mask, return_attn):
    # Fused: q/k/v proj + per-head softmax(QK^T)V + out-proj + residual + LayerNorm.
    x_ref, posq_ref, kv_ref, posk_ref = refs[:4]
    i = 4
    if has_mask:
        maskb_ref = refs[i]; i += 1
    w_ref, b_ref, ln_ref = refs[i:i + 3]
    i += 3
    o_ref = refs[i]; i += 1
    attn_ref = refs[i] if return_attn else None

    x = x_ref[0]                          # [Lq, D] (also the residual input)
    q_in = x + posq_ref[0]
    kv = kv_ref[0]                        # [Lk, D]
    k_in = kv + posk_ref[0]

    D = x.shape[-1]
    Dh = D // heads
    w = w_ref[...]                        # [D, 4D] = [Wq | Wk | Wv | Wo]
    b = b_ref[...]                        # [1, 4D]

    q = jnp.dot(q_in, w[:, 0:D], preferred_element_type=jnp.float32) + b[:, 0:D]
    k = jnp.dot(k_in, w[:, D:2 * D], preferred_element_type=jnp.float32) + b[:, D:2 * D]
    v = jnp.dot(kv, w[:, 2 * D:3 * D], preferred_element_type=jnp.float32) + b[:, 2 * D:3 * D]
    wo = w[:, 3 * D:4 * D]                # [D, D]

    if has_mask:
        kbias = maskb_ref[0]              # [1, Lk] additive key-padding bias

    proj = None
    attn_sum = None
    for h in range(heads):                # static unroll, heads fused in one launch
        qh = q[:, h * Dh:(h + 1) * Dh]
        kh = k[:, h * Dh:(h + 1) * Dh]
        vh = v[:, h * Dh:(h + 1) * Dh]
        # contract last dims directly (no explicit transpose of k)
        s = jax.lax.dot_general(qh, kh, (((1,), (1,)), ((), ())),
                                preferred_element_type=jnp.float32) * scale
        if has_mask:
            s = s + kbias
        m = jnp.max(s, axis=-1, keepdims=True)
        p = jnp.exp(s - m)
        l = jnp.sum(p, axis=-1, keepdims=True)
        attn = p * pl.reciprocal(l, approx=True)          # EUP reciprocal (free slot)
        oh = jnp.dot(attn, vh, preferred_element_type=jnp.float32)     # [Lq, Dh]
        # fold out-projection per head:  o @ Wo == sum_h oh @ Wo[h*Dh:(h+1)*Dh, :]
        c = jnp.dot(oh, wo[h * Dh:(h + 1) * Dh, :], preferred_element_type=jnp.float32)
        proj = c if proj is None else proj + c
        if return_attn:
            attn_sum = attn if attn_sum is None else attn_sum + attn

    y = x + proj + b[:, 3 * D:4 * D]      # residual + out-proj bias
    mu = jnp.mean(y, axis=-1, keepdims=True)
    yc = y - mu
    var = jnp.mean(yc * yc, axis=-1, keepdims=True)
    ln = ln_ref[...]                      # [2, D]: row 0 = gamma, row 1 = beta
    o_ref[0] = yc * jax.lax.rsqrt(var + eps) * ln[0:1, :] + ln[1:2, :]
    if return_attn:
        attn_ref[0] = attn_sum * (1.0 / heads)   # torch MHA head-averaged weights


def mha_block(x, pos_q, kv, pos_k, mask_bias, w, b, ln, heads, return_attn=False):
    B, Lq, D = x.shape
    Lk = kv.shape[1]
    scale = 1.0 / math.sqrt(D // heads)
    has_mask = mask_bias is not None

    in_specs = [pl.BlockSpec((1, Lq, D), lambda i: (i, 0, 0)),
                pl.BlockSpec((1, Lq, D), lambda i: (i, 0, 0)),
                pl.BlockSpec((1, Lk, D), lambda i: (i, 0, 0)),
                pl.BlockSpec((1, Lk, D), lambda i: (i, 0, 0))]
    args = [x, pos_q, kv, pos_k]
    if has_mask:
        in_specs.append(pl.BlockSpec((1, 1, Lk), lambda i: (i, 0, 0)))
        args.append(mask_bias)
    in_specs += [pl.BlockSpec((D, 4 * D), lambda i: (0, 0)),
                 pl.BlockSpec((1, 4 * D), lambda i: (0, 0)),
                 pl.BlockSpec((2, D), lambda i: (0, 0))]
    args += [w, b, ln]

    kern = functools.partial(_mha_block_kernel, heads=heads, scale=scale, eps=EPS,
                             has_mask=has_mask, return_attn=return_attn)
    if return_attn:
        out_shape = (jax.ShapeDtypeStruct((B, Lq, D), jnp.float32),
                     jax.ShapeDtypeStruct((B, Lq, Lk), jnp.float32))
        out_specs = [pl.BlockSpec((1, Lq, D), lambda i: (i, 0, 0)),
                     pl.BlockSpec((1, Lq, Lk), lambda i: (i, 0, 0))]
    else:
        out_shape = jax.ShapeDtypeStruct((B, Lq, D), jnp.float32)
        out_specs = pl.BlockSpec((1, Lq, D), lambda i: (i, 0, 0))

    return pl.pallas_call(
        kern, grid=(B,), in_specs=in_specs, out_specs=out_specs, out_shape=out_shape,
        compiler_params=pltpu.CompilerParams(dimension_semantics=("parallel",)),
    )(*args)


def _ffn_block_kernel(x_ref, w1_ref, b1_ref, w2_ref, b2_ref, ln_ref, o_ref, *, eps):
    # Fused: relu(x@W1+b1)@W2+b2 + residual + LayerNorm; FFN hidden never leaves VMEM.
    x = x_ref[...]
    h = jnp.maximum(jnp.dot(x, w1_ref[...], preferred_element_type=jnp.float32)
                    + b1_ref[...], 0.0)
    y = x + jnp.dot(h, w2_ref[...], preferred_element_type=jnp.float32) + b2_ref[...]
    mu = jnp.mean(y, axis=-1, keepdims=True)
    yc = y - mu
    var = jnp.mean(yc * yc, axis=-1, keepdims=True)
    ln = ln_ref[...]
    o_ref[...] = yc * jax.lax.rsqrt(var + eps) * ln[0:1, :] + ln[1:2, :]


def ffn_block(x, w1, b1, w2, b2, ln):
    B, L, D = x.shape
    M = B * L
    F = w1.shape[1]
    out = pl.pallas_call(
        functools.partial(_ffn_block_kernel, eps=EPS),
        grid=(1,),
        in_specs=[pl.BlockSpec((M, D), lambda i: (0, 0)),
                  pl.BlockSpec((D, F), lambda i: (0, 0)),
                  pl.BlockSpec((1, F), lambda i: (0, 0)),
                  pl.BlockSpec((F, D), lambda i: (0, 0)),
                  pl.BlockSpec((1, D), lambda i: (0, 0)),
                  pl.BlockSpec((2, D), lambda i: (0, 0))],
        out_specs=pl.BlockSpec((M, D), lambda i: (0, 0)),
        out_shape=jax.ShapeDtypeStruct((M, D), jnp.float32),
    )(x.reshape(M, D), w1, b1, w2, b2, ln)
    return out.reshape(B, L, D)


def _decoder_head_kernel(xdec_ref, feat_ref, attn_ref, w_ref, b_ref, o_ref):
    fused = xdec_ref[0] + feat_ref[0]                    # skip connection from nts[-1]
    ctx = jnp.dot(attn_ref[0], fused, preferred_element_type=jnp.float32)
    tok = fused + ctx                                    # attention-guided aggregation
    y = jnp.dot(tok, w_ref[...], preferred_element_type=jnp.float32) + b_ref[...]
    o_ref[0] = jnp.tanh(y)


def decoder_head(xdec_tok, feat_tok, attn_map, p, patch, h, w):
    B, L, D = xdec_tok.shape
    P = p["W"].shape[1]                                  # 3 * patch * patch
    patches = pl.pallas_call(
        _decoder_head_kernel,
        grid=(B,),
        in_specs=[pl.BlockSpec((1, L, D), lambda i: (i, 0, 0)),
                  pl.BlockSpec((1, L, D), lambda i: (i, 0, 0)),
                  pl.BlockSpec((1, L, L), lambda i: (i, 0, 0)),
                  pl.BlockSpec((D, P), lambda i: (0, 0)),
                  pl.BlockSpec((1, P), lambda i: (0, 0))],
        out_specs=pl.BlockSpec((1, L, P), lambda i: (i, 0, 0)),
        out_shape=jax.ShapeDtypeStruct((B, L, P), jnp.float32),
        compiler_params=pltpu.CompilerParams(dimension_semantics=("parallel",)),
    )(xdec_tok, feat_tok, attn_map, p["W"], p["b"])
    return unpatchify(patches, patch, 3, h, w)


# ---------------- JAX glue (layout plumbing, no heavy compute) ----------------

def patchify(x, p):
    B, C, H, W = x.shape
    x = x.reshape(B, C, H // p, p, W // p, p)
    x = x.transpose(0, 2, 4, 1, 3, 5)
    return x.reshape(B, (H // p) * (W // p), C * p * p)


def unpatchify(tok, p, cout, h, w):
    B = tok.shape[0]
    x = tok.reshape(B, h, w, cout, p, p)
    x = x.transpose(0, 3, 1, 4, 2, 5)
    return x.reshape(B, cout, h * p, w * p)


def sine_position_encoding(B, Hg, Wg, dim, temperature=10000.0):
    # DETR-style 2D sine embedding, normalized.  Returns [B, dim, Hg, Wg].
    npf = dim // 2
    scale = 2.0 * math.pi
    eps = 1e-6
    y_embed = jnp.arange(1, Hg + 1, dtype=jnp.float32)[:, None] * jnp.ones((1, Wg), jnp.float32)
    x_embed = jnp.ones((Hg, 1), jnp.float32) * jnp.arange(1, Wg + 1, dtype=jnp.float32)[None, :]
    y_embed = y_embed / (Hg + eps) * scale
    x_embed = x_embed / (Wg + eps) * scale
    dim_t = temperature ** (2.0 * (jnp.arange(npf) // 2).astype(jnp.float32) / npf)
    pos_x = x_embed[:, :, None] / dim_t
    pos_y = y_embed[:, :, None] / dim_t
    pos_x = jnp.stack([jnp.sin(pos_x[:, :, 0::2]), jnp.cos(pos_x[:, :, 1::2])], axis=3).reshape(Hg, Wg, npf)
    pos_y = jnp.stack([jnp.sin(pos_y[:, :, 0::2]), jnp.cos(pos_y[:, :, 1::2])], axis=3).reshape(Hg, Wg, npf)
    pos = jnp.concatenate([pos_y, pos_x], axis=2).transpose(2, 0, 1)[None]
    return jnp.broadcast_to(pos, (B, dim, Hg, Wg))


def bilinear_down8(x):
    # Exact F.interpolate(scale_factor=0.125, mode='bilinear', align_corners=False)
    # for an integer 1/8 factor: output sample center maps to input coord 8*i+3.5,
    # i.e. the mean of input pixels (8*i+3, 8*i+4) along each spatial axis.
    B, C, H, W = x.shape
    r = x.reshape(B, C, H // 8, 8, W // 8, 8)
    return r[:, :, :, 3:5, :, 3:5].mean(axis=(3, 5))


def precompute_positions(B, H, W, dim=DIM, patch=PATCH):
    # Static-shape constants, hoisted out of the jitted forward path.
    h, w = H // patch, W // patch
    pos = sine_position_encoding(B, H, W, dim)                       # full-res pos (spec)
    src_pos = sine_position_encoding(B, h, w, dim)                   # sampler /8-grid pos
    src_pos = src_pos.reshape(B, dim, h * w).transpose(0, 2, 1)      # [B, L, dim]
    tgt_pos = bilinear_down8(pos).reshape(B, dim, h * w).transpose(0, 2, 1)
    return src_pos, tgt_pos


# ---------------- GeneratorInpTrans forward ----------------

def generator_inptrans_forward(x, mask, src_pos, tgt_pos, params):
    B, Cin, H, W = x.shape
    patch, dim, heads = PATCH, DIM, HEADS
    h, w = H // patch, W // patch
    L = h * w

    # --- sampler + backbone share one patchify and one fused patch-embed matmul ---
    tok = patchify(x, patch).reshape(B * L, Cin * patch * patch)
    emb = pallas_linear(tok, params["embed"]["W"], params["embed"]["b"]).reshape(B, L, 2 * dim)
    src = emb[..., :dim]                 # sampler tokens            [B, L, dim]
    feat = emb[..., dim:]                # backbone nts[-1] tokens   [B, L, dim]
    #   (feat == nts[-1].flatten(2).permute(0, 2, 1) of the NCHW /8 feature map)

    # --- downsampled padding mask -> additive key-padding bias (decoder self-attn) ---
    kpm = mask.reshape(B, h, patch, w, patch).any(axis=(2, 4)).reshape(B, 1, L)
    kpm_bias = jnp.where(kpm, -1e9, 0.0).astype(jnp.float32)

    # --- transformer encoder over src -> memory (fused attn kernel + fused FFN kernel) ---
    enc = params["encoder"]
    e1 = mha_block(src, src_pos, src, src_pos, None,
                   enc["sa_w"], enc["sa_b"], enc["ln1"], heads)
    memory = ffn_block(e1, enc["W1"], enc["b1"], enc["W2"], enc["b2"], enc["ln2"])

    # --- GeneratorInpTrans.forward body: decoder on tgt = nts[-1] tokens ---
    dec = params["decoder"]
    d1 = mha_block(feat, tgt_pos, feat, tgt_pos, kpm_bias,
                   dec["sa_w"], dec["sa_b"], dec["ln1"], heads)
    d2, attn_weights = mha_block(d1, tgt_pos, memory, src_pos, None,
                                 dec["ca_w"], dec["ca_b"], dec["ln2"], heads,
                                 return_attn=True)
    xdec = ffn_block(d2, dec["W1"], dec["b1"], dec["W2"], dec["b2"], dec["ln3"])

    # --- decoder head: skip + attention-guided context + patch "deconv" + tanh ---
    return decoder_head(xdec, feat, attn_weights, params["head"], patch, h, w)


# ---------------- deterministic parameter init ----------------

def init_params(key, dim=DIM, in_ch=IN_CH, patch=PATCH, ffn_dim=FFN):
    pe = in_ch * patch * patch
    it = iter(jax.random.split(key, 64))

    def dense(kin, kout):
        return jax.random.normal(next(it), (kin, kout), jnp.float32) / math.sqrt(kin)

    def mha_w():
        # packed [Wq | Wk | Wv | Wo] along the output dim -> single weight ref per block
        return jnp.concatenate([dense(dim, dim) for _ in range(4)], axis=1)

    def ln_p():
        return jnp.concatenate([jnp.ones((1, dim), jnp.float32),
                                jnp.zeros((1, dim), jnp.float32)], axis=0)   # [2, dim]

    def z(n):
        return jnp.zeros((1, n), jnp.float32)

    return {
        "embed": {"W": dense(pe, 2 * dim), "b": z(2 * dim)},   # sampler ++ backbone embed
        "encoder": {"sa_w": mha_w(), "sa_b": z(4 * dim), "ln1": ln_p(),
                    "W1": dense(dim, ffn_dim), "b1": z(ffn_dim),
                    "W2": dense(ffn_dim, dim), "b2": z(dim), "ln2": ln_p()},
        "decoder": {"sa_w": mha_w(), "sa_b": z(4 * dim), "ln1": ln_p(),
                    "ca_w": mha_w(), "ca_b": z(4 * dim), "ln2": ln_p(),
                    "W1": dense(dim, ffn_dim), "b1": z(ffn_dim),
                    "W2": dense(ffn_dim, dim), "b2": z(dim), "ln3": ln_p()},
        "head": {"W": dense(dim, 3 * patch * patch), "b": z(3 * patch * patch)},
    }


if __name__ == "__main__":
    key = jax.random.PRNGKey(0)
    kx, kp = jax.random.split(key)
    B, H, W = 2, 32, 32
    x = jax.random.normal(kx, (B, IN_CH, H, W), jnp.float32)
    mask = jnp.zeros((B, H, W), dtype=bool)   # no padding
    params = init_params(kp)
    src_pos, tgt_pos = precompute_positions(B, H, W)   # static constants, outside jit

    fwd = jax.jit(generator_inptrans_forward)
    out = fwd(x, mask, src_pos, tgt_pos, params)
    jax.block_until_ready(out)
    assert out.shape == (B, 3, H, W), out.shape
    assert jnp.isfinite(out).all()
    print("KERNEL_OK")
</pallas_src>

<mosaic_0001>
module attributes {stable_mosaic.version = 11 : i64} {
  func.func @_linear_kernel(%arg0: i32, %arg1: memref<32x192xf32, #tpu.memory_space<vmem>>, %arg2: memref<192x64xf32, #tpu.memory_space<vmem>>, %arg3: memref<1x64xf32, #tpu.memory_space<vmem>>, %arg4: memref<32x64xf32, #tpu.memory_space<vmem>>) attributes {dimension_semantics = [#tpu.dimension_semantics<arbitrary>], iteration_bounds = array<i64: 1>, scalar_prefetch = 0 : i64, scratch_operands = 0 : i64, tpu.core_type = #tpu.core_type<tc>, window_params = [{pipeline_mode = #tpu.pipeline_mode<synchronous>, transform_indices = @transform_0, window_bounds = array<i64: 32, 192>}, {pipeline_mode = #tpu.pipeline_mode<synchronous>, transform_indices = @transform_1, window_bounds = array<i64: 192, 64>}, {pipeline_mode = #tpu.pipeline_mode<synchronous>, transform_indices = @transform_2, window_bounds = array<i64: 1, 64>}, {pipeline_mode = #tpu.pipeline_mode<synchronous>, transform_indices = @transform_3, window_bounds = array<i64: 32, 64>}]} {
    %c0 = arith.constant 0 : index
    %c0_0 = arith.constant 0 : index
    %0 = vector.load %arg1[%c0, %c0_0] : memref<32x192xf32, #tpu.memory_space<vmem>>, vector<32x192xf32>
    %c0_1 = arith.constant 0 : index
    %c0_2 = arith.constant 0 : index
    %1 = vector.load %arg2[%c0_1, %c0_2] : memref<192x64xf32, #tpu.memory_space<vmem>>, vector<192x64xf32>
    %cst = arith.constant dense<0.000000e+00> : vector<32x64xf32>
    %2 = tpu.matmul %0, %1, %cst {dimension_numbers = #tpu.dot_dimension_numbers<[1], [0], [0], [1], [0, 0, 1, 1], [], []>} : vector<32x192xf32>, vector<192x64xf32>, vector<32x64xf32> -> vector<32x64xf32>
    %c0_3 = arith.constant 0 : index
    %c0_4 = arith.constant 0 : index
    %3 = vector.load %arg3[%c0_3, %c0_4] : memref<1x64xf32, #tpu.memory_space<vmem>>, vector<1x64xf32>
    %4 = vector.broadcast %3 : vector<1x64xf32> to vector<32x64xf32>
    %5 = arith.addf %2, %4 : vector<32x64xf32>
    %c0_5 = arith.constant 0 : index
    %c0_6 = arith.constant 0 : index
    %6 = vector.load %arg4[%c0_5, %c0_6] : memref<32x64xf32, #tpu.memory_space<vmem>>, vector<32x64xf32>
    tpu.vector_store %arg4[%c0_5, %c0_6], %5 {strides = array<i32>} : memref<32x64xf32, #tpu.memory_space<vmem>>, vector<32x64xf32>,
    return
  }
  func.func @transform_0(%arg0: i32) -> (i32, i32) {
    %c0_i32 = arith.constant 0 : i32
    %c0_i32_0 = arith.constant 0 : i32
    %c0_i32_1 = arith.constant 0 : i32
    return %c0_i32, %c0_i32_0 : i32, i32
  }
  func.func @transform_1(%arg0: i32) -> (i32, i32) {
    %c0_i32 = arith.constant 0 : i32
    %c0_i32_0 = arith.constant 0 : i32
    %c0_i32_1 = arith.constant 0 : i32
    return %c0_i32, %c0_i32_0 : i32, i32
  }
  func.func @transform_2(%arg0: i32) -> (i32, i32) {
    %c0_i32 = arith.constant 0 : i32
    %c0_i32_0 = arith.constant 0 : i32
    %c0_i32_1 = arith.constant 0 : i32
    return %c0_i32, %c0_i32_0 : i32, i32
  }
  func.func @transform_3(%arg0: i32) -> (i32, i32) {
    %c0_i32 = arith.constant 0 : i32
    %c0_i32_0 = arith.constant 0 : i32
    %c0_i32_1 = arith.constant 0 : i32
    return %c0_i32, %c0_i32_0 : i32, i32
  }
}

module attributes {stable_mosaic.version = 11 : i64} {
  func.func @_mha_block_kernel(%arg0: i32, %arg1: memref<1x16x32xf32, #tpu.memory_space<vmem>>, %arg2: memref<1x16x32xf32, #tpu.memory_space<vmem>>, %arg3: memref<1x16x32xf32, #tpu.memory_space<vmem>>, %arg4: memref<1x16x32xf32, #tpu.memory_space<vmem>>, %arg5: memref<1x1x16xf32, #tpu.memory_space<vmem>>, %arg6: memref<32x128xf32, #tpu.memory_space<vmem>>, %arg7: memref<1x128xf32, #tpu.memory_space<vmem>>, %arg8: memref<2x32xf32, #tpu.memory_space<vmem>>, %arg9: memref<1x16x32xf32, #tpu.memory_space<vmem>>) attributes {dimension_semantics = [#tpu.dimension_semantics<parallel>], iteration_bounds = array<i64: 2>, scalar_prefetch = 0 : i64, scratch_operands = 0 : i64, tpu.core_type = #tpu.core_type<tc>, window_params = [{transform_indices = @transform_0, window_bounds = array<i64: 1, 16, 32>}, {transform_indices = @transform_1, window_bounds = array<i64: 1, 16, 32>}, {transform_indices = @transform_2, window_bounds = array<i64: 1, 16, 32>}, {transform_indices = @transform_3, window_bounds = array<i64: 1, 16, 32>}, {transform_indices = @transform_4, window_bounds = array<i64: 1, 1, 16>}, {pipeline_mode = #tpu.pipeline_mode<synchronous>, transform_indices = @transform_5, window_bounds = array<i64: 32, 128>}, {pipeline_mode = #tpu.pipeline_mode<synchronous>, transform_indices = @transform_6, window_bounds = array<i64: 1, 128>}, {pipeline_mode = #tpu.pipeline_mode<synchronous>, transform_indices = @transform_7, window_bounds = array<i64: 2, 32>}, {transform_indices = @transform_8, window_bounds = array<i64: 1, 16, 32>}]} {
    %c0 = arith.constant 0 : index
    %c0_0 = arith.constant 0 : index
    %c0_1 = arith.constant 0 : index
    %0 = vector.load %arg1[%c0, %c0_0, %c0_1] : memref<1x16x32xf32, #tpu.memory_space<vmem>>, vector<1x16x32xf32>
    %1 = vector.shape_cast %0 : vector<1x16x32xf32> to vector<16x32xf32>
    %c0_2 = arith.constant 0 : index
    %c0_3 = arith.constant 0 : index
    %c0_4 = arith.constant 0 : index
    %2 = vector.load %arg2[%c0_2, %c0_3, %c0_4] : memref<1x16x32xf32, #tpu.memory_space<vmem>>, vector<1x16x32xf32>
    %3 = vector.shape_cast %2 : vector<1x16x32xf32> to vector<16x32xf32>
    %4 = arith.addf %1, %3 : vector<16x32xf32>
    %c0_5 = arith.constant 0 : index
    %c0_6 = arith.constant 0 : index
    %c0_7 = arith.constant 0 : index
    %5 = vector.load %arg3[%c0_5, %c0_6, %c0_7] : memref<1x16x32xf32, #tpu.memory_space<vmem>>, vector<1x16x32xf32>
    %6 = vector.shape_cast %5 : vector<1x16x32xf32> to vector<16x32xf32>
    %c0_8 = arith.constant 0 : index
    %c0_9 = arith.constant 0 : index
    %c0_10 = arith.constant 0 : index
    %7 = vector.load %arg4[%c0_8, %c0_9, %c0_10] : memref<1x16x32xf32, #tpu.memory_space<vmem>>, vector<1x16x32xf32>
    %8 = vector.shape_cast %7 : vector<1x16x32xf32> to vector<16x32xf32>
    %9 = arith.addf %6, %8 : vector<16x32xf32>
    %c0_11 = arith.constant 0 : index
    %c0_12 = arith.constant 0 : index
    %10 = vector.load %arg6[%c0_11, %c0_12] : memref<32x128xf32, #tpu.memory_space<vmem>>, vector<32x128xf32>
    %c0_13 = arith.constant 0 : index
    %c0_14 = arith.constant 0 : index
    %11 = vector.load %arg7[%c0_13, %c0_14] : memref<1x128xf32, #tpu.memory_space<vmem>>, vector<1x128xf32>
    %12 = vector.extract_strided_slice %10 {offsets = [0, 0], sizes = [32, 32], strides = [1, 1]} : vector<32x128xf32> to vector<32x32xf32>
    %cst = arith.constant dense<0.000000e+00> : vector<16x32xf32>
    %13 = tpu.matmul %4, %12, %cst {dimension_numbers = #tpu.dot_dimension_numbers<[1], [0], [0], [1], [0, 0, 1, 1], [], []>} : vector<16x32xf32>, vector<32x32xf32>, vector<16x32xf32> -> vector<16x32xf32>
    %14 = vector.extract_strided_slice %11 {offsets = [0, 0], sizes = [1, 32], strides = [1, 1]} : vector<1x128xf32> to vector<1x32xf32>
    %15 = vector.broadcast %14 : vector<1x32xf32> to vector<16x32xf32>
    %16 = arith.addf %13, %15 : vector<16x32xf32>
    %17 = vector.extract_strided_slice %10 {offsets = [0, 32], sizes = [32, 32], strides = [1, 1]} : vector<32x128xf32> to vector<32x32xf32>
    %cst_15 = arith.constant dense<0.000000e+00> : vector<16x32xf32>
    %18 = tpu.matmul %9, %17, %cst_15 {dimension_numbers = #tpu.dot_dimension_numbers<[1], [0], [0], [1], [0, 0, 1, 1], [], []>} : vector<16x32xf32>, vector<32x32xf32>, vector<16x32xf32> -> vector<16x32xf32>
    %19 = vector.extract_strided_slice %11 {offsets = [0, 32], sizes = [1, 32], strides = [1, 1]} : vector<1x128xf32> to vector<1x32xf32>
    %20 = vector.broadcast %19 : vector<1x32xf32> to vector<16x32xf32>
    %21 = arith.addf %18, %20 : vector<16x32xf32>
    %22 = vector.extract_strided_slice %10 {offsets = [0, 64], sizes = [32, 32], strides = [1, 1]} : vector<32x128xf32> to vector<32x32xf32>
    %cst_16 = arith.constant dense<0.000000e+00> : vector<16x32xf32>
    %23 = tpu.matmul %6, %22, %cst_16 {dimension_numbers = #tpu.dot_dimension_numbers<[1], [0], [0], [1], [0, 0, 1, 1], [], []>} : vector<16x32xf32>, vector<32x32xf32>, vector<16x32xf32> -> vector<16x32xf32>
    %24 = vector.extract_strided_slice %11 {offsets = [0, 64], sizes = [1, 32], strides = [1, 1]} : vector<1x128xf32> to vector<1x32xf32>
    %25 = vector.broadcast %24 : vector<1x32xf32> to vector<16x32xf32>
    %26 = arith.addf %23, %25 : vector<16x32xf32>
    %27 = vector.extract_strided_slice %10 {offsets = [0, 96], sizes = [32, 32], strides = [1, 1]} : vector<32x128xf32> to vector<32x32xf32>
    %c0_17 = arith.constant 0 : index
    %c0_18 = arith.constant 0 : index
    %c0_19 = arith.constant 0 : index
    %28 = vector.load %arg5[%c0_17, %c0_18, %c0_19] : memref<1x1x16xf32, #tpu.memory_space<vmem>>, vector<1x1x16xf32>
    %29 = vector.shape_cast %28 : vector<1x1x16xf32> to vector<1x16xf32>
    %30 = vector.extract_strided_slice %16 {offsets = [0, 0], sizes = [16, 8], strides = [1, 1]} : vector<16x32xf32> to vector<16x8xf32>
    %31 = vector.extract_strided_slice %21 {offsets = [0, 0], sizes = [16, 8], strides = [1, 1]} : vector<16x32xf32> to vector<16x8xf32>
    %32 = vector.extract_strided_slice %26 {offsets = [0, 0], sizes = [16, 8], strides = [1, 1]} : vector<16x32xf32> to vector<16x8xf32>
    %cst_20 = arith.constant dense<0.000000e+00> : vector<16x16xf32>
    %33 = tpu.matmul %30, %31, %cst_20 {dimension_numbers = #tpu.dot_dimension_numbers<[1], [1], [0], [0], [0, 0, 1, 0], [], []>} : vector<16x8xf32>, vector<16x8xf32>, vector<16x16xf32> -> vector<16x16xf32>
    %cst_21 = arith.constant 0.353553385 : f32
    %34 = vector.broadcast %cst_21 : f32 to vector<16x16xf32>
    %35 = arith.mulf %33, %34 : vector<16x16xf32>
    %36 = vector.broadcast %29 : vector<1x16xf32> to vector<16x16xf32>
    %37 = arith.addf %35, %36 : vector<16x16xf32>
    %cst_22 = arith.constant dense<0xFF800000> : vector<16xf32>
    %38 = vector.multi_reduction <maximumf>, %37, %cst_22 [1] : vector<16x16xf32> to vector<16xf32>
    %39 = vector.shape_cast %38 : vector<16xf32> to vector<16x1xf32>
    %40 = vector.broadcast %39 : vector<16x1xf32> to vector<16x16xf32>
    %41 = arith.subf %37, %40 : vector<16x16xf32>
    %42 = math.exp %41 : vector<16x16xf32>
    %cst_23 = arith.constant dense<0.000000e+00> : vector<16xf32>
    %43 = vector.multi_reduction <add>, %42, %cst_23 [1] : vector<16x16xf32> to vector<16xf32>
    %44 = vector.shape_cast %43 : vector<16xf32> to vector<16x1xf32>
    %45 = tpu.reciprocal %44 {approx = true} : vector<16x1xf32> -> vector<16x1xf32>
    %46 = vector.broadcast %45 : vector<16x1xf32> to vector<16x16xf32>
    %47 = arith.mulf %42, %46 : vector<16x16xf32>
    %cst_24 = arith.constant dense<0.000000e+00> : vector<16x8xf32>
    %48 = tpu.matmul %47, %32, %cst_24 {dimension_numbers = #tpu.dot_dimension_numbers<[1], [0], [0], [1], [0, 0, 1, 1], [], []>} : vector<16x16xf32>, vector<16x8xf32>, vector<16x8xf32> -> vector<16x8xf32>
    %49 = vector.extract_strided_slice %27 {offsets = [0, 0], sizes = [8, 32], strides = [1, 1]} : vector<32x32xf32> to vector<8x32xf32>
    %cst_25 = arith.constant dense<0.000000e+00> : vector<16x32xf32>
    %50 = tpu.matmul %48, %49, %cst_25 {dimension_numbers = #tpu.dot_dimension_numbers<[1], [0], [0], [1], [0, 0, 1, 1], [], []>} : vector<16x8xf32>, vector<8x32xf32>, vector<16x32xf32> -> vector<16x32xf32>
    %51 = vector.extract_strided_slice %16 {offsets = [0, 8], sizes = [16, 8], strides = [1, 1]} : vector<16x32xf32> to vector<16x8xf32>
    %52 = vector.extract_strided_slice %21 {offsets = [0, 8], sizes = [16, 8], strides = [1, 1]} : vector<16x32xf32> to vector<16x8xf32>
    %53 = vector.extract_strided_slice %26 {offsets = [0, 8], sizes = [16, 8], strides = [1, 1]} : vector<16x32xf32> to vector<16x8xf32>
    %cst_26 = arith.constant dense<0.000000e+00> : vector<16x16xf32>
    %54 = tpu.matmul %51, %52, %cst_26 {dimension_numbers = #tpu.dot_dimension_numbers<[1], [1], [0], [0], [0, 0, 1, 0], [], []>} : vector<16x8xf32>, vector<16x8xf32>, vector<16x16xf32> -> vector<16x16xf32>
    %cst_27 = arith.constant 0.353553385 : f32
    %55 = vector.broadcast %cst_27 : f32 to vector<16x16xf32>
    %56 = arith.mulf %54, %55 : vector<16x16xf32>
    %57 = vector.broadcast %29 : vector<1x16xf32> to vector<16x16xf32>
    %58 = arith.addf %56, %57 : vector<16x16xf32>
    %cst_28 = arith.constant dense<0xFF800000> : vector<16xf32>
    %59 = vector.multi_reduction <maximumf>, %58, %cst_28 [1] : vector<16x16xf32> to vector<16xf32>
    %60 = vector.shape_cast %59 : vector<16xf32> to vector<16x1xf32>
    %61 = vector.broadcast %60 : vector<16x1xf32> to vector<16x16xf32>
    %62 = arith.subf %58, %61 : vector<16x16xf32>
    %63 = math.exp %62 : vector<16x16xf32>
    %cst_29 = arith.constant dense<0.000000e+00> : vector<16xf32>
    %64 = vector.multi_reduction <add>, %63, %cst_29 [1] : vector<16x16xf32> to vector<16xf32>
    %65 = vector.shape_cast %64 : vector<16xf32> to vector<16x1xf32>
    %66 = tpu.reciprocal %65 {approx = true} : vector<16x1xf32> -> vector<16x1xf32>
    %67 = vector.broadcast %66 : vector<16x1xf32> to vector<16x16xf32>
    %68 = arith.mulf %63, %67 : vector<16x16xf32>
    %cst_30 = arith.constant dense<0.000000e+00> : vector<16x8xf32>
    %69 = tpu.matmul %68, %53, %cst_30 {dimension_numbers = #tpu.dot_dimension_numbers<[1], [0], [0], [1], [0, 0, 1, 1], [], []>} : vector<16x16xf32>, vector<16x8xf32>, vector<16x8xf32> -> vector<16x8xf32>
    %70 = vector.extract_strided_slice %27 {offsets = [8, 0], sizes = [8, 32], strides = [1, 1]} : vector<32x32xf32> to vector<8x32xf32>
    %cst_31 = arith.constant dense<0.000000e+00> : vector<16x32xf32>
    %71 = tpu.matmul %69, %70, %cst_31 {dimension_numbers = #tpu.dot_dimension_numbers<[1], [0], [0], [1], [0, 0, 1, 1], [], []>} : vector<16x8xf32>, vector<8x32xf32>, vector<16x32xf32> -> vector<16x32xf32>
    %72 = arith.addf %50, %71 : vector<16x32xf32>
    %73 = vector.extract_strided_slice %16 {offsets = [0, 16], sizes = [16, 8], strides = [1, 1]} : vector<16x32xf32> to vector<16x8xf32>
    %74 = vector.extract_strided_slice %21 {offsets = [0, 16], sizes = [16, 8], strides = [1, 1]} : vector<16x32xf32> to vector<16x8xf32>
    %75 = vector.extract_strided_slice %26 {offsets = [0, 16], sizes = [16, 8], strides = [1, 1]} : vector<16x32xf32> to vector<16x8xf32>
    %cst_32 = arith.constant dense<0.000000e+00> : vector<16x16xf32>
    %76 = tpu.matmul %73, %74, %cst_32 {dimension_numbers = #tpu.dot_dimension_numbers<[1], [1], [0], [0], [0, 0, 1, 0], [], []>} : vector<16x8xf32>, vector<16x8xf32>, vector<16x16xf32> -> vector<16x16xf32>
    %cst_33 = arith.constant 0.353553385 : f32
    %77 = vector.broadcast %cst_33 : f32 to vector<16x16xf32>
    %78 = arith.mulf %76, %77 : vector<16x16xf32>
    %79 = vector.broadcast %29 : vector<1x16xf32> to vector<16x16xf32>
    %80 = arith.addf %78, %79 : vector<16x16xf32>
    %cst_34 = arith.constant dense<0xFF800000> : vector<16xf32>
    %81 = vector.multi_reduction <maximumf>, %80, %cst_34 [1] : vector<16x16xf32> to vector<16xf32>
    %82 = vector.shape_cast %81 : vector<16xf32> to vector<16x1xf32>
    %83 = vector.broadcast %82 : vector<16x1xf32> to vector<16x16xf32>
    %84 = arith.subf %80, %83 : vector<16x16xf32>
    %85 = math.exp %84 : vector<16x16xf32>
    %cst_35 = arith.constant dense<0.000000e+00> : vector<16xf32>
    %86 = vector.multi_reduction <add>, %85, %cst_35 [1] : vector<16x16xf32> to vector<16xf32>
    %87 = vector.shape_cast %86 : vector<16xf32> to vector<16x1xf32>
    %88 = tpu.reciprocal %87 {approx = true} : vector<16x1xf32> -> vector<16x1xf32>
    %89 = vector.broadcast %88 : vector<16x1xf32> to vector<16x16xf32>
    %90 = arith.mulf %85, %89 : vector<16x16xf32>
    %cst_36 = arith.constant dense<0.000000e+00> : vector<16x8xf32>
    %91 = tpu.matmul %90, %75, %cst_36 {dimension_numbers = #tpu.dot_dimension_numbers<[1], [0], [0], [1], [0, 0, 1, 1], [], []>} : vector<16x16xf32>, vector<16x8xf32>, vector<16x8xf32> -> vector<16x8xf32>
    %92 = vector.extract_strided_slice %27 {offsets = [16, 0], sizes = [8, 32], strides = [1, 1]} : vector<32x32xf32> to vector<8x32xf32>
    %cst_37 = arith.constant dense<0.000000e+00> : vector<16x32xf32>
    %93 = tpu.matmul %91, %92, %cst_37 {dimension_numbers = #tpu.dot_dimension_numbers<[1], [0], [0], [1], [0, 0, 1, 1], [], []>} : vector<16x8xf32>, vector<8x32xf32>, vector<16x32xf32> -> vector<16x32xf32>
    %94 = arith.addf %72, %93 : vector<16x32xf32>
    %95 = vector.extract_strided_slice %16 {offsets = [0, 24], sizes = [16, 8], strides = [1, 1]} : vector<16x32xf32> to vector<16x8xf32>
    %96 = vector.extract_strided_slice %21 {offsets = [0, 24], sizes = [16, 8], strides = [1, 1]} : vector<16x32xf32> to vector<16x8xf32>
    %97 = vector.extract_strided_slice %26 {offsets = [0, 24], sizes = [16, 8], strides = [1, 1]} : vector<16x32xf32> to vector<16x8xf32>
    %cst_38 = arith.constant dense<0.000000e+00> : vector<16x16xf32>
    %98 = tpu.matmul %95, %96, %cst_38 {dimension_numbers = #tpu.dot_dimension_numbers<[1], [1], [0], [0], [0, 0, 1, 0], [], []>} : vector<16x8xf32>, vector<16x8xf32>, vector<16x16xf32> -> vector<16x16xf32>
    %cst_39 = arith.constant 0.353553385 : f32
    %99 = vector.broadcast %cst_39 : f32 to vector<16x16xf32>
    %100 = arith.mulf %98, %99 : vector<16x16xf32>
    %101 = vector.broadcast %29 : vector<1x16xf32> to vector<16x16xf32>
    %102 = arith.addf %100, %101 : vector<16x16xf32>
    %cst_40 = arith.constant dense<0xFF800000> : vector<16xf32>
    %103 = vector.multi_reduction <maximumf>, %102, %cst_40 [1] : vector<16x16xf32> to vector<16xf32>
    %104 = vector.shape_cast %103 : vector<16xf32> to vector<16x1xf32>
    %105 = vector.broadcast %104 : vector<16x1xf32> to vector<16x16xf32>
    %106 = arith.subf %102, %105 : vector<16x16xf32>
    %107 = math.exp %106 : vector<16x16xf32>
    %cst_41 = arith.constant dense<0.000000e+00> : vector<16xf32>
    %108 = vector.multi_reduction <add>, %107, %cst_41 [1] : vector<16x16xf32> to vector<16xf32>
    %109 = vector.shape_cast %108 : vector<16xf32> to vector<16x1xf32>
    %110 = tpu.reciprocal %109 {approx = true} : vector<16x1xf32> -> vector<16x1xf32>
    %111 = vector.broadcast %110 : vector<16x1xf32> to vector<16x16xf32>
    %112 = arith.mulf %107, %111 : vector<16x16xf32>
    %cst_42 = arith.constant dense<0.000000e+00> : vector<16x8xf32>
    %113 = tpu.matmul %112, %97, %cst_42 {dimension_numbers = #tpu.dot_dimension_numbers<[1], [0], [0], [1], [0, 0, 1, 1], [], []>} : vector<16x16xf32>, vector<16x8xf32>, vector<16x8xf32> -> vector<16x8xf32>
    %114 = vector.extract_strided_slice %27 {offsets = [24, 0], sizes = [8, 32], strides = [1, 1]} : vector<32x32xf32> to vector<8x32xf32>
    %cst_43 = arith.constant dense<0.000000e+00> : vector<16x32xf32>
    %115 = tpu.matmul %113, %114, %cst_43 {dimension_numbers = #tpu.dot_dimension_numbers<[1], [0], [0], [1], [0, 0, 1, 1], [], []>} : vector<16x8xf32>, vector<8x32xf32>, vector<16x32xf32> -> vector<16x32xf32>
    %116 = arith.addf %94, %115 : vector<16x32xf32>
    %117 = arith.addf %1, %116 : vector<16x32xf32>
    %118 = vector.extract_strided_slice %11 {offsets = [0, 96], sizes = [1, 32], strides = [1, 1]} : vector<1x128xf32> to vector<1x32xf32>
    %119 = vector.broadcast %118 : vector<1x32xf32> to vector<16x32xf32>
    %120 = arith.addf %117, %119 : vector<16x32xf32>
    %cst_44 = arith.constant dense<0.000000e+00> : vector<16xf32>
    %121 = vector.multi_reduction <add>, %120, %cst_44 [1] : vector<16x32xf32> to vector<16xf32>
    %122 = vector.shape_cast %121 : vector<16xf32> to vector<16x1xf32>
    %cst_45 = arith.constant 3.200000e+01 : f32
    %123 = vector.broadcast %cst_45 : f32 to vector<16x1xf32>
    %124 = arith.divf %122, %123 : vector<16x1xf32>
    %125 = vector.broadcast %124 : vector<16x1xf32> to vector<16x32xf32>
    %126 = arith.subf %120, %125 : vector<16x32xf32>
    %127 = arith.mulf %126, %126 : vector<16x32xf32>
    %cst_46 = arith.constant dense<0.000000e+00> : vector<16xf32>
    %128 = vector.multi_reduction <add>, %127, %cst_46 [1] : vector<16x32xf32> to vector<16xf32>
    %129 = vector.shape_cast %128 : vector<16xf32> to vector<16x1xf32>
    %cst_47 = arith.constant 3.200000e+01 : f32
    %130 = vector.broadcast %cst_47 : f32 to vector<16x1xf32>
    %131 = arith.divf %129, %130 : vector<16x1xf32>
    %c0_48 = arith.constant 0 : index
    %c0_49 = arith.constant 0 : index
    %132 = vector.load %arg8[%c0_48, %c0_49] : memref<2x32xf32, #tpu.memory_space<vmem>>, vector<2x32xf32>
    %cst_50 = arith.constant 9.99999974E-6 : f32
    %133 = vector.broadcast %cst_50 : f32 to vector<16x1xf32>
    %134 = arith.addf %131, %133 : vector<16x1xf32>
    %135 = math.rsqrt %134 : vector<16x1xf32>
    %136 = vector.broadcast %135 : vector<16x1xf32> to vector<16x32xf32>
    %137 = arith.mulf %126, %136 : vector<16x32xf32>
    %138 = vector.extract_strided_slice %132 {offsets = [0, 0], sizes = [1, 32], strides = [1, 1]} : vector<2x32xf32> to vector<1x32xf32>
    %139 = vector.broadcast %138 : vector<1x32xf32> to vector<16x32xf32>
    %140 = arith.mulf %137, %139 : vector<16x32xf32>
    %141 = vector.extract_strided_slice %132 {offsets = [1, 0], sizes = [1, 32], strides = [1, 1]} : vector<2x32xf32> to vector<1x32xf32>
    %142 = vector.broadcast %141 : vector<1x32xf32> to vector<16x32xf32>
    %143 = arith.addf %140, %142 : vector<16x32xf32>
    %c0_51 = arith.constant 0 : index
    %c0_52 = arith.constant 0 : index
    %c0_53 = arith.constant 0 : index
    %144 = vector.load %arg9[%c0_51, %c0_52, %c0_53] : memref<1x16x32xf32, #tpu.memory_space<vmem>>, vector<1x16x32xf32>
    %145 = vector.shape_cast %144 : vector<1x16x32xf32> to vector<16x32xf32>
    %146 = vector.shape_cast %143 : vector<16x32xf32> to vector<1x16x32xf32>
    tpu.vector_store %arg9[%c0_51, %c0_52, %c0_53], %146 {strides = array<i32>} : memref<1x16x32xf32, #tpu.memory_space<vmem>>, vector<1x16x32xf32>,
    return
  }
  func.func @transform_0(%arg0: i32) -> (i32, i32, i32) {
    %c0_i32 = arith.constant 0 : i32
    %c0_i32_0 = arith.constant 0 : i32
    %c0_i32_1 = arith.constant 0 : i32
    return %arg0, %c0_i32, %c0_i32_0 : i32, i32, i32
  }
  func.func @transform_1(%arg0: i32) -> (i32, i32, i32) {
    %c0_i32 = arith.constant 0 : i32
    %c0_i32_0 = arith.constant 0 : i32
    %c0_i32_1 = arith.constant 0 : i32
    return %arg0, %c0_i32, %c0_i32_0 : i32, i32, i32
  }
  func.func @transform_2(%arg0: i32) -> (i32, i32, i32) {
    %c0_i32 = arith.constant 0 : i32
    %c0_i32_0 = arith.constant 0 : i32
    %c0_i32_1 = arith.constant 0 : i32
    return %arg0, %c0_i32, %c0_i32_0 : i32, i32, i32
  }
  func.func @transform_3(%arg0: i32) -> (i32, i32, i32) {
    %c0_i32 = arith.constant 0 : i32
    %c0_i32_0 = arith.constant 0 : i32
    %c0_i32_1 = arith.constant 0 : i32
    return %arg0, %c0_i32, %c0_i32_0 : i32, i32, i32
  }
  func.func @transform_4(%arg0: i32) -> (i32, i32, i32) {
    %c0_i32 = arith.constant 0 : i32
    %c0_i32_0 = arith.constant 0 : i32
    %c0_i32_1 = arith.constant 0 : i32
    return %arg0, %c0_i32, %c0_i32_0 : i32, i32, i32
  }
  func.func @transform_5(%arg0: i32) -> (i32, i32) {
    %c0_i32 = arith.constant 0 : i32
    %c0_i32_0 = arith.constant 0 : i32
    %c0_i32_1 = arith.constant 0 : i32
    return %c0_i32, %c0_i32_0 : i32, i32
  }
  func.func @transform_6(%arg0: i32) -> (i32, i32) {
    %c0_i32 = arith.constant 0 : i32
    %c0_i32_0 = arith.constant 0 : i32
    %c0_i32_1 = arith.constant 0 : i32
    return %c0_i32, %c0_i32_0 : i32, i32
  }
  func.func @transform_7(%arg0: i32) -> (i32, i32) {
    %c0_i32 = arith.constant 0 : i32
    %c0_i32_0 = arith.constant 0 : i32
    %c0_i32_1 = arith.constant 0 : i32
    return %c0_i32, %c0_i32_0 : i32, i32
  }
  func.func @transform_8(%arg0: i32) -> (i32, i32, i32) {
    %c0_i32 = arith.constant 0 : i32
    %c0_i32_0 = arith.constant 0 : i32
    %c0_i32_1 = arith.constant 0 : i32
    return %arg0, %c0_i32, %c0_i32_0 : i32, i32, i32
  }
}

module attributes {stable_mosaic.version = 11 : i64} {
  func.func @_mha_block_kernel(%arg0: i32, %arg1: memref<1x16x32xf32, #tpu.memory_space<vmem>>, %arg2: memref<1x16x32xf32, #tpu.memory_space<vmem>>, %arg3: memref<1x16x32xf32, #tpu.memory_space<vmem>>, %arg4: memref<1x16x32xf32, #tpu.memory_space<vmem>>, %arg5: memref<32x128xf32, #tpu.memory_space<vmem>>, %arg6: memref<1x128xf32, #tpu.memory_space<vmem>>, %arg7: memref<2x32xf32, #tpu.memory_space<vmem>>, %arg8: memref<1x16x32xf32, #tpu.memory_space<vmem>>) attributes {dimension_semantics = [#tpu.dimension_semantics<parallel>], iteration_bounds = array<i64: 2>, scalar_prefetch = 0 : i64, scratch_operands = 0 : i64, tpu.core_type = #tpu.core_type<tc>, window_params = [{transform_indices = @transform_0, window_bounds = array<i64: 1, 16, 32>}, {transform_indices = @transform_1, window_bounds = array<i64: 1, 16, 32>}, {transform_indices = @transform_2, window_bounds = array<i64: 1, 16, 32>}, {transform_indices = @transform_3, window_bounds = array<i64: 1, 16, 32>}, {pipeline_mode = #tpu.pipeline_mode<synchronous>, transform_indices = @transform_4, window_bounds = array<i64: 32, 128>}, {pipeline_mode = #tpu.pipeline_mode<synchronous>, transform_indices = @transform_5, window_bounds = array<i64: 1, 128>}, {pipeline_mode = #tpu.pipeline_mode<synchronous>, transform_indices = @transform_6, window_bounds = array<i64: 2, 32>}, {transform_indices = @transform_7, window_bounds = array<i64: 1, 16, 32>}]} {
    %c0 = arith.constant 0 : index
    %c0_0 = arith.constant 0 : index
    %c0_1 = arith.constant 0 : index
    %0 = vector.load %arg1[%c0, %c0_0, %c0_1] : memref<1x16x32xf32, #tpu.memory_space<vmem>>, vector<1x16x32xf32>
    %1 = vector.shape_cast %0 : vector<1x16x32xf32> to vector<16x32xf32>
    %c0_2 = arith.constant 0 : index
    %c0_3 = arith.constant 0 : index
    %c0_4 = arith.constant 0 : index
    %2 = vector.load %arg2[%c0_2, %c0_3, %c0_4] : memref<1x16x32xf32, #tpu.memory_space<vmem>>, vector<1x16x32xf32>
    %3 = vector.shape_cast %2 : vector<1x16x32xf32> to vector<16x32xf32>
    %4 = arith.addf %1, %3 : vector<16x32xf32>
    %c0_5 = arith.constant 0 : index
    %c0_6 = arith.constant 0 : index
    %c0_7 = arith.constant 0 : index
    %5 = vector.load %arg3[%c0_5, %c0_6, %c0_7] : memref<1x16x32xf32, #tpu.memory_space<vmem>>, vector<1x16x32xf32>
    %6 = vector.shape_cast %5 : vector<1x16x32xf32> to vector<16x32xf32>
    %c0_8 = arith.constant 0 : index
    %c0_9 = arith.constant 0 : index
    %c0_10 = arith.constant 0 : index
    %7 = vector.load %arg4[%c0_8, %c0_9, %c0_10] : memref<1x16x32xf32, #tpu.memory_space<vmem>>, vector<1x16x32xf32>
    %8 = vector.shape_cast %7 : vector<1x16x32xf32> to vector<16x32xf32>
    %9 = arith.addf %6, %8 : vector<16x32xf32>
    %c0_11 = arith.constant 0 : index
    %c0_12 = arith.constant 0 : index
    %10 = vector.load %arg5[%c0_11, %c0_12] : memref<32x128xf32, #tpu.memory_space<vmem>>, vector<32x128xf32>
    %c0_13 = arith.constant 0 : index
    %c0_14 = arith.constant 0 : index
    %11 = vector.load %arg6[%c0_13, %c0_14] : memref<1x128xf32, #tpu.memory_space<vmem>>, vector<1x128xf32>
    %12 = vector.extract_strided_slice %10 {offsets = [0, 0], sizes = [32, 32], strides = [1, 1]} : vector<32x128xf32> to vector<32x32xf32>
    %cst = arith.constant dense<0.000000e+00> : vector<16x32xf32>
    %13 = tpu.matmul %4, %12, %cst {dimension_numbers = #tpu.dot_dimension_numbers<[1], [0], [0], [1], [0, 0, 1, 1], [], []>} : vector<16x32xf32>, vector<32x32xf32>, vector<16x32xf32> -> vector<16x32xf32>
    %14 = vector.extract_strided_slice %11 {offsets = [0, 0], sizes = [1, 32], strides = [1, 1]} : vector<1x128xf32> to vector<1x32xf32>
    %15 = vector.broadcast %14 : vector<1x32xf32> to vector<16x32xf32>
    %16 = arith.addf %13, %15 : vector<16x32xf32>
    %17 = vector.extract_strided_slice %10 {offsets = [0, 32], sizes = [32, 32], strides = [1, 1]} : vector<32x128xf32> to vector<32x32xf32>
    %cst_15 = arith.constant dense<0.000000e+00> : vector<16x32xf32>
    %18 = tpu.matmul %9, %17, %cst_15 {dimension_numbers = #tpu.dot_dimension_numbers<[1], [0], [0], [1], [0, 0, 1, 1], [], []>} : vector<16x32xf32>, vector<32x32xf32>, vector<16x32xf32> -> vector<16x32xf32>
    %19 = vector.extract_strided_slice %11 {offsets = [0, 32], sizes = [1, 32], strides = [1, 1]} : vector<1x128xf32> to vector<1x32xf32>
    %20 = vector.broadcast %19 : vector<1x32xf32> to vector<16x32xf32>
    %21 = arith.addf %18, %20 : vector<16x32xf32>
    %22 = vector.extract_strided_slice %10 {offsets = [0, 64], sizes = [32, 32], strides = [1, 1]} : vector<32x128xf32> to vector<32x32xf32>
    %cst_16 = arith.constant dense<0.000000e+00> : vector<16x32xf32>
    %23 = tpu.matmul %6, %22, %cst_16 {dimension_numbers = #tpu.dot_dimension_numbers<[1], [0], [0], [1], [0, 0, 1, 1], [], []>} : vector<16x32xf32>, vector<32x32xf32>, vector<16x32xf32> -> vector<16x32xf32>
    %24 = vector.extract_strided_slice %11 {offsets = [0, 64], sizes = [1, 32], strides = [1, 1]} : vector<1x128xf32> to vector<1x32xf32>
    %25 = vector.broadcast %24 : vector<1x32xf32> to vector<16x32xf32>
    %26 = arith.addf %23, %25 : vector<16x32xf32>
    %27 = vector.extract_strided_slice %10 {offsets = [0, 96], sizes = [32, 32], strides = [1, 1]} : vector<32x128xf32> to vector<32x32xf32>
    %28 = vector.extract_strided_slice %16 {offsets = [0, 0], sizes = [16, 8], strides = [1, 1]} : vector<16x32xf32> to vector<16x8xf32>
    %29 = vector.extract_strided_slice %21 {offsets = [0, 0], sizes = [16, 8], strides = [1, 1]} : vector<16x32xf32> to vector<16x8xf32>
    %30 = vector.extract_strided_slice %26 {offsets = [0, 0], sizes = [16, 8], strides = [1, 1]} : vector<16x32xf32> to vector<16x8xf32>
    %cst_17 = arith.constant dense<0.000000e+00> : vector<16x16xf32>
    %31 = tpu.matmul %28, %29, %cst_17 {dimension_numbers = #tpu.dot_dimension_numbers<[1], [1], [0], [0], [0, 0, 1, 0], [], []>} : vector<16x8xf32>, vector<16x8xf32>, vector<16x16xf32> -> vector<16x16xf32>
    %cst_18 = arith.constant 0.353553385 : f32
    %32 = vector.broadcast %cst_18 : f32 to vector<16x16xf32>
    %33 = arith.mulf %31, %32 : vector<16x16xf32>
    %cst_19 = arith.constant dense<0xFF800000> : vector<16xf32>
    %34 = vector.multi_reduction <maximumf>, %33, %cst_19 [1] : vector<16x16xf32> to vector<16xf32>
    %35 = vector.shape_cast %34 : vector<16xf32> to vector<16x1xf32>
    %36 = vector.broadcast %35 : vector<16x1xf32> to vector<16x16xf32>
    %37 = arith.subf %33, %36 : vector<16x16xf32>
    %38 = math.exp %37 : vector<16x16xf32>
    %cst_20 = arith.constant dense<0.000000e+00> : vector<16xf32>
    %39 = vector.multi_reduction <add>, %38, %cst_20 [1] : vector<16x16xf32> to vector<16xf32>
    %40 = vector.shape_cast %39 : vector<16xf32> to vector<16x1xf32>
    %41 = tpu.reciprocal %40 {approx = true} : vector<16x1xf32> -> vector<16x1xf32>
    %42 = vector.broadcast %41 : vector<16x1xf32> to vector<16x16xf32>
    %43 = arith.mulf %38, %42 : vector<16x16xf32>
    %cst_21 = arith.constant dense<0.000000e+00> : vector<16x8xf32>
    %44 = tpu.matmul %43, %30, %cst_21 {dimension_numbers = #tpu.dot_dimension_numbers<[1], [0], [0], [1], [0, 0, 1, 1], [], []>} : vector<16x16xf32>, vector<16x8xf32>, vector<16x8xf32> -> vector<16x8xf32>
    %45 = vector.extract_strided_slice %27 {offsets = [0, 0], sizes = [8, 32], strides = [1, 1]} : vector<32x32xf32> to vector<8x32xf32>
    %cst_22 = arith.constant dense<0.000000e+00> : vector<16x32xf32>
    %46 = tpu.matmul %44, %45, %cst_22 {dimension_numbers = #tpu.dot_dimension_numbers<[1], [0], [0], [1], [0, 0, 1, 1], [], []>} : vector<16x8xf32>, vector<8x32xf32>, vector<16x32xf32> -> vector<16x32xf32>
    %47 = vector.extract_strided_slice %16 {offsets = [0, 8], sizes = [16, 8], strides = [1, 1]} : vector<16x32xf32> to vector<16x8xf32>
    %48 = vector.extract_strided_slice %21 {offsets = [0, 8], sizes = [16, 8], strides = [1, 1]} : vector<16x32xf32> to vector<16x8xf32>
    %49 = vector.extract_strided_slice %26 {offsets = [0, 8], sizes = [16, 8], strides = [1, 1]} : vector<16x32xf32> to vector<16x8xf32>
    %cst_23 = arith.constant dense<0.000000e+00> : vector<16x16xf32>
    %50 = tpu.matmul %47, %48, %cst_23 {dimension_numbers = #tpu.dot_dimension_numbers<[1], [1], [0], [0], [0, 0, 1, 0], [], []>} : vector<16x8xf32>, vector<16x8xf32>, vector<16x16xf32> -> vector<16x16xf32>
    %cst_24 = arith.constant 0.353553385 : f32
    %51 = vector.broadcast %cst_24 : f32 to vector<16x16xf32>
    %52 = arith.mulf %50, %51 : vector<16x16xf32>
    %cst_25 = arith.constant dense<0xFF800000> : vector<16xf32>
    %53 = vector.multi_reduction <maximumf>, %52, %cst_25 [1] : vector<16x16xf32> to vector<16xf32>
    %54 = vector.shape_cast %53 : vector<16xf32> to vector<16x1xf32>
    %55 = vector.broadcast %54 : vector<16x1xf32> to vector<16x16xf32>
    %56 = arith.subf %52, %55 : vector<16x16xf32>
    %57 = math.exp %56 : vector<16x16xf32>
    %cst_26 = arith.constant dense<0.000000e+00> : vector<16xf32>
    %58 = vector.multi_reduction <add>, %57, %cst_26 [1] : vector<16x16xf32> to vector<16xf32>
    %59 = vector.shape_cast %58 : vector<16xf32> to vector<16x1xf32>
    %60 = tpu.reciprocal %59 {approx = true} : vector<16x1xf32> -> vector<16x1xf32>
    %61 = vector.broadcast %60 : vector<16x1xf32> to vector<16x16xf32>
    %62 = arith.mulf %57, %61 : vector<16x16xf32>
    %cst_27 = arith.constant dense<0.000000e+00> : vector<16x8xf32>
    %63 = tpu.matmul %62, %49, %cst_27 {dimension_numbers = #tpu.dot_dimension_numbers<[1], [0], [0], [1], [0, 0, 1, 1], [], []>} : vector<16x16xf32>, vector<16x8xf32>, vector<16x8xf32> -> vector<16x8xf32>
    %64 = vector.extract_strided_slice %27 {offsets = [8, 0], sizes = [8, 32], strides = [1, 1]} : vector<32x32xf32> to vector<8x32xf32>
    %cst_28 = arith.constant dense<0.000000e+00> : vector<16x32xf32>
    %65 = tpu.matmul %63, %64, %cst_28 {dimension_numbers = #tpu.dot_dimension_numbers<[1], [0], [0], [1], [0, 0, 1, 1], [], []>} : vector<16x8xf32>, vector<8x32xf32>, vector<16x32xf32> -> vector<16x32xf32>
    %66 = arith.addf %46, %65 : vector<16x32xf32>
    %67 = vector.extract_strided_slice %16 {offsets = [0, 16], sizes = [16, 8], strides = [1, 1]} : vector<16x32xf32> to vector<16x8xf32>
    %68 = vector.extract_strided_slice %21 {offsets = [0, 16], sizes = [16, 8], strides = [1, 1]} : vector<16x32xf32> to vector<16x8xf32>
    %69 = vector.extract_strided_slice %26 {offsets = [0, 16], sizes = [16, 8], strides = [1, 1]} : vector<16x32xf32> to vector<16x8xf32>
    %cst_29 = arith.constant dense<0.000000e+00> : vector<16x16xf32>
    %70 = tpu.matmul %67, %68, %cst_29 {dimension_numbers = #tpu.dot_dimension_numbers<[1], [1], [0], [0], [0, 0, 1, 0], [], []>} : vector<16x8xf32>, vector<16x8xf32>, vector<16x16xf32> -> vector<16x16xf32>
    %cst_30 = arith.constant 0.353553385 : f32
    %71 = vector.broadcast %cst_30 : f32 to vector<16x16xf32>
    %72 = arith.mulf %70, %71 : vector<16x16xf32>
    %cst_31 = arith.constant dense<0xFF800000> : vector<16xf32>
    %73 = vector.multi_reduction <maximumf>, %72, %cst_31 [1] : vector<16x16xf32> to vector<16xf32>
    %74 = vector.shape_cast %73 : vector<16xf32> to vector<16x1xf32>
    %75 = vector.broadcast %74 : vector<16x1xf32> to vector<16x16xf32>
    %76 = arith.subf %72, %75 : vector<16x16xf32>
    %77 = math.exp %76 : vector<16x16xf32>
    %cst_32 = arith.constant dense<0.000000e+00> : vector<16xf32>
    %78 = vector.multi_reduction <add>, %77, %cst_32 [1] : vector<16x16xf32> to vector<16xf32>
    %79 = vector.shape_cast %78 : vector<16xf32> to vector<16x1xf32>
    %80 = tpu.reciprocal %79 {approx = true} : vector<16x1xf32> -> vector<16x1xf32>
    %81 = vector.broadcast %80 : vector<16x1xf32> to vector<16x16xf32>
    %82 = arith.mulf %77, %81 : vector<16x16xf32>
    %cst_33 = arith.constant dense<0.000000e+00> : vector<16x8xf32>
    %83 = tpu.matmul %82, %69, %cst_33 {dimension_numbers = #tpu.dot_dimension_numbers<[1], [0], [0], [1], [0, 0, 1, 1], [], []>} : vector<16x16xf32>, vector<16x8xf32>, vector<16x8xf32> -> vector<16x8xf32>
    %84 = vector.extract_strided_slice %27 {offsets = [16, 0], sizes = [8, 32], strides = [1, 1]} : vector<32x32xf32> to vector<8x32xf32>
    %cst_34 = arith.constant dense<0.000000e+00> : vector<16x32xf32>
    %85 = tpu.matmul %83, %84, %cst_34 {dimension_numbers = #tpu.dot_dimension_numbers<[1], [0], [0], [1], [0, 0, 1, 1], [], []>} : vector<16x8xf32>, vector<8x32xf32>, vector<16x32xf32> -> vector<16x32xf32>
    %86 = arith.addf %66, %85 : vector<16x32xf32>
    %87 = vector.extract_strided_slice %16 {offsets = [0, 24], sizes = [16, 8], strides = [1, 1]} : vector<16x32xf32> to vector<16x8xf32>
    %88 = vector.extract_strided_slice %21 {offsets = [0, 24], sizes = [16, 8], strides = [1, 1]} : vector<16x32xf32> to vector<16x8xf32>
    %89 = vector.extract_strided_slice %26 {offsets = [0, 24], sizes = [16, 8], strides = [1, 1]} : vector<16x32xf32> to vector<16x8xf32>
    %cst_35 = arith.constant dense<0.000000e+00> : vector<16x16xf32>
    %90 = tpu.matmul %87, %88, %cst_35 {dimension_numbers = #tpu.dot_dimension_numbers<[1], [1], [0], [0], [0, 0, 1, 0], [], []>} : vector<16x8xf32>, vector<16x8xf32>, vector<16x16xf32> -> vector<16x16xf32>
    %cst_36 = arith.constant 0.353553385 : f32
    %91 = vector.broadcast %cst_36 : f32 to vector<16x16xf32>
    %92 = arith.mulf %90, %91 : vector<16x16xf32>
    %cst_37 = arith.constant dense<0xFF800000> : vector<16xf32>
    %93 = vector.multi_reduction <maximumf>, %92, %cst_37 [1] : vector<16x16xf32> to vector<16xf32>
    %94 = vector.shape_cast %93 : vector<16xf32> to vector<16x1xf32>
    %95 = vector.broadcast %94 : vector<16x1xf32> to vector<16x16xf32>
    %96 = arith.subf %92, %95 : vector<16x16xf32>
    %97 = math.exp %96 : vector<16x16xf32>
    %cst_38 = arith.constant dense<0.000000e+00> : vector<16xf32>
    %98 = vector.multi_reduction <add>, %97, %cst_38 [1] : vector<16x16xf32> to vector<16xf32>
    %99 = vector.shape_cast %98 : vector<16xf32> to vector<16x1xf32>
    %100 = tpu.reciprocal %99 {approx = true} : vector<16x1xf32> -> vector<16x1xf32>
    %101 = vector.broadcast %100 : vector<16x1xf32> to vector<16x16xf32>
    %102 = arith.mulf %97, %101 : vector<16x16xf32>
    %cst_39 = arith.constant dense<0.000000e+00> : vector<16x8xf32>
    %103 = tpu.matmul %102, %89, %cst_39 {dimension_numbers = #tpu.dot_dimension_numbers<[1], [0], [0], [1], [0, 0, 1, 1], [], []>} : vector<16x16xf32>, vector<16x8xf32>, vector<16x8xf32> -> vector<16x8xf32>
    %104 = vector.extract_strided_slice %27 {offsets = [24, 0], sizes = [8, 32], strides = [1, 1]} : vector<32x32xf32> to vector<8x32xf32>
    %cst_40 = arith.constant dense<0.000000e+00> : vector<16x32xf32>
    %105 = tpu.matmul %103, %104, %cst_40 {dimension_numbers = #tpu.dot_dimension_numbers<[1], [0], [0], [1], [0, 0, 1, 1], [], []>} : vector<16x8xf32>, vector<8x32xf32>, vector<16x32xf32> -> vector<16x32xf32>
    %106 = arith.addf %86, %105 : vector<16x32xf32>
    %107 = arith.addf %1, %106 : vector<16x32xf32>
    %108 = vector.extract_strided_slice %11 {offsets = [0, 96], sizes = [1, 32], strides = [1, 1]} : vector<1x128xf32> to vector<1x32xf32>
    %109 = vector.broadcast %108 : vector<1x32xf32> to vector<16x32xf32>
    %110 = arith.addf %107, %109 : vector<16x32xf32>
    %cst_41 = arith.constant dense<0.000000e+00> : vector<16xf32>
    %111 = vector.multi_reduction <add>, %110, %cst_41 [1] : vector<16x32xf32> to vector<16xf32>
    %112 = vector.shape_cast %111 : vector<16xf32> to vector<16x1xf32>
    %cst_42 = arith.constant 3.200000e+01 : f32
    %113 = vector.broadcast %cst_42 : f32 to vector<16x1xf32>
    %114 = arith.divf %112, %113 : vector<16x1xf32>
    %115 = vector.broadcast %114 : vector<16x1xf32> to vector<16x32xf32>
    %116 = arith.subf %110, %115 : vector<16x32xf32>
    %117 = arith.mulf %116, %116 : vector<16x32xf32>
    %cst_43 = arith.constant dense<0.000000e+00> : vector<16xf32>
    %118 = vector.multi_reduction <add>, %117, %cst_43 [1] : vector<16x32xf32> to vector<16xf32>
    %119 = vector.shape_cast %118 : vector<16xf32> to vector<16x1xf32>
    %cst_44 = arith.constant 3.200000e+01 : f32
    %120 = vector.broadcast %cst_44 : f32 to vector<16x1xf32>
    %121 = arith.divf %119, %120 : vector<16x1xf32>
    %c0_45 = arith.constant 0 : index
    %c0_46 = arith.constant 0 : index
    %122 = vector.load %arg7[%c0_45, %c0_46] : memref<2x32xf32, #tpu.memory_space<vmem>>, vector<2x32xf32>
    %cst_47 = arith.constant 9.99999974E-6 : f32
    %123 = vector.broadcast %cst_47 : f32 to vector<16x1xf32>
    %124 = arith.addf %121, %123 : vector<16x1xf32>
    %125 = math.rsqrt %124 : vector<16x1xf32>
    %126 = vector.broadcast %125 : vector<16x1xf32> to vector<16x32xf32>
    %127 = arith.mulf %116, %126 : vector<16x32xf32>
    %128 = vector.extract_strided_slice %122 {offsets = [0, 0], sizes = [1, 32], strides = [1, 1]} : vector<2x32xf32> to vector<1x32xf32>
    %129 = vector.broadcast %128 : vector<1x32xf32> to vector<16x32xf32>
    %130 = arith.mulf %127, %129 : vector<16x32xf32>
    %131 = vector.extract_strided_slice %122 {offsets = [1, 0], sizes = [1, 32], strides = [1, 1]} : vector<2x32xf32> to vector<1x32xf32>
    %132 = vector.broadcast %131 : vector<1x32xf32> to vector<16x32xf32>
    %133 = arith.addf %130, %132 : vector<16x32xf32>
    %c0_48 = arith.constant 0 : index
    %c0_49 = arith.constant 0 : index
    %c0_50 = arith.constant 0 : index
    %134 = vector.load %arg8[%c0_48, %c0_49, %c0_50] : memref<1x16x32xf32, #tpu.memory_space<vmem>>, vector<1x16x32xf32>
    %135 = vector.shape_cast %134 : vector<1x16x32xf32> to vector<16x32xf32>
    %136 = vector.shape_cast %133 : vector<16x32xf32> to vector<1x16x32xf32>
    tpu.vector_store %arg8[%c0_48, %c0_49, %c0_50], %136 {strides = array<i32>} : memref<1x16x32xf32, #tpu.memory_space<vmem>>, vector<1x16x32xf32>,
    return
  }
  func.func @transform_0(%arg0: i32) -> (i32, i32, i32) {
    %c0_i32 = arith.constant 0 : i32
    %c0_i32_0 = arith.constant 0 : i32
    %c0_i32_1 = arith.constant 0 : i32
    return %arg0, %c0_i32, %c0_i32_0 : i32, i32, i32
  }
  func.func @transform_1(%arg0: i32) -> (i32, i32, i32) {
    %c0_i32 = arith.constant 0 : i32
    %c0_i32_0 = arith.constant 0 : i32
    %c0_i32_1 = arith.constant 0 : i32
    return %arg0, %c0_i32, %c0_i32_0 : i32, i32, i32
  }
  func.func @transform_2(%arg0: i32) -> (i32, i32, i32) {
    %c0_i32 = arith.constant 0 : i32
    %c0_i32_0 = arith.constant 0 : i32
    %c0_i32_1 = arith.constant 0 : i32
    return %arg0, %c0_i32, %c0_i32_0 : i32, i32, i32
  }
  func.func @transform_3(%arg0: i32) -> (i32, i32, i32) {
    %c0_i32 = arith.constant 0 : i32
    %c0_i32_0 = arith.constant 0 : i32
    %c0_i32_1 = arith.constant 0 : i32
    return %arg0, %c0_i32, %c0_i32_0 : i32, i32, i32
  }
  func.func @transform_4(%arg0: i32) -> (i32, i32) {
    %c0_i32 = arith.constant 0 : i32
    %c0_i32_0 = arith.constant 0 : i32
    %c0_i32_1 = arith.constant 0 : i32
    return %c0_i32, %c0_i32_0 : i32, i32
  }
  func.func @transform_5(%arg0: i32) -> (i32, i32) {
    %c0_i32 = arith.constant 0 : i32
    %c0_i32_0 = arith.constant 0 : i32
    %c0_i32_1 = arith.constant 0 : i32
    return %c0_i32, %c0_i32_0 : i32, i32
  }
  func.func @transform_6(%arg0: i32) -> (i32, i32) {
    %c0_i32 = arith.constant 0 : i32
    %c0_i32_0 = arith.constant 0 : i32
    %c0_i32_1 = arith.constant 0 : i32
    return %c0_i32, %c0_i32_0 : i32, i32
  }
  func.func @transform_7(%arg0: i32) -> (i32, i32, i32) {
    %c0_i32 = arith.constant 0 : i32
    %c0_i32_0 = arith.constant 0 : i32
    %c0_i32_1 = arith.constant 0 : i32
    return %arg0, %c0_i32, %c0_i32_0 : i32, i32, i32
  }
}

module attributes {stable_mosaic.version = 11 : i64} {
  func.func @_ffn_block_kernel(%arg0: i32, %arg1: memref<32x32xf32, #tpu.memory_space<vmem>>, %arg2: memref<32x128xf32, #tpu.memory_space<vmem>>, %arg3: memref<1x128xf32, #tpu.memory_space<vmem>>, %arg4: memref<128x32xf32, #tpu.memory_space<vmem>>, %arg5: memref<1x32xf32, #tpu.memory_space<vmem>>, %arg6: memref<2x32xf32, #tpu.memory_space<vmem>>, %arg7: memref<32x32xf32, #tpu.memory_space<vmem>>) attributes {dimension_semantics = [#tpu.dimension_semantics<arbitrary>], iteration_bounds = array<i64: 1>, scalar_prefetch = 0 : i64, scratch_operands = 0 : i64, tpu.core_type = #tpu.core_type<tc>, window_params = [{pipeline_mode = #tpu.pipeline_mode<synchronous>, transform_indices = @transform_0, window_bounds = array<i64: 32, 32>}, {pipeline_mode = #tpu.pipeline_mode<synchronous>, transform_indices = @transform_1, window_bounds = array<i64: 32, 128>}, {pipeline_mode = #tpu.pipeline_mode<synchronous>, transform_indices = @transform_2, window_bounds = array<i64: 1, 128>}, {pipeline_mode = #tpu.pipeline_mode<synchronous>, transform_indices = @transform_3, window_bounds = array<i64: 128, 32>}, {pipeline_mode = #tpu.pipeline_mode<synchronous>, transform_indices = @transform_4, window_bounds = array<i64: 1, 32>}, {pipeline_mode = #tpu.pipeline_mode<synchronous>, transform_indices = @transform_5, window_bounds = array<i64: 2, 32>}, {pipeline_mode = #tpu.pipeline_mode<synchronous>, transform_indices = @transform_6, window_bounds = array<i64: 32, 32>}]} {
    %c0 = arith.constant 0 : index
    %c0_0 = arith.constant 0 : index
    %0 = vector.load %arg1[%c0, %c0_0] : memref<32x32xf32, #tpu.memory_space<vmem>>, vector<32x32xf32>
    %c0_1 = arith.constant 0 : index
    %c0_2 = arith.constant 0 : index
    %1 = vector.load %arg2[%c0_1, %c0_2] : memref<32x128xf32, #tpu.memory_space<vmem>>, vector<32x128xf32>
    %cst = arith.constant dense<0.000000e+00> : vector<32x128xf32>
    %2 = tpu.matmul %0, %1, %cst {dimension_numbers = #tpu.dot_dimension_numbers<[1], [0], [0], [1], [0, 0, 1, 1], [], []>} : vector<32x32xf32>, vector<32x128xf32>, vector<32x128xf32> -> vector<32x128xf32>
    %c0_3 = arith.constant 0 : index
    %c0_4 = arith.constant 0 : index
    %3 = vector.load %arg3[%c0_3, %c0_4] : memref<1x128xf32, #tpu.memory_space<vmem>>, vector<1x128xf32>
    %4 = vector.broadcast %3 : vector<1x128xf32> to vector<32x128xf32>
    %5 = arith.addf %2, %4 : vector<32x128xf32>
    %cst_5 = arith.constant 0.000000e+00 : f32
    %6 = vector.broadcast %cst_5 : f32 to vector<32x128xf32>
    %7 = arith.maximumf %5, %6 : vector<32x128xf32>
    %c0_6 = arith.constant 0 : index
    %c0_7 = arith.constant 0 : index
    %8 = vector.load %arg4[%c0_6, %c0_7] : memref<128x32xf32, #tpu.memory_space<vmem>>, vector<128x32xf32>
    %cst_8 = arith.constant dense<0.000000e+00> : vector<32x32xf32>
    %9 = tpu.matmul %7, %8, %cst_8 {dimension_numbers = #tpu.dot_dimension_numbers<[1], [0], [0], [1], [0, 0, 1, 1], [], []>} : vector<32x128xf32>, vector<128x32xf32>, vector<32x32xf32> -> vector<32x32xf32>
    %10 = arith.addf %0, %9 : vector<32x32xf32>
    %c0_9 = arith.constant 0 : index
    %c0_10 = arith.constant 0 : index
    %11 = vector.load %arg5[%c0_9, %c0_10] : memref<1x32xf32, #tpu.memory_space<vmem>>, vector<1x32xf32>
    %12 = vector.broadcast %11 : vector<1x32xf32> to vector<32x32xf32>
    %13 = arith.addf %10, %12 : vector<32x32xf32>
    %cst_11 = arith.constant dense<0.000000e+00> : vector<32xf32>
    %14 = vector.multi_reduction <add>, %13, %cst_11 [1] : vector<32x32xf32> to vector<32xf32>
    %15 = vector.shape_cast %14 : vector<32xf32> to vector<32x1xf32>
    %cst_12 = arith.constant 3.200000e+01 : f32
    %16 = vector.broadcast %cst_12 : f32 to vector<32x1xf32>
    %17 = arith.divf %15, %16 : vector<32x1xf32>
    %18 = vector.broadcast %17 : vector<32x1xf32> to vector<32x32xf32>
    %19 = arith.subf %13, %18 : vector<32x32xf32>
    %20 = arith.mulf %19, %19 : vector<32x32xf32>
    %cst_13 = arith.constant dense<0.000000e+00> : vector<32xf32>
    %21 = vector.multi_reduction <add>, %20, %cst_13 [1] : vector<32x32xf32> to vector<32xf32>
    %22 = vector.shape_cast %21 : vector<32xf32> to vector<32x1xf32>
    %cst_14 = arith.constant 3.200000e+01 : f32
    %23 = vector.broadcast %cst_14 : f32 to vector<32x1xf32>
    %24 = arith.divf %22, %23 : vector<32x1xf32>
    %c0_15 = arith.constant 0 : index
    %c0_16 = arith.constant 0 : index
    %25 = vector.load %arg6[%c0_15, %c0_16] : memref<2x32xf32, #tpu.memory_space<vmem>>, vector<2x32xf32>
    %cst_17 = arith.constant 9.99999974E-6 : f32
    %26 = vector.broadcast %cst_17 : f32 to vector<32x1xf32>
    %27 = arith.addf %24, %26 : vector<32x1xf32>
    %28 = math.rsqrt %27 : vector<32x1xf32>
    %29 = vector.broadcast %28 : vector<32x1xf32> to vector<32x32xf32>
    %30 = arith.mulf %19, %29 : vector<32x32xf32>
    %31 = vector.extract_strided_slice %25 {offsets = [0, 0], sizes = [1, 32], strides = [1, 1]} : vector<2x32xf32> to vector<1x32xf32>
    %32 = vector.broadcast %31 : vector<1x32xf32> to vector<32x32xf32>
    %33 = arith.mulf %30, %32 : vector<32x32xf32>
    %34 = vector.extract_strided_slice %25 {offsets = [1, 0], sizes = [1, 32], strides = [1, 1]} : vector<2x32xf32> to vector<1x32xf32>
    %35 = vector.broadcast %34 : vector<1x32xf32> to vector<32x32xf32>
    %36 = arith.addf %33, %35 : vector<32x32xf32>
    %c0_18 = arith.constant 0 : index
    %c0_19 = arith.constant 0 : index
    %37 = vector.load %arg7[%c0_18, %c0_19] : memref<32x32xf32, #tpu.memory_space<vmem>>, vector<32x32xf32>
    tpu.vector_store %arg7[%c0_18, %c0_19], %36 {strides = array<i32>} : memref<32x32xf32, #tpu.memory_space<vmem>>, vector<32x32xf32>,
    return
  }
  func.func @transform_0(%arg0: i32) -> (i32, i32) {
    %c0_i32 = arith.constant 0 : i32
    %c0_i32_0 = arith.constant 0 : i32
    %c0_i32_1 = arith.constant 0 : i32
    return %c0_i32, %c0_i32_0 : i32, i32
  }
  func.func @transform_1(%arg0: i32) -> (i32, i32) {
    %c0_i32 = arith.constant 0 : i32
    %c0_i32_0 = arith.constant 0 : i32
    %c0_i32_1 = arith.constant 0 : i32
    return %c0_i32, %c0_i32_0 : i32, i32
  }
  func.func @transform_2(%arg0: i32) -> (i32, i32) {
    %c0_i32 = arith.constant 0 : i32
    %c0_i32_0 = arith.constant 0 : i32
    %c0_i32_1 = arith.constant 0 : i32
    return %c0_i32, %c0_i32_0 : i32, i32
  }
  func.func @transform_3(%arg0: i32) -> (i32, i32) {
    %c0_i32 = arith.constant 0 : i32
    %c0_i32_0 = arith.constant 0 : i32
    %c0_i32_1 = arith.constant 0 : i32
    return %c0_i32, %c0_i32_0 : i32, i32
  }
  func.func @transform_4(%arg0: i32) -> (i32, i32) {
    %c0_i32 = arith.constant 0 : i32
    %c0_i32_0 = arith.constant 0 : i32
    %c0_i32_1 = arith.constant 0 : i32
    return %c0_i32, %c0_i32_0 : i32, i32
  }
  func.func @transform_5(%arg0: i32) -> (i32, i32) {
    %c0_i32 = arith.constant 0 : i32
    %c0_i32_0 = arith.constant 0 : i32
    %c0_i32_1 = arith.constant 0 : i32
    return %c0_i32, %c0_i32_0 : i32, i32
  }
  func.func @transform_6(%arg0: i32) -> (i32, i32) {
    %c0_i32 = arith.constant 0 : i32
    %c0_i32_0 = arith.constant 0 : i32
    %c0_i32_1 = arith.constant 0 : i32
    return %c0_i32, %c0_i32_0 : i32, i32
  }
}

module attributes {stable_mosaic.version = 11 : i64} {
  func.func @_mha_block_kernel(%arg0: i32, %arg1: memref<1x16x32xf32, #tpu.memory_space<vmem>>, %arg2: memref<1x16x32xf32, #tpu.memory_space<vmem>>, %arg3: memref<1x16x32xf32, #tpu.memory_space<vmem>>, %arg4: memref<1x16x32xf32, #tpu.memory_space<vmem>>, %arg5: memref<32x128xf32, #tpu.memory_space<vmem>>, %arg6: memref<1x128xf32, #tpu.memory_space<vmem>>, %arg7: memref<2x32xf32, #tpu.memory_space<vmem>>, %arg8: memref<1x16x32xf32, #tpu.memory_space<vmem>>, %arg9: memref<1x16x16xf32, #tpu.memory_space<vmem>>) attributes {dimension_semantics = [#tpu.dimension_semantics<parallel>], iteration_bounds = array<i64: 2>, scalar_prefetch = 0 : i64, scratch_operands = 0 : i64, tpu.core_type = #tpu.core_type<tc>, window_params = [{transform_indices = @transform_0, window_bounds = array<i64: 1, 16, 32>}, {transform_indices = @transform_1, window_bounds = array<i64: 1, 16, 32>}, {transform_indices = @transform_2, window_bounds = array<i64: 1, 16, 32>}, {transform_indices = @transform_3, window_bounds = array<i64: 1, 16, 32>}, {pipeline_mode = #tpu.pipeline_mode<synchronous>, transform_indices = @transform_4, window_bounds = array<i64: 32, 128>}, {pipeline_mode = #tpu.pipeline_mode<synchronous>, transform_indices = @transform_5, window_bounds = array<i64: 1, 128>}, {pipeline_mode = #tpu.pipeline_mode<synchronous>, transform_indices = @transform_6, window_bounds = array<i64: 2, 32>}, {transform_indices = @transform_7, window_bounds = array<i64: 1, 16, 32>}, {transform_indices = @transform_8, window_bounds = array<i64: 1, 16, 16>}]} {
    %c0 = arith.constant 0 : index
    %c0_0 = arith.constant 0 : index
    %c0_1 = arith.constant 0 : index
    %0 = vector.load %arg1[%c0, %c0_0, %c0_1] : memref<1x16x32xf32, #tpu.memory_space<vmem>>, vector<1x16x32xf32>
    %1 = vector.shape_cast %0 : vector<1x16x32xf32> to vector<16x32xf32>
    %c0_2 = arith.constant 0 : index
    %c0_3 = arith.constant 0 : index
    %c0_4 = arith.constant 0 : index
    %2 = vector.load %arg2[%c0_2, %c0_3, %c0_4] : memref<1x16x32xf32, #tpu.memory_space<vmem>>, vector<1x16x32xf32>
    %3 = vector.shape_cast %2 : vector<1x16x32xf32> to vector<16x32xf32>
    %4 = arith.addf %1, %3 : vector<16x32xf32>
    %c0_5 = arith.constant 0 : index
    %c0_6 = arith.constant 0 : index
    %c0_7 = arith.constant 0 : index
    %5 = vector.load %arg3[%c0_5, %c0_6, %c0_7] : memref<1x16x32xf32, #tpu.memory_space<vmem>>, vector<1x16x32xf32>
    %6 = vector.shape_cast %5 : vector<1x16x32xf32> to vector<16x32xf32>
    %c0_8 = arith.constant 0 : index
    %c0_9 = arith.constant 0 : index
    %c0_10 = arith.constant 0 : index
    %7 = vector.load %arg4[%c0_8, %c0_9, %c0_10] : memref<1x16x32xf32, #tpu.memory_space<vmem>>, vector<1x16x32xf32>
    %8 = vector.shape_cast %7 : vector<1x16x32xf32> to vector<16x32xf32>
    %9 = arith.addf %6, %8 : vector<16x32xf32>
    %c0_11 = arith.constant 0 : index
    %c0_12 = arith.constant 0 : index
    %10 = vector.load %arg5[%c0_11, %c0_12] : memref<32x128xf32, #tpu.memory_space<vmem>>, vector<32x128xf32>
    %c0_13 = arith.constant 0 : index
    %c0_14 = arith.constant 0 : index
    %11 = vector.load %arg6[%c0_13, %c0_14] : memref<1x128xf32, #tpu.memory_space<vmem>>, vector<1x128xf32>
    %12 = vector.extract_strided_slice %10 {offsets = [0, 0], sizes = [32, 32], strides = [1, 1]} : vector<32x128xf32> to vector<32x32xf32>
    %cst = arith.constant dense<0.000000e+00> : vector<16x32xf32>
    %13 = tpu.matmul %4, %12, %cst {dimension_numbers = #tpu.dot_dimension_numbers<[1], [0], [0], [1], [0, 0, 1, 1], [], []>} : vector<16x32xf32>, vector<32x32xf32>, vector<16x32xf32> -> vector<16x32xf32>
    %14 = vector.extract_strided_slice %11 {offsets = [0, 0], sizes = [1, 32], strides = [1, 1]} : vector<1x128xf32> to vector<1x32xf32>
    %15 = vector.broadcast %14 : vector<1x32xf32> to vector<16x32xf32>
    %16 = arith.addf %13, %15 : vector<16x32xf32>
    %17 = vector.extract_strided_slice %10 {offsets = [0, 32], sizes = [32, 32], strides = [1, 1]} : vector<32x128xf32> to vector<32x32xf32>
    %cst_15 = arith.constant dense<0.000000e+00> : vector<16x32xf32>
    %18 = tpu.matmul %9, %17, %cst_15 {dimension_numbers = #tpu.dot_dimension_numbers<[1], [0], [0], [1], [0, 0, 1, 1], [], []>} : vector<16x32xf32>, vector<32x32xf32>, vector<16x32xf32> -> vector<16x32xf32>
    %19 = vector.extract_strided_slice %11 {offsets = [0, 32], sizes = [1, 32], strides = [1, 1]} : vector<1x128xf32> to vector<1x32xf32>
    %20 = vector.broadcast %19 : vector<1x32xf32> to vector<16x32xf32>
    %21 = arith.addf %18, %20 : vector<16x32xf32>
    %22 = vector.extract_strided_slice %10 {offsets = [0, 64], sizes = [32, 32], strides = [1, 1]} : vector<32x128xf32> to vector<32x32xf32>
    %cst_16 = arith.constant dense<0.000000e+00> : vector<16x32xf32>
    %23 = tpu.matmul %6, %22, %cst_16 {dimension_numbers = #tpu.dot_dimension_numbers<[1], [0], [0], [1], [0, 0, 1, 1], [], []>} : vector<16x32xf32>, vector<32x32xf32>, vector<16x32xf32> -> vector<16x32xf32>
    %24 = vector.extract_strided_slice %11 {offsets = [0, 64], sizes = [1, 32], strides = [1, 1]} : vector<1x128xf32> to vector<1x32xf32>
    %25 = vector.broadcast %24 : vector<1x32xf32> to vector<16x32xf32>
    %26 = arith.addf %23, %25 : vector<16x32xf32>
    %27 = vector.extract_strided_slice %10 {offsets = [0, 96], sizes = [32, 32], strides = [1, 1]} : vector<32x128xf32> to vector<32x32xf32>
    %28 = vector.extract_strided_slice %16 {offsets = [0, 0], sizes = [16, 8], strides = [1, 1]} : vector<16x32xf32> to vector<16x8xf32>
    %29 = vector.extract_strided_slice %21 {offsets = [0, 0], sizes = [16, 8], strides = [1, 1]} : vector<16x32xf32> to vector<16x8xf32>
    %30 = vector.extract_strided_slice %26 {offsets = [0, 0], sizes = [16, 8], strides = [1, 1]} : vector<16x32xf32> to vector<16x8xf32>
    %cst_17 = arith.constant dense<0.000000e+00> : vector<16x16xf32>
    %31 = tpu.matmul %28, %29, %cst_17 {dimension_numbers = #tpu.dot_dimension_numbers<[1], [1], [0], [0], [0, 0, 1, 0], [], []>} : vector<16x8xf32>, vector<16x8xf32>, vector<16x16xf32> -> vector<16x16xf32>
    %cst_18 = arith.constant 0.353553385 : f32
    %32 = vector.broadcast %cst_18 : f32 to vector<16x16xf32>
    %33 = arith.mulf %31, %32 : vector<16x16xf32>
    %cst_19 = arith.constant dense<0xFF800000> : vector<16xf32>
    %34 = vector.multi_reduction <maximumf>, %33, %cst_19 [1] : vector<16x16xf32> to vector<16xf32>
    %35 = vector.shape_cast %34 : vector<16xf32> to vector<16x1xf32>
    %36 = vector.broadcast %35 : vector<16x1xf32> to vector<16x16xf32>
    %37 = arith.subf %33, %36 : vector<16x16xf32>
    %38 = math.exp %37 : vector<16x16xf32>
    %cst_20 = arith.constant dense<0.000000e+00> : vector<16xf32>
    %39 = vector.multi_reduction <add>, %38, %cst_20 [1] : vector<16x16xf32> to vector<16xf32>
    %40 = vector.shape_cast %39 : vector<16xf32> to vector<16x1xf32>
    %41 = tpu.reciprocal %40 {approx = true} : vector<16x1xf32> -> vector<16x1xf32>
    %42 = vector.broadcast %41 : vector<16x1xf32> to vector<16x16xf32>
    %43 = arith.mulf %38, %42 : vector<16x16xf32>
    %cst_21 = arith.constant dense<0.000000e+00> : vector<16x8xf32>
    %44 = tpu.matmul %43, %30, %cst_21 {dimension_numbers = #tpu.dot_dimension_numbers<[1], [0], [0], [1], [0, 0, 1, 1], [], []>} : vector<16x16xf32>, vector<16x8xf32>, vector<16x8xf32> -> vector<16x8xf32>
    %45 = vector.extract_strided_slice %27 {offsets = [0, 0], sizes = [8, 32], strides = [1, 1]} : vector<32x32xf32> to vector<8x32xf32>
    %cst_22 = arith.constant dense<0.000000e+00> : vector<16x32xf32>
    %46 = tpu.matmul %44, %45, %cst_22 {dimension_numbers = #tpu.dot_dimension_numbers<[1], [0], [0], [1], [0, 0, 1, 1], [], []>} : vector<16x8xf32>, vector<8x32xf32>, vector<16x32xf32> -> vector<16x32xf32>
    %47 = vector.extract_strided_slice %16 {offsets = [0, 8], sizes = [16, 8], strides = [1, 1]} : vector<16x32xf32> to vector<16x8xf32>
    %48 = vector.extract_strided_slice %21 {offsets = [0, 8], sizes = [16, 8], strides = [1, 1]} : vector<16x32xf32> to vector<16x8xf32>
    %49 = vector.extract_strided_slice %26 {offsets = [0, 8], sizes = [16, 8], strides = [1, 1]} : vector<16x32xf32> to vector<16x8xf32>
    %cst_23 = arith.constant dense<0.000000e+00> : vector<16x16xf32>
    %50 = tpu.matmul %47, %48, %cst_23 {dimension_numbers = #tpu.dot_dimension_numbers<[1], [1], [0], [0], [0, 0, 1, 0], [], []>} : vector<16x8xf32>, vector<16x8xf32>, vector<16x16xf32> -> vector<16x16xf32>
    %cst_24 = arith.constant 0.353553385 : f32
    %51 = vector.broadcast %cst_24 : f32 to vector<16x16xf32>
    %52 = arith.mulf %50, %51 : vector<16x16xf32>
    %cst_25 = arith.constant dense<0xFF800000> : vector<16xf32>
    %53 = vector.multi_reduction <maximumf>, %52, %cst_25 [1] : vector<16x16xf32> to vector<16xf32>
    %54 = vector.shape_cast %53 : vector<16xf32> to vector<16x1xf32>
    %55 = vector.broadcast %54 : vector<16x1xf32> to vector<16x16xf32>
    %56 = arith.subf %52, %55 : vector<16x16xf32>
    %57 = math.exp %56 : vector<16x16xf32>
    %cst_26 = arith.constant dense<0.000000e+00> : vector<16xf32>
    %58 = vector.multi_reduction <add>, %57, %cst_26 [1] : vector<16x16xf32> to vector<16xf32>
    %59 = vector.shape_cast %58 : vector<16xf32> to vector<16x1xf32>
    %60 = tpu.reciprocal %59 {approx = true} : vector<16x1xf32> -> vector<16x1xf32>
    %61 = vector.broadcast %60 : vector<16x1xf32> to vector<16x16xf32>
    %62 = arith.mulf %57, %61 : vector<16x16xf32>
    %cst_27 = arith.constant dense<0.000000e+00> : vector<16x8xf32>
    %63 = tpu.matmul %62, %49, %cst_27 {dimension_numbers = #tpu.dot_dimension_numbers<[1], [0], [0], [1], [0, 0, 1, 1], [], []>} : vector<16x16xf32>, vector<16x8xf32>, vector<16x8xf32> -> vector<16x8xf32>
    %64 = vector.extract_strided_slice %27 {offsets = [8, 0], sizes = [8, 32], strides = [1, 1]} : vector<32x32xf32> to vector<8x32xf32>
    %cst_28 = arith.constant dense<0.000000e+00> : vector<16x32xf32>
    %65 = tpu.matmul %63, %64, %cst_28 {dimension_numbers = #tpu.dot_dimension_numbers<[1], [0], [0], [1], [0, 0, 1, 1], [], []>} : vector<16x8xf32>, vector<8x32xf32>, vector<16x32xf32> -> vector<16x32xf32>
    %66 = arith.addf %46, %65 : vector<16x32xf32>
    %67 = arith.addf %43, %62 : vector<16x16xf32>
    %68 = vector.extract_strided_slice %16 {offsets = [0, 16], sizes = [16, 8], strides = [1, 1]} : vector<16x32xf32> to vector<16x8xf32>
    %69 = vector.extract_strided_slice %21 {offsets = [0, 16], sizes = [16, 8], strides = [1, 1]} : vector<16x32xf32> to vector<16x8xf32>
    %70 = vector.extract_strided_slice %26 {offsets = [0, 16], sizes = [16, 8], strides = [1, 1]} : vector<16x32xf32> to vector<16x8xf32>
    %cst_29 = arith.constant dense<0.000000e+00> : vector<16x16xf32>
    %71 = tpu.matmul %68, %69, %cst_29 {dimension_numbers = #tpu.dot_dimension_numbers<[1], [1], [0], [0], [0, 0, 1, 0], [], []>} : vector<16x8xf32>, vector<16x8xf32>, vector<16x16xf32> -> vector<16x16xf32>
    %cst_30 = arith.constant 0.353553385 : f32
    %72 = vector.broadcast %cst_30 : f32 to vector<16x16xf32>
    %73 = arith.mulf %71, %72 : vector<16x16xf32>
    %cst_31 = arith.constant dense<0xFF800000> : vector<16xf32>
    %74 = vector.multi_reduction <maximumf>, %73, %cst_31 [1] : vector<16x16xf32> to vector<16xf32>
    %75 = vector.shape_cast %74 : vector<16xf32> to vector<16x1xf32>
    %76 = vector.broadcast %75 : vector<16x1xf32> to vector<16x16xf32>
    %77 = arith.subf %73, %76 : vector<16x16xf32>
    %78 = math.exp %77 : vector<16x16xf32>
    %cst_32 = arith.constant dense<0.000000e+00> : vector<16xf32>
    %79 = vector.multi_reduction <add>, %78, %cst_32 [1] : vector<16x16xf32> to vector<16xf32>
    %80 = vector.shape_cast %79 : vector<16xf32> to vector<16x1xf32>
    %81 = tpu.reciprocal %80 {approx = true} : vector<16x1xf32> -> vector<16x1xf32>
    %82 = vector.broadcast %81 : vector<16x1xf32> to vector<16x16xf32>
    %83 = arith.mulf %78, %82 : vector<16x16xf32>
    %cst_33 = arith.constant dense<0.000000e+00> : vector<16x8xf32>
    %84 = tpu.matmul %83, %70, %cst_33 {dimension_numbers = #tpu.dot_dimension_numbers<[1], [0], [0], [1], [0, 0, 1, 1], [], []>} : vector<16x16xf32>, vector<16x8xf32>, vector<16x8xf32> -> vector<16x8xf32>
    %85 = vector.extract_strided_slice %27 {offsets = [16, 0], sizes = [8, 32], strides = [1, 1]} : vector<32x32xf32> to vector<8x32xf32>
    %cst_34 = arith.constant dense<0.000000e+00> : vector<16x32xf32>
    %86 = tpu.matmul %84, %85, %cst_34 {dimension_numbers = #tpu.dot_dimension_numbers<[1], [0], [0], [1], [0, 0, 1, 1], [], []>} : vector<16x8xf32>, vector<8x32xf32>, vector<16x32xf32> -> vector<16x32xf32>
    %87 = arith.addf %66, %86 : vector<16x32xf32>
    %88 = arith.addf %67, %83 : vector<16x16xf32>
    %89 = vector.extract_strided_slice %16 {offsets = [0, 24], sizes = [16, 8], strides = [1, 1]} : vector<16x32xf32> to vector<16x8xf32>
    %90 = vector.extract_strided_slice %21 {offsets = [0, 24], sizes = [16, 8], strides = [1, 1]} : vector<16x32xf32> to vector<16x8xf32>
    %91 = vector.extract_strided_slice %26 {offsets = [0, 24], sizes = [16, 8], strides = [1, 1]} : vector<16x32xf32> to vector<16x8xf32>
    %cst_35 = arith.constant dense<0.000000e+00> : vector<16x16xf32>
    %92 = tpu.matmul %89, %90, %cst_35 {dimension_numbers = #tpu.dot_dimension_numbers<[1], [1], [0], [0], [0, 0, 1, 0], [], []>} : vector<16x8xf32>, vector<16x8xf32>, vector<16x16xf32> -> vector<16x16xf32>
    %cst_36 = arith.constant 0.353553385 : f32
    %93 = vector.broadcast %cst_36 : f32 to vector<16x16xf32>
    %94 = arith.mulf %92, %93 : vector<16x16xf32>
    %cst_37 = arith.constant dense<0xFF800000> : vector<16xf32>
    %95 = vector.multi_reduction <maximumf>, %94, %cst_37 [1] : vector<16x16xf32> to vector<16xf32>
    %96 = vector.shape_cast %95 : vector<16xf32> to vector<16x1xf32>
    %97 = vector.broadcast %96 : vector<16x1xf32> to vector<16x16xf32>
    %98 = arith.subf %94, %97 : vector<16x16xf32>
    %99 = math.exp %98 : vector<16x16xf32>
    %cst_38 = arith.constant dense<0.000000e+00> : vector<16xf32>
    %100 = vector.multi_reduction <add>, %99, %cst_38 [1] : vector<16x16xf32> to vector<16xf32>
    %101 = vector.shape_cast %100 : vector<16xf32> to vector<16x1xf32>
    %102 = tpu.reciprocal %101 {approx = true} : vector<16x1xf32> -> vector<16x1xf32>
    %103 = vector.broadcast %102 : vector<16x1xf32> to vector<16x16xf32>
    %104 = arith.mulf %99, %103 : vector<16x16xf32>
    %cst_39 = arith.constant dense<0.000000e+00> : vector<16x8xf32>
    %105 = tpu.matmul %104, %91, %cst_39 {dimension_numbers = #tpu.dot_dimension_numbers<[1], [0], [0], [1], [0, 0, 1, 1], [], []>} : vector<16x16xf32>, vector<16x8xf32>, vector<16x8xf32> -> vector<16x8xf32>
    %106 = vector.extract_strided_slice %27 {offsets = [24, 0], sizes = [8, 32], strides = [1, 1]} : vector<32x32xf32> to vector<8x32xf32>
    %cst_40 = arith.constant dense<0.000000e+00> : vector<16x32xf32>
    %107 = tpu.matmul %105, %106, %cst_40 {dimension_numbers = #tpu.dot_dimension_numbers<[1], [0], [0], [1], [0, 0, 1, 1], [], []>} : vector<16x8xf32>, vector<8x32xf32>, vector<16x32xf32> -> vector<16x32xf32>
    %108 = arith.addf %87, %107 : vector<16x32xf32>
    %109 = arith.addf %88, %104 : vector<16x16xf32>
    %110 = arith.addf %1, %108 : vector<16x32xf32>
    %111 = vector.extract_strided_slice %11 {offsets = [0, 96], sizes = [1, 32], strides = [1, 1]} : vector<1x128xf32> to vector<1x32xf32>
    %112 = vector.broadcast %111 : vector<1x32xf32> to vector<16x32xf32>
    %113 = arith.addf %110, %112 : vector<16x32xf32>
    %cst_41 = arith.constant dense<0.000000e+00> : vector<16xf32>
    %114 = vector.multi_reduction <add>, %113, %cst_41 [1] : vector<16x32xf32> to vector<16xf32>
    %115 = vector.shape_cast %114 : vector<16xf32> to vector<16x1xf32>
    %cst_42 = arith.constant 3.200000e+01 : f32
    %116 = vector.broadcast %cst_42 : f32 to vector<16x1xf32>
    %117 = arith.divf %115, %116 : vector<16x1xf32>
    %118 = vector.broadcast %117 : vector<16x1xf32> to vector<16x32xf32>
    %119 = arith.subf %113, %118 : vector<16x32xf32>
    %120 = arith.mulf %119, %119 : vector<16x32xf32>
    %cst_43 = arith.constant dense<0.000000e+00> : vector<16xf32>
    %121 = vector.multi_reduction <add>, %120, %cst_43 [1] : vector<16x32xf32> to vector<16xf32>
    %122 = vector.shape_cast %121 : vector<16xf32> to vector<16x1xf32>
    %cst_44 = arith.constant 3.200000e+01 : f32
    %123 = vector.broadcast %cst_44 : f32 to vector<16x1xf32>
    %124 = arith.divf %122, %123 : vector<16x1xf32>
    %c0_45 = arith.constant 0 : index
    %c0_46 = arith.constant 0 : index
    %125 = vector.load %arg7[%c0_45, %c0_46] : memref<2x32xf32, #tpu.memory_space<vmem>>, vector<2x32xf32>
    %cst_47 = arith.constant 9.99999974E-6 : f32
    %126 = vector.broadcast %cst_47 : f32 to vector<16x1xf32>
    %127 = arith.addf %124, %126 : vector<16x1xf32>
    %128 = math.rsqrt %127 : vector<16x1xf32>
    %129 = vector.broadcast %128 : vector<16x1xf32> to vector<16x32xf32>
    %130 = arith.mulf %119, %129 : vector<16x32xf32>
    %131 = vector.extract_strided_slice %125 {offsets = [0, 0], sizes = [1, 32], strides = [1, 1]} : vector<2x32xf32> to vector<1x32xf32>
    %132 = vector.broadcast %131 : vector<1x32xf32> to vector<16x32xf32>
    %133 = arith.mulf %130, %132 : vector<16x32xf32>
    %134 = vector.extract_strided_slice %125 {offsets = [1, 0], sizes = [1, 32], strides = [1, 1]} : vector<2x32xf32> to vector<1x32xf32>
    %135 = vector.broadcast %134 : vector<1x32xf32> to vector<16x32xf32>
    %136 = arith.addf %133, %135 : vector<16x32xf32>
    %c0_48 = arith.constant 0 : index
    %c0_49 = arith.constant 0 : index
    %c0_50 = arith.constant 0 : index
    %137 = vector.load %arg8[%c0_48, %c0_49, %c0_50] : memref<1x16x32xf32, #tpu.memory_space<vmem>>, vector<1x16x32xf32>
    %138 = vector.shape_cast %137 : vector<1x16x32xf32> to vector<16x32xf32>
    %139 = vector.shape_cast %136 : vector<16x32xf32> to vector<1x16x32xf32>
    tpu.vector_store %arg8[%c0_48, %c0_49, %c0_50], %139 {strides = array<i32>} : memref<1x16x32xf32, #tpu.memory_space<vmem>>, vector<1x16x32xf32>,
    %cst_51 = arith.constant 2.500000e-01 : f32
    %140 = vector.broadcast %cst_51 : f32 to vector<16x16xf32>
    %141 = arith.mulf %109, %140 : vector<16x16xf32>
    %c0_52 = arith.constant 0 : index
    %c0_53 = arith.constant 0 : index
    %c0_54 = arith.constant 0 : index
    %142 = vector.load %arg9[%c0_52, %c0_53, %c0_54] : memref<1x16x16xf32, #tpu.memory_space<vmem>>, vector<1x16x16xf32>
    %143 = vector.shape_cast %142 : vector<1x16x16xf32> to vector<16x16xf32>
    %144 = vector.shape_cast %141 : vector<16x16xf32> to vector<1x16x16xf32>
    tpu.vector_store %arg9[%c0_52, %c0_53, %c0_54], %144 {strides = array<i32>} : memref<1x16x16xf32, #tpu.memory_space<vmem>>, vector<1x16x16xf32>,
    return
  }
  func.func @transform_0(%arg0: i32) -> (i32, i32, i32) {
    %c0_i32 = arith.constant 0 : i32
    %c0_i32_0 = arith.constant 0 : i32
    %c0_i32_1 = arith.constant 0 : i32
    return %arg0, %c0_i32, %c0_i32_0 : i32, i32, i32
  }
  func.func @transform_1(%arg0: i32) -> (i32, i32, i32) {
    %c0_i32 = arith.constant 0 : i32
    %c0_i32_0 = arith.constant 0 : i32
    %c0_i32_1 = arith.constant 0 : i32
    return %arg0, %c0_i32, %c0_i32_0 : i32, i32, i32
  }
  func.func @transform_2(%arg0: i32) -> (i32, i32, i32) {
    %c0_i32 = arith.constant 0 : i32
    %c0_i32_0 = arith.constant 0 : i32
    %c0_i32_1 = arith.constant 0 : i32
    return %arg0, %c0_i32, %c0_i32_0 : i32, i32, i32
  }
  func.func @transform_3(%arg0: i32) -> (i32, i32, i32) {
    %c0_i32 = arith.constant 0 : i32
    %c0_i32_0 = arith.constant 0 : i32
    %c0_i32_1 = arith.constant 0 : i32
    return %arg0, %c0_i32, %c0_i32_0 : i32, i32, i32
  }
  func.func @transform_4(%arg0: i32) -> (i32, i32) {
    %c0_i32 = arith.constant 0 : i32
    %c0_i32_0 = arith.constant 0 : i32
    %c0_i32_1 = arith.constant 0 : i32
    return %c0_i32, %c0_i32_0 : i32, i32
  }
  func.func @transform_5(%arg0: i32) -> (i32, i32) {
    %c0_i32 = arith.constant 0 : i32
    %c0_i32_0 = arith.constant 0 : i32
    %c0_i32_1 = arith.constant 0 : i32
    return %c0_i32, %c0_i32_0 : i32, i32
  }
  func.func @transform_6(%arg0: i32) -> (i32, i32) {
    %c0_i32 = arith.constant 0 : i32
    %c0_i32_0 = arith.constant 0 : i32
    %c0_i32_1 = arith.constant 0 : i32
    return %c0_i32, %c0_i32_0 : i32, i32
  }
  func.func @transform_7(%arg0: i32) -> (i32, i32, i32) {
    %c0_i32 = arith.constant 0 : i32
    %c0_i32_0 = arith.constant 0 : i32
    %c0_i32_1 = arith.constant 0 : i32
    return %arg0, %c0_i32, %c0_i32_0 : i32, i32, i32
  }
  func.func @transform_8(%arg0: i32) -> (i32, i32, i32) {
    %c0_i32 = arith.constant 0 : i32
    %c0_i32_0 = arith.constant 0 : i32
    %c0_i32_1 = arith.constant 0 : i32
    return %arg0, %c0_i32, %c0_i32_0 : i32, i32, i32
  }
}

module attributes {stable_mosaic.version = 11 : i64} {
  func.func @_decoder_head_kernel(%arg0: i32, %arg1: memref<1x16x32xf32, #tpu.memory_space<vmem>>, %arg2: memref<1x16x32xf32, #tpu.memory_space<vmem>>, %arg3: memref<1x16x16xf32, #tpu.memory_space<vmem>>, %arg4: memref<32x192xf32, #tpu.memory_space<vmem>>, %arg5: memref<1x192xf32, #tpu.memory_space<vmem>>, %arg6: memref<1x16x192xf32, #tpu.memory_space<vmem>>) attributes {dimension_semantics = [#tpu.dimension_semantics<parallel>], iteration_bounds = array<i64: 2>, scalar_prefetch = 0 : i64, scratch_operands = 0 : i64, tpu.core_type = #tpu.core_type<tc>, window_params = [{transform_indices = @transform_0, window_bounds = array<i64: 1, 16, 32>}, {transform_indices = @transform_1, window_bounds = array<i64: 1, 16, 32>}, {transform_indices = @transform_2, window_bounds = array<i64: 1, 16, 16>}, {pipeline_mode = #tpu.pipeline_mode<synchronous>, transform_indices = @transform_3, window_bounds = array<i64: 32, 192>}, {pipeline_mode = #tpu.pipeline_mode<synchronous>, transform_indices = @transform_4, window_bounds = array<i64: 1, 192>}, {transform_indices = @transform_5, window_bounds = array<i64: 1, 16, 192>}]} {
    %c0 = arith.constant 0 : index
    %c0_0 = arith.constant 0 : index
    %c0_1 = arith.constant 0 : index
    %0 = vector.load %arg1[%c0, %c0_0, %c0_1] : memref<1x16x32xf32, #tpu.memory_space<vmem>>, vector<1x16x32xf32>
    %1 = vector.shape_cast %0 : vector<1x16x32xf32> to vector<16x32xf32>
    %c0_2 = arith.constant 0 : index
    %c0_3 = arith.constant 0 : index
    %c0_4 = arith.constant 0 : index
    %2 = vector.load %arg2[%c0_2, %c0_3, %c0_4] : memref<1x16x32xf32, #tpu.memory_space<vmem>>, vector<1x16x32xf32>
    %3 = vector.shape_cast %2 : vector<1x16x32xf32> to vector<16x32xf32>
    %4 = arith.addf %1, %3 : vector<16x32xf32>
    %c0_5 = arith.constant 0 : index
    %c0_6 = arith.constant 0 : index
    %c0_7 = arith.constant 0 : index
    %5 = vector.load %arg3[%c0_5, %c0_6, %c0_7] : memref<1x16x16xf32, #tpu.memory_space<vmem>>, vector<1x16x16xf32>
    %6 = vector.shape_cast %5 : vector<1x16x16xf32> to vector<16x16xf32>
    %cst = arith.constant dense<0.000000e+00> : vector<16x32xf32>
    %7 = tpu.matmul %6, %4, %cst {dimension_numbers = #tpu.dot_dimension_numbers<[1], [0], [0], [1], [0, 0, 1, 1], [], []>} : vector<16x16xf32>, vector<16x32xf32>, vector<16x32xf32> -> vector<16x32xf32>
    %8 = arith.addf %4, %7 : vector<16x32xf32>
    %c0_8 = arith.constant 0 : index
    %c0_9 = arith.constant 0 : index
    %9 = vector.load %arg4[%c0_8, %c0_9] : memref<32x192xf32, #tpu.memory_space<vmem>>, vector<32x192xf32>
    %cst_10 = arith.constant dense<0.000000e+00> : vector<16x192xf32>
    %10 = tpu.matmul %8, %9, %cst_10 {dimension_numbers = #tpu.dot_dimension_numbers<[1], [0], [0], [1], [0, 0, 1, 1], [], []>} : vector<16x32xf32>, vector<32x192xf32>, vector<16x192xf32> -> vector<16x192xf32>
    %c0_11 = arith.constant 0 : index
    %c0_12 = arith.constant 0 : index
    %11 = vector.load %arg5[%c0_11, %c0_12] : memref<1x192xf32, #tpu.memory_space<vmem>>, vector<1x192xf32>
    %12 = vector.broadcast %11 : vector<1x192xf32> to vector<16x192xf32>
    %13 = arith.addf %10, %12 : vector<16x192xf32>
    %14 = math.tanh %13 : vector<16x192xf32>
    %c0_13 = arith.constant 0 : index
    %c0_14 = arith.constant 0 : index
    %c0_15 = arith.constant 0 : index
    %15 = vector.load %arg6[%c0_13, %c0_14, %c0_15] : memref<1x16x192xf32, #tpu.memory_space<vmem>>, vector<1x16x192xf32>
    %16 = vector.shape_cast %15 : vector<1x16x192xf32> to vector<16x192xf32>
    %17 = vector.shape_cast %14 : vector<16x192xf32> to vector<1x16x192xf32>
    tpu.vector_store %arg6[%c0_13, %c0_14, %c0_15], %17 {strides = array<i32>} : memref<1x16x192xf32, #tpu.memory_space<vmem>>, vector<1x16x192xf32>,
    return
  }
  func.func @transform_0(%arg0: i32) -> (i32, i32, i32) {
    %c0_i32 = arith.constant 0 : i32
    %c0_i32_0 = arith.constant 0 : i32
    %c0_i32_1 = arith.constant 0 : i32
    return %arg0, %c0_i32, %c0_i32_0 : i32, i32, i32
  }
  func.func @transform_1(%arg0: i32) -> (i32, i32, i32) {
    %c0_i32 = arith.constant 0 : i32
    %c0_i32_0 = arith.constant 0 : i32
    %c0_i32_1 = arith.constant 0 : i32
    return %arg0, %c0_i32, %c0_i32_0 : i32, i32, i32
  }
  func.func @transform_2(%arg0: i32) -> (i32, i32, i32) {
    %c0_i32 = arith.constant 0 : i32
    %c0_i32_0 = arith.constant 0 : i32
    %c0_i32_1 = arith.constant 0 : i32
    return %arg0, %c0_i32, %c0_i32_0 : i32, i32, i32
  }
  func.func @transform_3(%arg0: i32) -> (i32, i32) {
    %c0_i32 = arith.constant 0 : i32
    %c0_i32_0 = arith.constant 0 : i32
    %c0_i32_1 = arith.constant 0 : i32
    return %c0_i32, %c0_i32_0 : i32, i32
  }
  func.func @transform_4(%arg0: i32) -> (i32, i32) {
    %c0_i32 = arith.constant 0 : i32
    %c0_i32_0 = arith.constant 0 : i32
    %c0_i32_1 = arith.constant 0 : i32
    return %c0_i32, %c0_i32_0 : i32, i32
  }
  func.func @transform_5(%arg0: i32) -> (i32, i32, i32) {
    %c0_i32 = arith.constant 0 : i32
    %c0_i32_0 = arith.constant 0 : i32
    %c0_i32_1 = arith.constant 0 : i32
    return %arg0, %c0_i32, %c0_i32_0 : i32, i32, i32
  }
}

</mosaic_0001>

<bundles_post_ra>
// kernel: generator_inptrans_forward.7
= control target key start
LH: loop header
LB: loop body
LE: loop exit
PB: predicated region body
PF: predicated region fallthrough
CT: control target
= control target key end

     0   :  { %v213_v0 = vmov 0.0   ;;  %vm53_vm0 = vcmask 523264   ;;  %s401_s1 = inlined_call_operand.vmem [shape: f32[192,64], index: 1, kind: input, shape index: {}]   ;;  %s402_s0 = inlined_call_operand.vmem [shape: f32[32,192], index: 0, kind: input, shape index: {}]   ;;  %s403_s2 = inlined_call_operand.vmem [shape: f32[1,64], index: 2, kind: input, shape index: {}]   ;;  %s404_s3 = inlined_call_operand.vmem [shape: f32[32,64], index: 3, kind: output, shape index: {}]  }
   0x1   :  { %66 = vmatprep.subr.mxu0 %v213_v0  ;;  %164 = vmatprep.subr.mxu1 %v213_v0  ;;  %v37_v1 = vld [vmem:[%s401_s1 + $0x78] sm:$0xff]  ;;  %v36_v2 = vld [vmem:[%s401_s1 + $0x70] sm:$0xff]  ;;  %v35_v3 = vld [vmem:[%s401_s1 + $0x68] sm:$0xff] }
   0x2   :  { %67 = vmatpush1.msra.mxu0 %v37_v1  ;;  %188 = vmatpush1.msra.mxu1 %v37_v1  ;;  %v34_v4 = vld [vmem:[%s401_s1 + $0x60] sm:$0xff]  ;;  %v33_v5 = vld [vmem:[%s401_s1 + $0x58] sm:$0xff]  ;;  %v32_v6 = vld [vmem:[%s401_s1 + $0x50] sm:$0xff] }
   0x3   :  { %68 = vmatprep.subr.mxu0 %v213_v0  ;;  %165 = vmatprep.subr.mxu1 %v213_v0  ;;  %v31_v7 = vld [vmem:[%s401_s1 + $0x48] sm:$0xff]  ;;  %v30_v8 = vld [vmem:[%s401_s1 + $0x40] sm:$0xff]  ;;  %v29_v9 = vld [vmem:[%s401_s1 + $0x38] sm:$0xff] }
   0x4   :  { %69 = vmatpush1.msra.mxu0 %v36_v2  ;;  %189 = vmatpush1.msra.mxu1 %v36_v2  ;;  %v28_v10 = vld [vmem:[%s401_s1 + $0x30] sm:$0xff]  ;;  %v27_v11 = vld [vmem:[%s401_s1 + $0x28] sm:$0xff]  ;;  %v26_v12 = vld [vmem:[%s401_s1 + $0x20] sm:$0xff] }
   0x5   :  { %70 = vmatprep.subr.mxu0 %v213_v0  ;;  %166 = vmatprep.subr.mxu1 %v213_v0  ;;  %v25_v13 = vld [vmem:[%s401_s1 + $0x18] sm:$0xff]  ;;  %v24_v14 = vld [vmem:[%s401_s1 + $0x10] sm:$0xff]  ;;  %v23_v15 = vld [vmem:[%s401_s1 + $0x8] sm:$0xff] }
   0x6   :  { %71 = vmatpush1.msra.mxu0 %v35_v3  ;;  %190 = vmatpush1.msra.mxu1 %v35_v3  ;;  %v22_v16 = vld [vmem:[%s401_s1] sm:$0xff]  ;;  %v45_v17 = vld [vmem:[%s401_s1 + $0xb8] sm:$0xff]  ;;  %v44_v18 = vld [vmem:[%s401_s1 + $0xb0] sm:$0xff] }
   0x7   :  { %72 = vmatprep.subr.mxu0 %v213_v0  ;;  %167 = vmatprep.subr.mxu1 %v213_v0  ;;  %v43_v19 = vld [vmem:[%s401_s1 + $0xa8] sm:$0xff]  ;;  %v42_v20 = vld [vmem:[%s401_s1 + $0xa0] sm:$0xff]  ;;  %v41_v21 = vld [vmem:[%s401_s1 + $0x98] sm:$0xff] }
   0x8   :  { %73 = vmatpush1.msra.mxu0 %v34_v4  ;;  %191 = vmatpush1.msra.mxu1 %v34_v4  ;;  %v40_v22 = vld [vmem:[%s401_s1 + $0x90] sm:$0xff]  ;;  %v39_v23 = vld [vmem:[%s401_s1 + $0x88] sm:$0xff]  ;;  %v38_v24 = vld [vmem:[%s401_s1 + $0x80] sm:$0xff] }
   0x9   :  { %74 = vmatprep.subr.mxu0 %v213_v0  ;;  %168 = vmatprep.subr.mxu1 %v213_v0  ;;  %v15_v25 = vld [vmem:[%s402_s0 + $0x8] sm:$0xff]  ;;  %v14_v27 = vld [vmem:[%s402_s0] sm:$0xff]  ;;  %v17_v29 = vld [vmem:[%s402_s0 + $0x18] sm:$0xff] }
   0xa   :  { %75 = vmatpush1.msra.mxu0 %v33_v5  ;;  %192 = vmatpush1.msra.mxu1 %v33_v5  ;;  %v19_v26 = vld [vmem:[%s402_s0 + $0x28] sm:$0xff]  ;;  %v18_v28 = vld [vmem:[%s402_s0 + $0x20] sm:$0xff]  ;;  %v21_v30 = vld [vmem:[%s402_s0 + $0x38] sm:$0xff] }
   0xb   :  { %76 = vmatprep.subr.mxu0 %v213_v0  ;;  %169 = vmatprep.subr.mxu1 %v213_v0  ;;  %v16_v31 = vld [vmem:[%s402_s0 + $0x10] sm:$0xff]  ;;  %v159_v33 = vld [vmem:[%s403_s2] ss:$0 sm:$0xff] }
   0xc   :  { %77 = vmatpush1.msra.mxu0 %v32_v6  ;;  %193 = vmatpush1.msra.mxu1 %v32_v6  ;;  %v20_v32 = vld [vmem:[%s402_s0 + $0x30] sm:$0xff] }
   0xd   :  { %78 = vmatprep.subr.mxu0 %v213_v0  ;;  %170 = vmatprep.subr.mxu1 %v213_v0 }
   0xe   :  { %79 = vmatpush1.msra.mxu0 %v31_v7  ;;  %194 = vmatpush1.msra.mxu1 %v31_v7 }
   0xf   :  { %80 = vmatprep.subr.mxu0 %v213_v0  ;;  %171 = vmatprep.subr.mxu1 %v213_v0 }
  0x10   :  { %81 = vmatpush1.msra.mxu0 %v30_v8  ;;  %195 = vmatpush1.msra.mxu1 %v30_v8 }
  0x11   :  { %82 = vmatprep.subr.mxu0 %v213_v0  ;;  %172 = vmatprep.subr.mxu1 %v213_v0 }
  0x12   :  { %83 = vmatpush1.msra.mxu0 %v29_v9  ;;  %196 = vmatpush1.msra.mxu1 %v29_v9 }
  0x13   :  { %84 = vmatprep.subr.mxu0 %v213_v0  ;;  %173 = vmatprep.subr.mxu1 %v213_v0 }
  0x14   :  { %85 = vmatpush1.msra.mxu0 %v28_v10  ;;  %197 = vmatpush1.msra.mxu1 %v28_v10 }
  0x15   :  { %86 = vmatprep.subr.mxu0 %v213_v0  ;;  %174 = vmatprep.subr.mxu1 %v213_v0 }
  0x16   :  { %87 = vmatpush1.msra.mxu0 %v27_v11  ;;  %198 = vmatpush1.msra.mxu1 %v27_v11 }
  0x17   :  { %88 = vmatprep.subr.mxu0 %v213_v0  ;;  %175 = vmatprep.subr.mxu1 %v213_v0 }
  0x18   :  { %89 = vmatpush1.msra.mxu0 %v26_v12  ;;  %199 = vmatpush1.msra.mxu1 %v26_v12 }
  0x19   :  { %90 = vmatprep.subr.mxu0 %v213_v0  ;;  %176 = vmatprep.subr.mxu1 %v213_v0 }
  0x1a   :  { %91 = vmatpush1.msra.mxu0 %v25_v13  ;;  %200 = vmatpush1.msra.mxu1 %v25_v13 }
  0x1b   :  { %92 = vmatprep.subr.mxu0 %v213_v0  ;;  %177 = vmatprep.subr.mxu1 %v213_v0 }
  0x1c   :  { %93 = vmatpush1.msra.mxu0 %v24_v14  ;;  %201 = vmatpush1.msra.mxu1 %v24_v14 }
  0x1d   :  { %94 = vmatprep.subr.mxu0 %v213_v0  ;;  %178 = vmatprep.subr.mxu1 %v213_v0 }
  0x1e   :  { %95 = vmatpush1.msra.mxu0 %v23_v15  ;;  %202 = vmatpush1.msra.mxu1 %v23_v15 }
  0x1f   :  { %96 = vmatprep.subr.mxu0 %v213_v0  ;;  %179 = vmatprep.subr.mxu1 %v213_v0 }
  0x20   :  { %97 = vmatpush1.msra.mxu0 %v22_v16  ;;  %203 = vmatpush1.msra.mxu1 %v22_v16 }
  0x21   :  { %114 = vmatprep.subr.mxu0 %v213_v0  ;;  %180 = vmatprep.subr.mxu1 %v213_v0 }
  0x22   :  { %115 = vmatpush2.msra.mxu0 %v45_v17  ;;  %204 = vmatpush2.msra.mxu1 %v45_v17 }
  0x23   :  { %116 = vmatprep.subr.mxu0 %v213_v0  ;;  %181 = vmatprep.subr.mxu1 %v213_v0 }
  0x24   :  { %117 = vmatpush2.msra.mxu0 %v44_v18  ;;  %205 = vmatpush2.msra.mxu1 %v44_v18 }
  0x25   :  { %118 = vmatprep.subr.mxu0 %v213_v0  ;;  %182 = vmatprep.subr.mxu1 %v213_v0 }
  0x26   :  { %119 = vmatpush2.msra.mxu0 %v43_v19  ;;  %206 = vmatpush2.msra.mxu1 %v43_v19 }
  0x27   :  { %120 = vmatprep.subr.mxu0 %v213_v0  ;;  %183 = vmatprep.subr.mxu1 %v213_v0 }
  0x28   :  { %121 = vmatpush2.msra.mxu0 %v42_v20  ;;  %207 = vmatpush2.msra.mxu1 %v42_v20 }
  0x29   :  { %122 = vmatprep.subr.mxu0 %v213_v0  ;;  %184 = vmatprep.subr.mxu1 %v213_v0 }
  0x2a   :  { %123 = vmatpush2.msra.mxu0 %v41_v21  ;;  %208 = vmatpush2.msra.mxu1 %v41_v21 }
  0x2b   :  { %124 = vmatprep.subr.mxu0 %v213_v0  ;;  %185 = vmatprep.subr.mxu1 %v213_v0 }
  0x2c   :  { %125 = vmatpush2.msra.mxu0 %v40_v22  ;;  %209 = vmatpush2.msra.mxu1 %v40_v22 }
  0x2d   :  { %126 = vmatprep.subr.mxu0 %v213_v0  ;;  %186 = vmatprep.subr.mxu1 %v213_v0 }
  0x2e   :  { %127 = vmatpush2.msra.mxu0 %v39_v23  ;;  %210 = vmatpush2.msra.mxu1 %v39_v23 }
  0x2f   :  { %128 = vmatprep.subr.mxu0 %v213_v0  ;;  %187 = vmatprep.subr.mxu1 %v213_v0 }
  0x30   :  { %129 = vmatpush2.msra.mxu0 %v38_v24  ;;  %211 = vmatpush2.msra.mxu1 %v38_v24 }
  0x31   :  { %160 = vmatprep.mubr.msk.f32.mxu0 %vm53_vm0, %v15_v25  ;;  %162 = vmatprep.mubr.msk.f32.mxu1 %vm53_vm0, %v19_v26 }
  0x32   :  { %131 = vmatmul.mubr.f32.vlgmr.msra.gmra.mxu0 %v14_v27  ;;  %141 = vmatmul.mubr.f32.vlgmr.msra.gmra.mxu1 %v18_v28 }
  0x33   :  { %161 = vmatprep.mubr.msk.f32.mxu0 %vm53_vm0, %v17_v29  ;;  %163 = vmatprep.mubr.msk.f32.mxu1 %vm53_vm0, %v21_v30 }
  0x36   :  { %136 = vmatmul.mubr.f32.gmra.mxu0 %v16_v31  ;;  %146 = vmatmul.mubr.f32.gmra.mxu1 %v20_v32 }
  0xf2   :  { %v132_v34 = vpop.f32.mrf.mxu0  ;;  %v142_v35 = vpop.f32.mrf.mxu1 }
  0xf3   :  { %v133_v36 = vadd.f32 %v159_v33, %v132_v34  ;;  %v143_v37 = vadd.f32 %v159_v33, %v142_v35 }
  0xf4   :  { %v134_v38 = vpop.f32.mrf.mxu0  ;;  %v144_v39 = vpop.f32.mrf.mxu1 }
  0xf5   :  { %151 = vst.msk [vmem:[%s404_s3] sm:$0xff] %vm53_vm0, %v133_v36  ;;  %153 = vst.msk [vmem:[%s404_s3 + $0x10] sm:$0xff] %vm53_vm0, %v143_v37 }
  0xf6   :  { %v137_v40 = vpop.f32.mrf.mxu0  ;;  %v147_v41 = vpop.f32.mrf.mxu1 }
  0xf7   :  { %v138_v42 = vadd.f32 %v159_v33, %v137_v40  ;;  %v148_v43 = vadd.f32 %v159_v33, %v147_v41 }
  0xf8   :  { %v139_v44 = vpop.f32.mrf.mxu0  ;;  %v149_v45 = vpop.f32.mrf.mxu1 }
  0xf9   :  { %152 = vst.msk [vmem:[%s404_s3 + $0x8] sm:$0xff] %vm53_vm0, %v138_v42  ;;  %154 = vst.msk [vmem:[%s404_s3 + $0x18] sm:$0xff] %vm53_vm0, %v148_v43 }

// kernel: generator_inptrans_forward.9
= control target key start
LH: loop header
LB: loop body
LE: loop exit
PB: predicated region body
PF: predicated region fallthrough
CT: control target
= control target key end

     0   :  { %vm38_vm0 = vcmask 261120   ;;  %s588_s1 = inlined_call_operand.vmem [shape: f32[32,128], index: 1, kind: input, shape index: {}]   ;;  %s589_s0 = inlined_call_operand.vmem [shape: f32[32,32], index: 0, kind: input, shape index: {}]   ;;  %s590_s3 = inlined_call_operand.vmem [shape: f32[128,32], index: 3, kind: input, shape index: {}]   ;;  %s591_s2 = inlined_call_operand.vmem [shape: f32[1,128], index: 2, kind: input, shape index: {}]   ;;  %s592_s4 = inlined_call_operand.vmem [shape: f32[1,32], index: 4, kind: input, shape index: {}]   ;;  %s593_s5 = inlined_call_operand.vmem [shape: f32[2,32], index: 5, kind: input, shape index: {}]   ;;  %s594_s6 = inlined_call_operand.vmem [shape: f32[32,32], index: 6, kind: output, shape index: {}]  }
   0x1   :  { %v30_v0 = vld [vmem:[%s588_s1 + $0x18] sm:$0xff]  ;;  %v29_v1 = vld [vmem:[%s588_s1 + $0x10] sm:$0xff]  ;;  %v472_v2 = vld [vmem:[%s589_s0] sm:$0xff] }
   0x2   :  { %368 = vmatprep.subr.mxu0 %v30_v0  ;;  %v28_v3 = vld [vmem:[%s588_s1 + $0x8] sm:$0xff]  ;;  %376 = vmatprep.mubr.msk.f32.mxu0 %vm38_vm0, %v472_v2  ;;  %v155_v4 = vld [vmem:[%s590_s3 + $0x78] sm:$0xff]  ;;  %v154_v5 = vld [vmem:[%s590_s3 + $0x70] sm:$0xff] }
   0x3   :  { %369 = vmatpush3.msra.mxu0 %v30_v0  ;;  %382 = vmatprep.subr.mxu1 %v155_v4  ;;  %v27_v6 = vld [vmem:[%s588_s1] sm:$0xff]  ;;  %v153_v7 = vld [vmem:[%s590_s3 + $0x68] sm:$0xff]  ;;  %v502_v10 = vld [vmem:[%s589_s0 + $0x10] sm:$0xff] }
   0x4   :  { %370 = vmatprep.subr.mxu0 %v29_v1  ;;  %383 = vmatpush3.msra.mxu1 %v155_v4  ;;  %v494_v8 = vld [vmem:[%s589_s0 + $0x8] sm:$0xff]  ;;  %v152_v9 = vld [vmem:[%s590_s3 + $0x60] sm:$0xff]  ;;  %v151_v11 = vld [vmem:[%s590_s3 + $0x58] sm:$0xff] }
   0x5   :  { %371 = vmatpush3.msra.mxu0 %v29_v1  ;;  %384 = vmatprep.subr.mxu1 %v154_v5  ;;  %v514_v12 = vld [vmem:[%s589_s0 + $0x18] sm:$0xff]  ;;  %v150_v13 = vld [vmem:[%s590_s3 + $0x50] sm:$0xff]  ;;  %v149_v14 = vld [vmem:[%s590_s3 + $0x48] sm:$0xff] }
   0x6   :  { %372 = vmatprep.subr.mxu0 %v28_v3  ;;  %385 = vmatpush3.msra.mxu1 %v154_v5  ;;  %v148_v15 = vld [vmem:[%s590_s3 + $0x40] sm:$0xff]  ;;  %v147_v16 = vld [vmem:[%s590_s3 + $0x38] sm:$0xff]  ;;  %v146_v17 = vld [vmem:[%s590_s3 + $0x30] sm:$0xff] }
   0x7   :  { %373 = vmatpush3.msra.mxu0 %v28_v3  ;;  %386 = vmatprep.subr.mxu1 %v153_v7  ;;  %v145_v18 = vld [vmem:[%s590_s3 + $0x28] sm:$0xff]  ;;  %v144_v19 = vld [vmem:[%s590_s3 + $0x20] sm:$0xff]  ;;  %v143_v20 = vld [vmem:[%s590_s3 + $0x18] sm:$0xff] }
   0x8   :  { %374 = vmatprep.subr.mxu0 %v27_v6  ;;  %387 = vmatpush3.msra.mxu1 %v153_v7  ;;  %v142_v21 = vld [vmem:[%s590_s3 + $0x10] sm:$0xff]  ;;  %v141_v22 = vld [vmem:[%s590_s3 + $0x8] sm:$0xff]  ;;  %v140_v23 = vld [vmem:[%s590_s3] sm:$0xff] }
   0x9   :  { %375 = vmatpush3.msra.mxu0 %v27_v6  ;;  %388 = vmatprep.subr.mxu1 %v152_v9  ;;  %v334_v24 = vld [vmem:[%s591_s2] ss:$0 sm:$0xff] }
   0xa   :  { %377 = vmatmul.mubr.msk.f32.vlgmr.msra.gmra.mxu0 %vm38_vm0, %v494_v8  ;;  %389 = vmatpush3.msra.mxu1 %v152_v9  ;;  %v339_v42 = vld [vmem:[%s592_s4] ss:$0 sm:$0xff] }
   0xb   :  { %379 = vmatprep.mubr.msk.f32.mxu0 %vm38_vm0, %v502_v10  ;;  %390 = vmatprep.subr.mxu1 %v151_v11 }
   0xc   :  { %391 = vmatpush3.msra.mxu1 %v151_v11 }
   0xd   :  { %392 = vmatprep.subr.mxu1 %v150_v13 }
   0xe   :  { %380 = vmatmul.mubr.msk.f32.gmra.mxu0 %vm38_vm0, %v514_v12  ;;  %393 = vmatpush3.msra.mxu1 %v150_v13 }
   0xf   :  { %394 = vmatprep.subr.mxu1 %v149_v14 }
  0x10   :  { %395 = vmatpush3.msra.mxu1 %v149_v14 }
  0x11   :  { %396 = vmatprep.subr.mxu1 %v148_v15 }
  0x12   :  { %397 = vmatpush3.msra.mxu1 %v148_v15  ;;  %v310_v15 = vlaneseq }
  0x13   :  { %398 = vmatprep.subr.mxu1 %v147_v16 }
  0x14   :  { %399 = vmatpush3.msra.mxu1 %v147_v16 }
  0x15   :  { %400 = vmatprep.subr.mxu1 %v146_v17 }
  0x16   :  { %401 = vmatpush3.msra.mxu1 %v146_v17 }
  0x17   :  { %402 = vmatprep.subr.mxu1 %v145_v18 }
  0x18   :  { %403 = vmatpush3.msra.mxu1 %v145_v18 }
  0x19   :  { %404 = vmatprep.subr.mxu1 %v144_v19 }
  0x1a   :  { %405 = vmatpush3.msra.mxu1 %v144_v19 }
  0x1b   :  { %406 = vmatprep.subr.mxu1 %v143_v20 }
  0x1c   :  { %407 = vmatpush3.msra.mxu1 %v143_v20 }
  0x1d   :  { %408 = vmatprep.subr.mxu1 %v142_v21 }
  0x1e   :  { %409 = vmatpush3.msra.mxu1 %v142_v21  ;;  %v311_v21 = vshrl.u32 %v310_v15, 7 }
  0x1f   :  { %410 = vmatprep.subr.mxu1 %v141_v22 }
  0x20   :  { %411 = vmatpush3.msra.mxu1 %v141_v22 }
  0x21   :  { %412 = vmatprep.subr.mxu1 %v140_v23 }
  0x22   :  { %413 = vmatpush3.msra.mxu1 %v140_v23 }
  0xca   :  { %v378_v25 = vpop.f32.mrf.mxu0 }
  0xcb   :  { %v123_v26 = vadd.f32 %v378_v25, %v334_v24  ;;  %v297_v25 = vld [vmem:[%s593_s5] sm:$0x3] }
  0xcc   :  { %v117_v27 = vpop.f32.mrf.mxu0 }
  0xcd   :  { %v118_v28 = vadd.f32 %v334_v24, %v117_v27  ;;  %v137_v31 = vmax.f32 %v123_v26, 0.0  ;;  %v320_v26 = vsub.s32 1, %v311_v21 }
  0xce   :  { %v381_v29 = vpop.f32.mrf.mxu0 }
  0xcf   :  { %v136_v30 = vmax.f32 %v118_v28, 0.0  ;;  %v133_v32 = vadd.f32 %v381_v29, %v334_v24  ;;  %v321_v29 = vrot.slane %v297_v25, %v320_v26 }
  0xd0   :  { %v127_v33 = vpop.f32.mrf.mxu0 }
  0xd1   :  { %v128_v34 = vadd.f32 %v334_v24, %v127_v33  ;;  %414 = vmatprep.mubr.f32.mxu1 %v136_v30  ;;  %v139_v36 = vmax.f32 %v133_v32, 0.0  ;;  %v312_v24 = vsub.s32 0, %v311_v21 }
  0xd2   :  { %415 = vmatmul.mubr.f32.vlgmr.msra.gmra.mxu1 %v137_v31 }
  0xd3   :  { %v138_v35 = vmax.f32 %v128_v34, 0.0  ;;  %v313_v27 = vrot.slane %v297_v25, %v312_v24 }
  0xd5   :  { %417 = vmatprep.mubr.f32.mxu1 %v138_v35 }
  0xd6   :  { %418 = vmatmul.mubr.f32.gmra.mxu1 %v139_v36 }
 0x192   :  { %v416_v37 = vpop.f32.mrf.mxu1 }
 0x193   :  { %v242_v39 = vadd.f32 %v416_v37, %v494_v8 }
 0x194   :  { %v222_v38 = vpop.f32.mrf.mxu1 }
 0x195   :  { %v241_v40 = vadd.f32 %v222_v38, %v472_v2  ;;  %v253_v48 = vadd.f32 %v339_v42, %v242_v39 }
 0x196   :  { %v419_v41 = vpop.f32.mrf.mxu1 }
 0x197   :  { %v252_v43 = vadd.f32 %v339_v42, %v241_v40  ;;  %v244_v45 = vadd.f32 %v419_v41, %v514_v12  ;;  %v259_v50 = vsel %vm38_vm0, %v253_v48, 0.0 }
 0x198   :  { %v232_v44 = vpop.f32.mrf.mxu1 }
 0x199   :  { %v243_v46 = vadd.f32 %v232_v44, %v502_v10  ;;  %v256_v47 = vsel %vm38_vm0, %v252_v43, 0.0  ;;  %v255_v52 = vadd.f32 %v339_v42, %v244_v45 }
 0x19a   :  { %257 = vadd.xlane.f32.xlu0 %v256_v47 }
 0x19b   :  { %v254_v49 = vadd.f32 %v339_v42, %v243_v46  ;;  %v265_v53 = vsel %vm38_vm0, %v255_v52, 0.0 }
 0x19d   :  { %v262_v51 = vsel %vm38_vm0, %v254_v49, 0.0 }
 0x19e   :  { %260 = vadd.xlane.f32.xlu0 %v259_v50  ;;  %263 = vadd.xlane.f32.xlu1 %v262_v51 }
 0x1a2   :  { %266 = vadd.xlane.f32.xlu1 %v265_v53 }
 0x223   :  { %v258_v54 = vpop.xlane.xlu0 %257 }
 0x224   :  { %v269_v55 = vmul.f32 0.03125, %v258_v54 }
 0x226   :  { %v273_v56 = vsub.f32 %v252_v43, %v269_v55 }
 0x227   :  { %v261_v57 = vpop.xlane.xlu0 %260  ;;  %v264_v58 = vpop.xlane.xlu1 %263 }
 0x228   :  { %v270_v59 = vmul.f32 0.03125, %v261_v57  ;;  %v271_v60 = vmul.f32 0.03125, %v264_v58  ;;  %v277_v61 = vmul.f32 %v273_v56, %v273_v56 }
 0x22a   :  { %v274_v62 = vsub.f32 %v253_v48, %v270_v59  ;;  %v275_v63 = vsub.f32 %v254_v49, %v271_v60  ;;  %v281_v0 = vsel %vm38_vm0, %v277_v61, 0.0 }
 0x22b   :  { %282 = vadd.xlane.f32.xlu0 %v281_v0  ;;  %v267_v1 = vpop.xlane.xlu1 %266 }
 0x22c   :  { %v272_v2 = vmul.f32 0.03125, %v267_v1  ;;  %v278_v3 = vmul.f32 %v274_v62, %v274_v62  ;;  %v279_v4 = vmul.f32 %v275_v63, %v275_v63 }
 0x22e   :  { %v276_v5 = vsub.f32 %v255_v52, %v272_v2  ;;  %v284_v6 = vsel %vm38_vm0, %v278_v3, 0.0  ;;  %v287_v7 = vsel %vm38_vm0, %v279_v4, 0.0 }
 0x22f   :  { %285 = vadd.xlane.f32.xlu1 %v284_v6  ;;  %288 = vadd.xlane.f32.xlu0 %v287_v7 }
 0x230   :  { %v280_v8 = vmul.f32 %v276_v5, %v276_v5 }
 0x232   :  { %v290_v9 = vsel %vm38_vm0, %v280_v8, 0.0 }
 0x233   :  { %291 = vadd.xlane.f32.xlu1 %v290_v9 }
 0x2b4   :  { %v283_v10 = vpop.xlane.xlu0 %282 }
 0x2b5   :  { %v293_v11 = vmul.f32 0.03125, %v283_v10 }
 0x2b7   :  { %v298_v12 = vadd.f32 1e-05, %v293_v11 }
 0x2b8   :  { %v289_v13 = vpop.xlane.xlu0 %288  ;;  %v286_v14 = vpop.xlane.xlu1 %285 }
 0x2b9   :  { %420 = vrsqrt.f32 %v298_v12  ;;  %v295_v16 = vmul.f32 0.03125, %v289_v13  ;;  %v294_v17 = vmul.f32 0.03125, %v286_v14 }
 0x2bb   :  { %v300_v18 = vadd.f32 1e-05, %v295_v16  ;;  %v299_v19 = vadd.f32 1e-05, %v294_v17 }
 0x2bc   :  { %v292_v20 = vpop.xlane.xlu1 %291 }
 0x2bd   :  { %422 = vrsqrt.f32 %v300_v18  ;;  %v296_v22 = vmul.f32 0.03125, %v292_v20 }
 0x2be   :  { %424 = vrsqrt.f32 %v299_v19 }
 0x2bf   :  { %v301_v23 = vadd.f32 1e-05, %v296_v22 }
 0x2c1   :  { %426 = vrsqrt.f32 %v301_v23 }
 0x2c6   :  { %v421_v28 = vpop.eup %420 }
 0x2c7   :  { %v306_v30 = vmul.f32 %v421_v28, %v273_v56 }
 0x2c9   :  { %v314_v31 = vmul.f32 %v313_v27, %v306_v30 }
 0x2ca   :  { %v423_v32 = vpop.eup %422 }
 0x2cb   :  { %v425_v33 = vpop.eup %424  ;;  %v322_v34 = vadd.f32 %v321_v29, %v314_v31  ;;  %v308_v35 = vmul.f32 %v423_v32, %v275_v63 }
 0x2cc   :  { %v307_v36 = vmul.f32 %v425_v33, %v274_v62 }
 0x2cd   :  { %326 = vst.msk [vmem:[%s594_s6] sm:$0xff] %vm38_vm0, %v322_v34  ;;  %v316_v37 = vmul.f32 %v313_v27, %v308_v35 }
 0x2ce   :  { %v427_v38 = vpop.eup %426  ;;  %v315_v39 = vmul.f32 %v313_v27, %v307_v36 }
 0x2cf   :  { %v324_v40 = vadd.f32 %v321_v29, %v316_v37  ;;  %v309_v41 = vmul.f32 %v427_v38, %v276_v5 }
 0x2d0   :  { %v323_v42 = vadd.f32 %v321_v29, %v315_v39 }
 0x2d1   :  { %328 = vst.msk [vmem:[%s594_s6 + $0x10] sm:$0xff] %vm38_vm0, %v324_v40  ;;  %v317_v43 = vmul.f32 %v313_v27, %v309_v41 }
 0x2d2   :  { %327 = vst.msk [vmem:[%s594_s6 + $0x8] sm:$0xff] %vm38_vm0, %v323_v42 }
 0x2d3   :  { %v325_v44 = vadd.f32 %v321_v29, %v317_v43 }
 0x2d5   :  { %329 = vst.msk [vmem:[%s594_s6 + $0x18] sm:$0xff] %vm38_vm0, %v325_v44 }

// kernel: generator_inptrans_forward.10
= control target key start
LH: loop header
LB: loop body
LE: loop exit
PB: predicated region body
PF: predicated region fallthrough
CT: control target
= control target key end

     0   :  { %s2329_s27 = smov 0   ;;  %s2590_s0 = inlined_call_operand.vmem [shape: f32[2,16,32], index: 0, kind: input, shape index: {}, may-alias: {0,2}]   ;;  %s2591_s1 = inlined_call_operand.vmem [shape: f32[2,16,32], index: 1, kind: input, shape index: {}, may-alias: {1,3}]   ;;  %s2592_s2 = inlined_call_operand.vmem [shape: f32[2,16,32], index: 2, kind: input, shape index: {}, may-alias: {0,2}]   ;;  %s2593_s3 = inlined_call_operand.vmem [shape: f32[2,16,32], index: 3, kind: input, shape index: {}, may-alias: {1,3}]   ;;  %s2594_s4 = inlined_call_operand.vmem [shape: f32[2,1,16], index: 4, kind: input, shape index: {}]   ;;  %s2595_s5 = inlined_call_operand.vmem [shape: f32[32,128], index: 5, kind: input, shape index: {}]   ;;  %s2596_s6 = inlined_call_operand.vmem [shape: f32[1,128], index: 6, kind: input, shape index: {}]   ;;  %s2597_s7 = inlined_call_operand.vmem [shape: f32[2,32], index: 7, kind: input, shape index: {}]   ;;  %s2598_s8 = inlined_call_operand.vmem [shape: f32[2,16,32], index: 8, kind: output, shape index: {}]  }
   0x1 LB: > { %s1987_s28 = sadd.s32 4294967295, %s2276_s27   ;;  %p1991_p0 = scmp.ge.s32.totalorder %s2276_s27, 1  ;;  %s2276_s27 = sphi %s2329_s27, %s18_s27  }
   0x2   : > { %p300_p1 = scmp.lt.s32.totalorder %s2276_s27, 3 }
   0x4   : > { %p301_p2 = pnand %p1991_p0, %p300_p1 }
   0x5   : > { %p352_p3 = scmp.lt.s32.totalorder (!%p301_p2), %s1987_s28, 1  ;;  %s2278_s11 = smov (!%p301_p2), 96  }
   0x6   : > { %304 = sbr.rel (%p301_p2) target bundleno = 2607 (0xa2f), region = 52  ;;  %s2280_s12 = smov (!%p301_p2), 64  }
   0x7   : > { %s2282_s17 = smov (!%p301_p2), 112   ;;  %s2283_s18 = smov (!%p301_p2), 104  }
   0xb   : > { %v2340_v0 = vld [vmem:[%s2595_s5 + $0x18] sm:$0xff]  ;;  %v2345_v1 = vld [vmem:[%s2595_s5 + $0x8] sm:$0xff]  ;;  %v2354_v2 = vld [vmem:[%s2595_s5 + $0x10] sm:$0xff]  ;;  %s2600_s28 = smov (!%p352_p3, %s1987_s28), 1  ;;  %vm403_vm0 = vcmask 261120   ;;  %vm682_vm1 = vcmask 64512  }
   0xc   : > { %495 = vrot.lane.b32.xlu0 %v2340_v0, %s2278_s11  ;;  %491 = vrot.lane.b32.xlu1 %v2345_v1, %s2278_s11  ;;  %v2359_v3 = vld [vmem:[%s2595_s5] sm:$0xff]  ;;  %s2367_s16 = sshll.u32 %s2600_s28, 4  ;;  %s374_s15 = scalar_lea.vmem %s2594_s4, %s2600_s28  ;;  %vm780_vm2 = vcmask 130048  }
   0xd   : > { %2111 = vmatprep.subr.mxu0 %v2340_v0  ;;  %s366_s19 = scalar_lea.vmem %s2592_s2, %s2367_s16  ;;  %s371_s22 = scalar_lea.vmem %s2593_s3, %s2367_s16  ;;  %v2398_v9 = vld [vmem:[%s2596_s6] ss:$0 sm:$0xff] }
   0xe   : > { %2112 = vmatpush3.msra.mxu0 %v2340_v0  ;;  %v386_v4 = vld [vmem:[%s366_s19] sm:$0xff]  ;;  %s356_s25 = scalar_lea.vmem %s2590_s0, %s2367_s16  ;;  %s361_s30 = scalar_lea.vmem %s2591_s1, %s2367_s16  ;;  %v387_v17 = vld [vmem:[%s366_s19 + $0x8] sm:$0xff] }
   0xf   : > { %2113 = vmatprep.subr.mxu0 %v2354_v2  ;;  %v388_v5 = vld [vmem:[%s371_s22] sm:$0xff]  ;;  %v2393_v8 = vld [vmem:[%s356_s25 + $0x8] sm:$0xff]  ;;  %s2281_s28 = smov 32   ;;  %s379_s23 = scalar_lea.vmem %s2598_s8, %s2367_s16 }
  0x10   : > { %493 = vrot.lane.b32.xlu0 %v2354_v2, %s2278_s11  ;;  %489 = vrot.lane.b32.xlu1 %v2359_v3, %s2278_s11  ;;  %v390_v6 = vadd.f32 %v388_v5, %v386_v4  ;;  %v2391_v7 = vld [vmem:[%s356_s25] sm:$0xff]  ;;  %v383_v11 = vld [vmem:[%s361_s30 + $0x8] sm:$0xff] }
  0x11   : > { %2114 = vmatpush3.msra.mxu0 %v2354_v2  ;;  %v382_v10 = vld [vmem:[%s361_s30] sm:$0xff]  ;;  %v385_v13 = vadd.f32 %v383_v11, %v2393_v8  ;;  %v389_v18 = vld [vmem:[%s371_s22 + $0x8] sm:$0xff] }
  0x12   : > { %2115 = vmatprep.subr.mxu0 %v2345_v1  ;;  %2130 = vmatprep.mubr.msk.f32.mxu1 %vm403_vm0, %v390_v6  ;;  %v384_v12 = vadd.f32 %v382_v10, %v2391_v7  ;;  %v391_v20 = vadd.f32 %v389_v18, %v387_v17  ;;  %v2461_v38 = vld [vmem:[%s374_s15] ss:$0 sm:$0xff] }
  0x13   : > { %2116 = vmatpush3.msra.mxu0 %v2345_v1 }
  0x14   : > { %2117 = vmatprep.subr.mxu0 %v2359_v3  ;;  %501 = vrot.lane.b32.xlu0 %v2398_v9, %s2278_s11  ;;  %s2279_s11 = smov 120  }
  0x15   : > { %2118 = vmatpush3.msra.mxu0 %v2359_v3  ;;  %2119 = vmatprep.mubr.msk.f32.mxu0 %vm403_vm0, %v384_v12 }
  0x16   : > { %2120 = vmatmul.mubr.msk.f32.vlgmr.msra.gmra.mxu0 %vm403_vm0, %v385_v13 }
  0x17   : > { %2141 = vmatprep.mubr.msk.f32.mxu0 %vm403_vm0, %v386_v4 }
  0x7e   : > { %v496_v14 = vpop.permute.xlu0 %495  ;;  %v492_v15 = vpop.permute.xlu1 %491 }
  0x7f   : > { %2122 = vmatprep.subr.mxu1 %v496_v14 }
  0x80   : > { %2123 = vmatpush3.msra.mxu1 %v496_v14 }
  0x82   : > { %v494_v16 = vpop.permute.xlu0 %493  ;;  %v490_v19 = vpop.permute.xlu1 %489 }
  0x83   : > { %2124 = vmatprep.subr.mxu1 %v494_v16 }
  0x84   : > { %2125 = vmatpush3.msra.mxu1 %v494_v16 }
  0x85   : > { %2126 = vmatprep.subr.mxu1 %v492_v15 }
  0x86   : > { %2127 = vmatpush3.msra.mxu1 %v492_v15  ;;  %v502_v24 = vpop.permute.xlu0 %501 }
  0x87   : > { %2128 = vmatprep.subr.mxu1 %v490_v19 }
  0x88   : > { %2129 = vmatpush3.msra.mxu1 %v490_v19 }
  0x89   : > { %2131 = vmatmul.mubr.msk.f32.vlgmr.msra.gmra.mxu1 %vm403_vm0, %v391_v20 }
  0xd6   : > { %v2121_v21 = vpop.f32.mrf.mxu0 }
  0xd7   : > { %v2428_v29 = vadd.f32 %v2121_v21, %v2398_v9 }
  0xd8   : > { %v476_v22 = vpop.f32.mrf.mxu0 }
  0xd9   : > { %v2413_v23 = vadd.f32 %v2398_v9, %v476_v22 }
  0xdb   : > { %2148 = vmatprep.mubr.msk.f32.mxu1 %vm682_vm1, %v2413_v23 }
 0x149   : > { %v2132_v25 = vpop.f32.mrf.mxu1 }
 0x14a   : > { %v2417_v26 = vadd.f32 %v2132_v25, %v502_v24 }
 0x14b   : > { %v576_v27 = vpop.f32.mrf.mxu1 }
 0x14c   : > { %v2419_v28 = vadd.f32 %v576_v27, %v502_v24  ;;  %890 = vrot.lane.b32.xlu1 %v2417_v26, %s2279_s11  ;;  %2144 = vmatprep.subr.msk.mxu1 %vm682_vm1, %v2417_v26 }
 0x14d   : > { %2145 = vmatpush3.xpose.msk.msra.mxu1 %vm682_vm1, %v2417_v26 }
 0x14e   : > { %888 = vrot.lane.b32.xlu0 %v2419_v28, %s2279_s11  ;;  %2146 = vmatprep.subr.msk.mxu1 %vm682_vm1, %v2419_v28 }
 0x150   : > { %884 = vrot.lane.b32.xlu1 %v2413_v23, %s2279_s11 }
 0x151   : > { %2147 = vmatpush3.xpose.msk.msra.mxu1 %vm682_vm1, %v2419_v28 }
 0x152   : > { %886 = vrot.lane.b32.xlu0 %v2428_v29, %s2279_s11 }
 0x154   : > { %2149 = vmatmul.mubr.msk.f32.vlgmr.msra.gmra.mxu1 %vm682_vm1, %v2428_v29  ;;  %591 = vrot.lane.b32.xlu1 %v2340_v0, %s2280_s12 }
 0x156   : > { %589 = vrot.lane.b32.xlu0 %v2354_v2, %s2280_s12 }
 0x158   : > { %587 = vrot.lane.b32.xlu1 %v2345_v1, %s2280_s12 }
 0x15a   : > { %585 = vrot.lane.b32.xlu0 %v2359_v3, %s2280_s12 }
 0x1be   : > { %v891_v30 = vpop.permute.xlu1 %890 }
 0x1bf   : > { %2158 = vmatprep.subr.msk.mxu1 %vm682_vm1, %v891_v30 }
 0x1c0   : > { %v889_v31 = vpop.permute.xlu0 %888  ;;  %2159 = vmatpush3.xpose.msk.msra.mxu1 %vm682_vm1, %v891_v30 }
 0x1c1   : > { %2160 = vmatprep.subr.msk.mxu1 %vm682_vm1, %v889_v31 }
 0x1c2   : > { %v885_v32 = vpop.permute.xlu1 %884 }
 0x1c3   : > { %2162 = vmatprep.mubr.msk.f32.mxu1 %vm682_vm1, %v885_v32 }
 0x1c4   : > { %v887_v33 = vpop.permute.xlu0 %886  ;;  %2161 = vmatpush3.xpose.msk.msra.mxu1 %vm682_vm1, %v889_v31 }
 0x1c6   : > { %v592_v34 = vpop.permute.xlu1 %591 }
 0x1c7   : > { %2163 = vmatmul.mubr.msk.f32.vlgmr.msra.gmra.mxu1 %vm682_vm1, %v887_v33  ;;  %2133 = vmatprep.subr.mxu0 %v592_v34 }
 0x1c8   : > { %v590_v35 = vpop.permute.xlu0 %589  ;;  %2134 = vmatpush3.msra.mxu0 %v592_v34 }
 0x1c9   : > { %2135 = vmatprep.subr.mxu0 %v590_v35 }
 0x1ca   : > { %2136 = vmatpush3.msra.mxu0 %v590_v35  ;;  %v588_v36 = vpop.permute.xlu1 %587 }
 0x1cb   : > { %2137 = vmatprep.subr.mxu0 %v588_v36 }
 0x1cc   : > { %v586_v37 = vpop.permute.xlu0 %585  ;;  %2138 = vmatpush3.msra.mxu0 %v588_v36 }
 0x1cd   : > { %2139 = vmatprep.subr.mxu0 %v586_v37 }
 0x1ce   : > { %2140 = vmatpush3.msra.mxu0 %v586_v37 }
 0x1cf   : > { %2142 = vmatmul.mubr.msk.f32.vlgmr.msra.gmra.mxu0 %vm403_vm0, %v387_v17 }
 0x214   : > { %v2150_v39 = vpop.f32.mrf.mxu1 }
 0x215   : > { %v771_v40 = vmul.f32 0.35355338, %v2150_v39 }
 0x216   : > { %v761_v41 = vpop.f32.mrf.mxu1 }
 0x217   : > { %v770_v42 = vmul.f32 0.35355338, %v761_v41  ;;  %v779_v43 = vadd.f32 %v2461_v38, %v771_v40 }
 0x219   : > { %v784_v44 = vsel %vm780_vm2, %v779_v43, -inf  ;;  %v778_v45 = vadd.f32 %v2461_v38, %v770_v42 }
 0x21a   : > { %785 = vmax.xlane.f32.xlu0 %v784_v44 }
 0x21b   : > { %v781_v46 = vsel %vm780_vm2, %v778_v45, -inf }
 0x21c   : > { %782 = vmax.xlane.f32.xlu1 %v781_v46 }
 0x287   : > { %v2164_v47 = vpop.f32.mrf.mxu1 }
 0x288   : > { %v976_v48 = vmul.f32 0.35355338, %v2164_v47 }
 0x289   : > { %v966_v49 = vpop.f32.mrf.mxu1 }
 0x28a   : > { %v975_v50 = vmul.f32 0.35355338, %v966_v49  ;;  %v978_v51 = vadd.f32 %v2461_v38, %v976_v48 }
 0x28c   : > { %v982_v52 = vsel %vm780_vm2, %v978_v51, -inf  ;;  %v977_v53 = vadd.f32 %v2461_v38, %v975_v50 }
 0x28d   : > { %983 = vmax.xlane.f32.xlu1 %v982_v52 }
 0x28e   : > { %v979_v54 = vsel %vm780_vm2, %v977_v53, -inf }
 0x28f   : > { %980 = vmax.xlane.f32.xlu0 %v979_v54  ;;  %v2143_v6 = vpop.f32.mrf.mxu0 }
 0x291   : > { %v672_v14 = vpop.f32.mrf.mxu0 }
 0x2a3   : > { %v786_v55 = vpop.xlane.xlu0 %785 }
 0x2a4   : > { %v788_v56 = vsub.f32 %v779_v43, %v786_v55 }
 0x2a5   : > { %v783_v57 = vpop.xlane.xlu1 %782  ;;  %597 = vrot.lane.b32.xlu0 %v2398_v9, %s2280_s12 }
 0x2a6   : > { %v791_v58 = vmul.f32 1.442695, %v788_v56  ;;  %v787_v59 = vsub.f32 %v778_v45, %v783_v57 }
 0x2a8   : > { %2234 = vpow2.f32 %v791_v58  ;;  %v789_v60 = vmul.f32 1.442695, %v787_v59 }
 0x2aa   : > { %2236 = vpow2.f32 %v789_v60 }
 0x2b5   : > { %v2235_v61 = vpop.eup %2234 }
 0x2b6   : > { %v796_v62 = vsel %vm780_vm2, %v2235_v61, 0.0 }
 0x2b7   : > { %v2237_v63 = vpop.eup %2236  ;;  %797 = vadd.xlane.f32.xlu1 %v796_v62 }
 0x2b8   : > { %v793_v4 = vsel %vm780_vm2, %v2237_v63, 0.0 }
 0x2bb   : > { %794 = vadd.xlane.f32.xlu1 %v793_v4 }
 0x316   : > { %v984_v5 = vpop.xlane.xlu1 %983 }
 0x317   : > { %v986_v10 = vsub.f32 %v978_v51, %v984_v5 }
 0x318   : > { %v981_v11 = vpop.xlane.xlu0 %980 }
 0x319   : > { %v989_v12 = vmul.f32 1.442695, %v986_v10  ;;  %v985_v13 = vsub.f32 %v977_v53, %v981_v11 }
 0x31b   : > { %2238 = vpow2.f32 %v989_v12  ;;  %v987_v15 = vmul.f32 1.442695, %v985_v13 }
 0x31c   : > { %v598_v16 = vpop.permute.xlu0 %597 }
 0x31d   : > { %2240 = vpow2.f32 %v987_v15  ;;  %v2475_v17 = vadd.f32 %v672_v14, %v598_v16  ;;  %v2477_v18 = vadd.f32 %v2143_v6, %v598_v16 }
 0x31f   : > { %1003 = vrot.lane.b32.xlu0 %v2475_v17, %s2279_s11  ;;  %2151 = vmatprep.subr.mxu0 %v2477_v18 }
 0x320   : > { %2152 = vmatpush3.msra.mxu0 %v2477_v18 }
 0x321   : > { %2153 = vmatprep.subr.mxu0 %v2475_v17 }
 0x322   : > { %2154 = vmatpush3.msra.mxu0 %v2475_v17 }
 0x323   : > { %1090 = vrot.lane.b32.xlu0 %v2345_v1, %s2281_s28 }
 0x327   : > { %1264 = vrot.lane.b32.xlu0 %v2417_v26, %s2282_s17 }
 0x328   : > { %v2239_v19 = vpop.eup %2238 }
 0x329   : > { %v994_v20 = vsel %vm780_vm2, %v2239_v19, 0.0 }
 0x32a   : > { %v2241_v21 = vpop.eup %2240  ;;  %995 = vadd.xlane.f32.xlu1 %v994_v20 }
 0x32b   : > { %1262 = vrot.lane.b32.xlu0 %v2419_v28, %s2282_s17  ;;  %v991_v22 = vsel %vm780_vm2, %v2241_v21, 0.0 }
 0x32e   : > { %992 = vadd.xlane.f32.xlu1 %v991_v22 }
 0x32f   : > { %1260 = vrot.lane.b32.xlu0 %v2428_v29, %s2282_s17 }
 0x333   : > { %1552 = vrot.lane.b32.xlu0 %v2419_v28, %s2283_s18 }
 0x337   : > { %1550 = vrot.lane.b32.xlu0 %v2428_v29, %s2283_s18 }
 0x33f   : > { %1005 = vrot.lane.b32.xlu1 %v2477_v18, %s2279_s11 }
 0x340   : > { %v798_v1 = vpop.xlane.xlu1 %797 }
 0x341   : > { %2242 = vrcp.f32 %v798_v1 }
 0x343   : > { %1258 = vrot.lane.b32.xlu1 %v2413_v23, %s2282_s17 }
 0x344   : > { %v795_v24 = vpop.xlane.xlu1 %794 }
 0x345   : > { %2244 = vrcp.f32 %v795_v24 }
 0x347   : > { %1554 = vrot.lane.b32.xlu1 %v2417_v26, %s2283_s18 }
 0x34b   : > { %1548 = vrot.lane.b32.xlu1 %v2413_v23, %s2283_s18 }
 0x34e   : > { %v2243_v25 = vpop.eup %2242 }
 0x34f   : > { %v802_v29 = vmul.f32 %v2243_v25, %v2235_v61 }
 0x352   : > { %v2245_v27 = vpop.eup %2244 }
 0x353   : > { %v801_v28 = vmul.f32 %v2245_v27, %v2237_v63 }
 0x355   : > { %2155 = vmatprep.mubr.msk.f32.mxu0 %vm780_vm2, %v801_v28 }
 0x356   : > { %2156 = vmatmul.mubr.msk.f32.vlgmr.msra.gmra.mxu0 %vm780_vm2, %v802_v29 }
 0x391   : > { %v1004_v32 = vpop.permute.xlu0 %1003 }
 0x395   : > { %v1091_v26 = vpop.permute.xlu0 %1090 }
 0x399   : > { %v1265_v37 = vpop.permute.xlu0 %1264 }
 0x39d   : > { %v1263_v43 = vpop.permute.xlu0 %1262 }
 0x3a1   : > { %v1261_v46 = vpop.permute.xlu0 %1260 }
 0x3a5   : > { %v1553_v48 = vpop.permute.xlu0 %1552 }
 0x3a9   : > { %v1551_v49 = vpop.permute.xlu0 %1550 }
 0x3b3   : > { %v996_v30 = vpop.xlane.xlu1 %995 }
 0x3b4   : > { %2246 = vrcp.f32 %v996_v30 }
 0x3b7   : > { %v993_v31 = vpop.xlane.xlu1 %992 }
 0x3b8   : > { %2248 = vrcp.f32 %v993_v31 }
 0x3bb   : > { %v1006_v33 = vpop.permute.xlu1 %1005 }
 0x3bc   : > { %2165 = vmatprep.subr.mxu0 %v1006_v33 }
 0x3bd   : > { %2166 = vmatpush3.msra.mxu0 %v1006_v33 }
 0x3be   : > { %2167 = vmatprep.subr.mxu0 %v1004_v32 }
 0x3bf   : > { %2168 = vmatpush3.msra.mxu0 %v1004_v32  ;;  %v1259_v41 = vpop.permute.xlu1 %1258 }
 0x3c0   : > { %2172 = vmatprep.subr.mxu0 %v1091_v26 }
 0x3c1   : > { %v2247_v23 = vpop.eup %2246 }
 0x3c2   : > { %v1000_v36 = vmul.f32 %v2247_v23, %v2239_v19 }
 0x3c3   : > { %v1555_v45 = vpop.permute.xlu1 %1554 }
 0x3c5   : > { %v2249_v34 = vpop.eup %2248 }
 0x3c6   : > { %v999_v35 = vmul.f32 %v2249_v34, %v2241_v21 }
 0x3c7   : > { %v1549_v47 = vpop.permute.xlu1 %1548 }
 0x3c8   : > { %2169 = vmatprep.mubr.msk.f32.mxu0 %vm780_vm2, %v999_v35 }
 0x3c9   : > { %2170 = vmatmul.mubr.msk.f32.vlgmr.msra.gmra.mxu0 %vm780_vm2, %v1000_v36 }
 0x3ca   : > { %2173 = vmatpush3.msra.mxu0 %v1091_v26 }
 0x3cb   : > { %2182 = vmatprep.subr.msk.mxu0 %vm682_vm1, %v1265_v37 }
 0x416   : > { %v2512_v39 = vpop.f32.mrf.mxu0 }
 0x418   : > { %v875_v40 = vpop.f32.mrf.mxu0 }
 0x419   : > { %2179 = vmatprep.mubr.msk.f32.mxu1 %vm682_vm1, %v875_v40 }
 0x489   : > { %v2171_v42 = vpop.f32.mrf.mxu0 }
 0x48b   : > { %v1081_v44 = vpop.f32.mrf.mxu0 }
 0x48c   : > { %2174 = vmatprep.mubr.msk.f32.mxu0 %vm682_vm1, %v1081_v44 }
 0x48d   : > { %2175 = vmatmul.mubr.msk.f32.vlgmr.msra.gmra.mxu0 %vm682_vm1, %v2171_v42 }
 0x48e   : > { %2183 = vmatpush3.xpose.msk.msra.mxu0 %vm682_vm1, %v1265_v37  ;;  %2186 = vmatprep.mubr.msk.f32.mxu0 %vm682_vm1, %v1259_v41 }
 0x48f   : > { %2184 = vmatprep.subr.msk.mxu0 %vm682_vm1, %v1263_v43 }
 0x492   : > { %2185 = vmatpush3.xpose.msk.msra.mxu0 %vm682_vm1, %v1263_v43 }
 0x493   : > { %2201 = vmatprep.subr.msk.mxu0 %vm682_vm1, %v1555_v45 }
 0x495   : > { %2187 = vmatmul.mubr.msk.f32.vlgmr.msra.gmra.mxu0 %vm682_vm1, %v1261_v46 }
 0x496   : > { %2202 = vmatpush3.xpose.msk.msra.mxu0 %vm682_vm1, %v1555_v45  ;;  %2205 = vmatprep.mubr.msk.f32.mxu0 %vm682_vm1, %v1549_v47 }
 0x497   : > { %2203 = vmatprep.subr.msk.mxu0 %vm682_vm1, %v1553_v48 }
 0x49a   : > { %2204 = vmatpush3.xpose.msk.msra.mxu0 %vm682_vm1, %v1553_v48 }
 0x49d   : > { %2206 = vmatmul.mubr.msk.f32.vlgmr.msra.gmra.mxu0 %vm682_vm1, %v1551_v49 }
 0x54d   : > { %v2528_v50 = vpop.f32.mrf.mxu0 }
 0x54f   : > { %v2530_v51 = vpop.f32.mrf.mxu0 }
 0x555   : > { %v2188_v52 = vpop.f32.mrf.mxu0 }
 0x556   : > { %v1350_v53 = vmul.f32 0.35355338, %v2188_v52 }
 0x557   : > { %v1340_v54 = vpop.f32.mrf.mxu0 }
 0x558   : > { %v1349_v55 = vmul.f32 0.35355338, %v1340_v54  ;;  %v1352_v56 = vadd.f32 %v2461_v38, %v1350_v53 }
 0x55a   : > { %v1356_v57 = vsel %vm780_vm2, %v1352_v56, -inf  ;;  %v1351_v58 = vadd.f32 %v2461_v38, %v1349_v55 }
 0x55b   : > { %1357 = vmax.xlane.f32.xlu0 %v1356_v57 }
 0x55c   : > { %v1353_v59 = vsel %vm780_vm2, %v1351_v58, -inf }
 0x55d   : > { %1354 = vmax.xlane.f32.xlu1 %v1353_v59  ;;  %v2207_v13 = vpop.f32.mrf.mxu0 }
 0x55e   : > { %v1640_v16 = vmul.f32 0.35355338, %v2207_v13 }
 0x55f   : > { %v1630_v14 = vpop.f32.mrf.mxu0 }
 0x560   : > { %v1639_v15 = vmul.f32 0.35355338, %v1630_v14  ;;  %v1642_v20 = vadd.f32 %v2461_v38, %v1640_v16 }
 0x562   : > { %v1641_v19 = vadd.f32 %v2461_v38, %v1639_v15  ;;  %v1646_v22 = vsel %vm780_vm2, %v1642_v20, -inf }
 0x564   : > { %v1643_v21 = vsel %vm780_vm2, %v1641_v19, -inf }
 0x5e4   : > { %v1358_v60 = vpop.xlane.xlu0 %1357 }
 0x5e5   : > { %v1360_v61 = vsub.f32 %v1352_v56, %v1358_v60 }
 0x5e6   : > { %v1355_v62 = vpop.xlane.xlu1 %1354 }
 0x5e7   : > { %v1363_v63 = vmul.f32 1.442695, %v1360_v61  ;;  %v1359_v4 = vsub.f32 %v1351_v58, %v1355_v62 }
 0x5e9   : > { %2250 = vpow2.f32 %v1363_v63  ;;  %v1361_v5 = vmul.f32 1.442695, %v1359_v4 }
 0x5eb   : > { %2252 = vpow2.f32 %v1361_v5 }
 0x5f6   : > { %v2251_v6 = vpop.eup %2250 }
 0x5f7   : > { %v1368_v10 = vsel %vm780_vm2, %v2251_v6, 0.0 }
 0x5f8   : > { %v2253_v11 = vpop.eup %2252  ;;  %1369 = vadd.xlane.f32.xlu1 %v1368_v10 }
 0x5f9   : > { %v1365_v12 = vsel %vm780_vm2, %v2253_v11, 0.0 }
 0x5fa   : > { %1366 = vadd.xlane.f32.xlu0 %v1365_v12 }
 0x609   : > { %1377 = vrot.lane.b32.xlu1 %v2477_v18, %s2282_s17 }
 0x60d   : > { %1375 = vrot.lane.b32.xlu1 %v2475_v17, %s2282_s17 }
 0x610   : > { %1174 = vrot.lane.b32.xlu0 %v2359_v3, %s2281_s28 }
 0x62f   : > { %1644 = vmax.xlane.f32.xlu0 %v1643_v21 }
 0x631   : > { %1647 = vmax.xlane.f32.xlu1 %v1646_v22 }
 0x642   : > { %1462 = vrot.lane.b32.xlu1 %v2354_v2, %s2281_s28 }
 0x646   : > { %1665 = vrot.lane.b32.xlu1 %v2475_v17, %s2283_s18 }
 0x64a   : > { %1752 = vrot.lane.b32.xlu1 %v2340_v0, %s2281_s28 }
 0x681   : > { %v1370_v3 = vpop.xlane.xlu1 %1369 }
 0x682   : > { %2254 = vrcp.f32 %v1370_v3 }
 0x683   : > { %v1367_v1 = vpop.xlane.xlu0 %1366 }
 0x684   : > { %2256 = vrcp.f32 %v1367_v1 }
 0x685   : > { %v1378_v38 = vpop.permute.xlu1 %1377 }
 0x687   : > { %v1175_v24 = vpop.permute.xlu0 %1174 }
 0x688   : > { %2177 = vmatprep.subr.mxu1 %v1175_v24 }
 0x689   : > { %2178 = vmatpush3.msra.mxu1 %v1175_v24  ;;  %v1376_v25 = vpop.permute.xlu1 %1375  ;;  %v1873_v24 = vlaneseq }
 0x68a   : > { %2180 = vmatmul.mubr.msk.f32.vlgmr.msra.gmra.mxu1 %vm682_vm1, %v2512_v39  ;;  %2189 = vmatprep.subr.mxu1 %v1378_v38 }
 0x68b   : > { %2190 = vmatpush3.msra.mxu1 %v1378_v38 }
 0x68c   : > { %2191 = vmatprep.subr.mxu1 %v1376_v25 }
 0x68d   : > { %2192 = vmatpush3.msra.mxu1 %v1376_v25 }
 0x68f   : > { %v2255_v2 = vpop.eup %2254 }
 0x690   : > { %v1374_v0 = vmul.f32 %v2255_v2, %v2251_v6  ;;  %v1874_v2 = vshrl.u32 %v1873_v24, 7 }
 0x691   : > { %v2257_v17 = vpop.eup %2256 }
 0x692   : > { %v1373_v27 = vmul.f32 %v2257_v17, %v2253_v11  ;;  %v1875_v17 = vsub.s32 0, %v1874_v2 }
 0x694   : > { %2193 = vmatprep.mubr.msk.f32.mxu1 %vm780_vm2, %v1373_v27  ;;  %v1866_v27 = vld [vmem:[%s2597_s7] sm:$0x3] }
 0x695   : > { %2194 = vmatmul.mubr.msk.f32.vlgmr.msra.gmra.mxu1 %vm780_vm2, %v1374_v0  ;;  %v1881_v0 = vsub.s32 1, %v1874_v2 }
 0x6b8   : > { %v1645_v28 = vpop.xlane.xlu0 %1644 }
 0x6b9   : > { %v1649_v29 = vsub.f32 %v1641_v19, %v1645_v28  ;;  %v1876_v28 = vrot.slane %v1866_v27, %v1875_v17 }
 0x6ba   : > { %v1648_v30 = vpop.xlane.xlu1 %1647 }
 0x6bb   : > { %v1650_v31 = vsub.f32 %v1642_v20, %v1648_v30  ;;  %v1651_v32 = vmul.f32 1.442695, %v1649_v29  ;;  %v1882_v30 = vrot.slane %v1866_v27, %v1881_v0 }
 0x6bd   : > { %v1653_v33 = vmul.f32 1.442695, %v1650_v31 }
 0x6be   : > { %v1463_v26 = vpop.permute.xlu1 %1462 }
 0x6bf   : > { %2258 = vpow2.f32 %v1653_v33  ;;  %2196 = vmatprep.subr.mxu1 %v1463_v26 }
 0x6c0   : > { %2197 = vmatpush3.msra.mxu1 %v1463_v26  ;;  %2260 = vpow2.f32 %v1651_v32 }
 0x6c2   : > { %v1666_v45 = vpop.permute.xlu1 %1665 }
 0x6c6   : > { %v1753_v48 = vpop.permute.xlu1 %1752 }
 0x6cc   : > { %v2259_v23 = vpop.eup %2258 }
 0x6cd   : > { %v1658_v34 = vsel %vm780_vm2, %v2259_v23, 0.0  ;;  %v2261_v35 = vpop.eup %2260 }
 0x6ce   : > { %1659 = vadd.xlane.f32.xlu0 %v1658_v34  ;;  %v1655_v36 = vsel %vm780_vm2, %v2261_v35, 0.0 }
 0x6d2   : > { %1656 = vadd.xlane.f32.xlu0 %v1655_v36 }
 0x6e8   : > { %1667 = vrot.lane.b32.xlu0 %v2477_v18, %s2283_s18 }
 0x6ec   : > { %1840 = vrot.lane.b32.xlu0 %v2398_v9, %s2281_s28 }
 0x74a   : > { %v2181_v37 = vpop.f32.mrf.mxu1 }
 0x74b   : > { %v1255_v49 = vadd.f32 %v2181_v37, %v2528_v50 }
 0x74c   : > { %v1249_v39 = vpop.f32.mrf.mxu1 }
 0x74d   : > { %v1250_v53 = vadd.f32 %v1249_v39, %v2530_v51 }
 0x755   : > { %v2195_v40 = vpop.f32.mrf.mxu1 }
 0x757   : > { %v1453_v41 = vpop.f32.mrf.mxu1  ;;  %v1660_v42 = vpop.xlane.xlu0 %1659 }
 0x758   : > { %2198 = vmatprep.mubr.msk.f32.mxu1 %vm682_vm1, %v1453_v41  ;;  %2262 = vrcp.f32 %v1660_v42 }
 0x759   : > { %2199 = vmatmul.mubr.msk.f32.vlgmr.msra.gmra.mxu1 %vm682_vm1, %v2195_v40 }
 0x75b   : > { %v1657_v43 = vpop.xlane.xlu0 %1656 }
 0x75c   : > { %2264 = vrcp.f32 %v1657_v43 }
 0x75f   : > { %v1668_v44 = vpop.permute.xlu0 %1667 }
 0x760   : > { %2208 = vmatprep.subr.mxu1 %v1668_v44 }
 0x761   : > { %2209 = vmatpush3.msra.mxu1 %v1668_v44 }
 0x762   : > { %2210 = vmatprep.subr.mxu1 %v1666_v45 }
 0x763   : > { %2211 = vmatpush3.msra.mxu1 %v1666_v45  ;;  %v1841_v62 = vpop.permute.xlu0 %1840 }
 0x764   : > { %2215 = vmatprep.subr.mxu1 %v1753_v48 }
 0x765   : > { %v2263_v18 = vpop.eup %2262 }
 0x766   : > { %v1664_v47 = vmul.f32 %v2263_v18, %v2259_v23 }
 0x769   : > { %v2265_v9 = vpop.eup %2264 }
 0x76a   : > { %v1663_v46 = vmul.f32 %v2265_v9, %v2261_v35 }
 0x76c   : > { %2212 = vmatprep.mubr.msk.f32.mxu1 %vm780_vm2, %v1663_v46 }
 0x76d   : > { %2213 = vmatmul.mubr.msk.f32.vlgmr.msra.gmra.mxu1 %vm780_vm2, %v1664_v47 }
 0x76e   : > { %2216 = vmatpush3.msra.mxu1 %v1753_v48 }
 0x819   : > { %v2200_v52 = vpop.f32.mrf.mxu1 }
 0x81a   : > { %v1547_v54 = vadd.f32 %v2200_v52, %v1255_v49 }
 0x81b   : > { %v1537_v55 = vpop.f32.mrf.mxu1 }
 0x81c   : > { %v1546_v56 = vadd.f32 %v1537_v55, %v1250_v53 }
 0x82d   : > { %v2214_v57 = vpop.f32.mrf.mxu1 }
 0x82f   : > { %v1743_v58 = vpop.f32.mrf.mxu1 }
 0x830   : > { %2217 = vmatprep.mubr.msk.f32.mxu1 %vm682_vm1, %v1743_v58 }
 0x831   : > { %2218 = vmatmul.mubr.msk.f32.vlgmr.msra.gmra.mxu1 %vm682_vm1, %v2214_v57 }
 0x8f1   : > { %v2219_v59 = vpop.f32.mrf.mxu1 }
 0x8f2   : > { %v1837_v60 = vadd.f32 %v2219_v59, %v1547_v54 }
 0x8f3   : > { %v1827_v61 = vpop.f32.mrf.mxu1 }
 0x8f4   : > { %v1839_v63 = vadd.f32 %v1837_v60, %v2393_v8  ;;  %v1836_v4 = vadd.f32 %v1827_v61, %v1546_v56 }
 0x8f6   : > { %v1838_v50 = vadd.f32 %v1836_v4, %v2391_v7  ;;  %v1844_v5 = vadd.f32 %v1841_v62, %v1839_v63 }
 0x8f8   : > { %v1843_v51 = vadd.f32 %v1841_v62, %v1838_v50  ;;  %v1848_v6 = vsel %vm403_vm0, %v1844_v5, 0.0 }
 0x8f9   : > { %1849 = vadd.xlane.f32.xlu0 %v1848_v6 }
 0x8fa   : > { %v1845_v10 = vsel %vm403_vm0, %v1843_v51, 0.0 }
 0x8fb   : > { %1846 = vadd.xlane.f32.xlu1 %v1845_v10 }
 0x982   : > { %v1850_v11 = vpop.xlane.xlu0 %1849 }
 0x983   : > { %v1853_v12 = vmul.f32 0.03125, %v1850_v11 }
 0x984   : > { %v1847_v13 = vpop.xlane.xlu1 %1846 }
 0x985   : > { %v1855_v14 = vsub.f32 %v1844_v5, %v1853_v12  ;;  %v1852_v15 = vmul.f32 0.03125, %v1847_v13 }
 0x987   : > { %v1854_v16 = vsub.f32 %v1843_v51, %v1852_v15  ;;  %v1857_v19 = vmul.f32 %v1855_v14, %v1855_v14 }
 0x989   : > { %v1861_v8 = vsel %vm403_vm0, %v1857_v19, 0.0  ;;  %v1856_v20 = vmul.f32 %v1854_v16, %v1854_v16 }
 0x98a   : > { %1862 = vadd.xlane.f32.xlu1 %v1861_v8 }
 0x98b   : > { %v1858_v7 = vsel %vm403_vm0, %v1856_v20, 0.0 }
 0x98c   : > { %1859 = vadd.xlane.f32.xlu0 %v1858_v7 }
 0xa13   : > { %v1863_v21 = vpop.xlane.xlu1 %1862 }
 0xa14   : > { %v1865_v22 = vmul.f32 0.03125, %v1863_v21 }
 0xa15   : > { %v1860_v3 = vpop.xlane.xlu0 %1859 }
 0xa16   : > { %v1868_v1 = vadd.f32 1e-05, %v1865_v22  ;;  %v1864_v38 = vmul.f32 0.03125, %v1860_v3 }
 0xa18   : > { %2266 = vrsqrt.f32 %v1868_v1  ;;  %v1867_v25 = vadd.f32 1e-05, %v1864_v38 }
 0xa1a   : > { %2268 = vrsqrt.f32 %v1867_v25 }
 0xa25   : > { %v2267_v29 = vpop.eup %2266 }
 0xa26   : > { %v1872_v31 = vmul.f32 %v2267_v29, %v1855_v14 }
 0xa27   : > { %v2269_v32 = vpop.eup %2268 }
 0xa28   : > { %v1878_v33 = vmul.f32 %v1876_v28, %v1872_v31  ;;  %v1871_v26 = vmul.f32 %v2269_v32, %v1854_v16 }
 0xa2a   : > { %v1884_v23 = vadd.f32 %v1882_v30, %v1878_v33  ;;  %v1877_v34 = vmul.f32 %v1876_v28, %v1871_v26 }
 0xa2c   : > { %1886 = vst.msk [vmem:[%s379_s23 + $0x8] sm:$0xff] %vm403_vm0, %v1884_v23  ;;  %v1883_v35 = vadd.f32 %v1882_v30, %v1877_v34 }
 0xa2e   : > { %1885 = vst.msk [vmem:[%s379_s23] sm:$0xff] %vm403_vm0, %v1883_v35 }
 0xa2f PF: > { %s18_s27 = sadd.s32 1, %s2276_s27  }
 0xa30   : > { %p15_p4 = scmp.ge.s32.totalorder %s18_s27, 4  }
 0xa32   :  { %17 = sbr.rel (!%p15_p4) target bundleno = 1 (0x1), region = 94 }

// kernel: generator_inptrans_forward.8
= control target key start
LH: loop header
LB: loop body
LE: loop exit
PB: predicated region body
PF: predicated region fallthrough
CT: control target
= control target key end

     0   :  { %s2258_s24 = smov 0   ;;  %s2502_s0 = inlined_call_operand.vmem [shape: f32[2,16,32], index: 0, kind: input, shape index: {}, may-alias: {0,2}]   ;;  %s2503_s1 = inlined_call_operand.vmem [shape: f32[2,16,32], index: 1, kind: input, shape index: {}, may-alias: {1,3}]   ;;  %s2504_s2 = inlined_call_operand.vmem [shape: f32[2,16,32], index: 2, kind: input, shape index: {}, may-alias: {0,2}]   ;;  %s2505_s3 = inlined_call_operand.vmem [shape: f32[2,16,32], index: 3, kind: input, shape index: {}, may-alias: {1,3}]   ;;  %s2506_s4 = inlined_call_operand.vmem [shape: f32[32,128], index: 4, kind: input, shape index: {}]   ;;  %s2507_s5 = inlined_call_operand.vmem [shape: f32[1,128], index: 5, kind: input, shape index: {}]   ;;  %s2508_s6 = inlined_call_operand.vmem [shape: f32[2,32], index: 6, kind: input, shape index: {}]   ;;  %s2509_s7 = inlined_call_operand.vmem [shape: f32[2,16,32], index: 7, kind: output, shape index: {}]  }
   0x1 LB: > { %s1922_s25 = sadd.s32 4294967295, %s2210_s24   ;;  %p1926_p0 = scmp.ge.s32.totalorder %s2210_s24, 1  ;;  %s2210_s24 = sphi %s2258_s24, %s17_s24  }
   0x2   : > { %p267_p1 = scmp.lt.s32.totalorder %s2210_s24, 3 }
   0x4   : > { %p268_p2 = pnand %p1926_p0, %p267_p1 }
   0x5   : > { %p314_p3 = scmp.lt.s32.totalorder (!%p268_p2), %s1922_s25, 1  ;;  %s2212_s30 = smov (!%p268_p2), 96  }
   0x6   : > { %271 = sbr.rel (%p268_p2) target bundleno = 2603 (0xa2b), region = 48  ;;  %s2213_s28 = smov (!%p268_p2), 120  }
   0x7   : > { %s2214_s29 = smov (!%p268_p2), 64   ;;  %s2216_s8 = smov (!%p268_p2), 112  }
   0x8   : > { %s2217_s9 = smov (!%p268_p2), 104  }
   0xb   : > { %v2269_v0 = vld [vmem:[%s2506_s4 + $0x18] sm:$0xff]  ;;  %v2274_v1 = vld [vmem:[%s2506_s4 + $0x8] sm:$0xff]  ;;  %v2283_v2 = vld [vmem:[%s2506_s4 + $0x10] sm:$0xff]  ;;  %s2511_s25 = smov (!%p314_p3, %s1922_s25), 1  ;;  %vm362_vm0 = vcmask 261120   ;;  %vm640_vm1 = vcmask 64512  }
   0xc   : > { %454 = vrot.lane.b32.xlu0 %v2269_v0, %s2212_s30  ;;  %450 = vrot.lane.b32.xlu1 %v2274_v1, %s2212_s30  ;;  %v2288_v3 = vld [vmem:[%s2506_s4] sm:$0xff]  ;;  %s2293_s12 = sshll.u32 %s2511_s25, 4  ;;  %vm730_vm2 = vcmask 130048  }
   0xd   : > { %2045 = vmatprep.subr.mxu0 %v2269_v0  ;;  %s328_s15 = scalar_lea.vmem %s2504_s2, %s2293_s12  ;;  %s333_s18 = scalar_lea.vmem %s2505_s3, %s2293_s12  ;;  %v2324_v9 = vld [vmem:[%s2507_s5] ss:$0 sm:$0xff] }
   0xe   : > { %2046 = vmatpush3.msra.mxu0 %v2269_v0  ;;  %v345_v4 = vld [vmem:[%s328_s15] sm:$0xff]  ;;  %s318_s21 = scalar_lea.vmem %s2502_s0, %s2293_s12  ;;  %s323_s25 = scalar_lea.vmem %s2503_s1, %s2293_s12  ;;  %v346_v17 = vld [vmem:[%s328_s15 + $0x8] sm:$0xff] }
   0xf   : > { %2047 = vmatprep.subr.mxu0 %v2283_v2  ;;  %v347_v5 = vld [vmem:[%s333_s18] sm:$0xff]  ;;  %v2319_v8 = vld [vmem:[%s318_s21 + $0x8] sm:$0xff]  ;;  %s338_s15 = scalar_lea.vmem %s2509_s7, %s2293_s12 }
  0x10   : > { %452 = vrot.lane.b32.xlu0 %v2283_v2, %s2212_s30  ;;  %448 = vrot.lane.b32.xlu1 %v2288_v3, %s2212_s30  ;;  %v349_v6 = vadd.f32 %v347_v5, %v345_v4  ;;  %v2317_v7 = vld [vmem:[%s318_s21] sm:$0xff]  ;;  %v342_v11 = vld [vmem:[%s323_s25 + $0x8] sm:$0xff] }
  0x11   : > { %2048 = vmatpush3.msra.mxu0 %v2283_v2  ;;  %v341_v10 = vld [vmem:[%s323_s25] sm:$0xff]  ;;  %v344_v13 = vadd.f32 %v342_v11, %v2319_v8  ;;  %v348_v18 = vld [vmem:[%s333_s18 + $0x8] sm:$0xff] }
  0x12   : > { %2049 = vmatprep.subr.mxu0 %v2274_v1  ;;  %2064 = vmatprep.mubr.msk.f32.mxu1 %vm362_vm0, %v349_v6  ;;  %v343_v12 = vadd.f32 %v341_v10, %v2317_v7  ;;  %v350_v20 = vadd.f32 %v348_v18, %v346_v17 }
  0x13   : > { %2050 = vmatpush3.msra.mxu0 %v2274_v1 }
  0x14   : > { %2051 = vmatprep.subr.mxu0 %v2288_v3  ;;  %460 = vrot.lane.b32.xlu0 %v2324_v9, %s2212_s30  ;;  %s2215_s30 = smov 32  }
  0x15   : > { %2052 = vmatpush3.msra.mxu0 %v2288_v3  ;;  %2053 = vmatprep.mubr.msk.f32.mxu0 %vm362_vm0, %v343_v12 }
  0x16   : > { %2054 = vmatmul.mubr.msk.f32.vlgmr.msra.gmra.mxu0 %vm362_vm0, %v344_v13 }
  0x17   : > { %2075 = vmatprep.mubr.msk.f32.mxu0 %vm362_vm0, %v345_v4 }
  0x7e   : > { %v455_v14 = vpop.permute.xlu0 %454  ;;  %v451_v15 = vpop.permute.xlu1 %450 }
  0x7f   : > { %2056 = vmatprep.subr.mxu1 %v455_v14 }
  0x80   : > { %2057 = vmatpush3.msra.mxu1 %v455_v14 }
  0x82   : > { %v453_v16 = vpop.permute.xlu0 %452  ;;  %v449_v19 = vpop.permute.xlu1 %448 }
  0x83   : > { %2058 = vmatprep.subr.mxu1 %v453_v16 }
  0x84   : > { %2059 = vmatpush3.msra.mxu1 %v453_v16 }
  0x85   : > { %2060 = vmatprep.subr.mxu1 %v451_v15 }
  0x86   : > { %2061 = vmatpush3.msra.mxu1 %v451_v15  ;;  %v461_v24 = vpop.permute.xlu0 %460 }
  0x87   : > { %2062 = vmatprep.subr.mxu1 %v449_v19 }
  0x88   : > { %2063 = vmatpush3.msra.mxu1 %v449_v19 }
  0x89   : > { %2065 = vmatmul.mubr.msk.f32.vlgmr.msra.gmra.mxu1 %vm362_vm0, %v350_v20 }
  0xd6   : > { %v2055_v21 = vpop.f32.mrf.mxu0 }
  0xd7   : > { %v2354_v29 = vadd.f32 %v2055_v21, %v2324_v9 }
  0xd8   : > { %v435_v22 = vpop.f32.mrf.mxu0 }
  0xd9   : > { %v2339_v23 = vadd.f32 %v2324_v9, %v435_v22 }
  0xdb   : > { %2082 = vmatprep.mubr.msk.f32.mxu1 %vm640_vm1, %v2339_v23 }
 0x149   : > { %v2066_v25 = vpop.f32.mrf.mxu1 }
 0x14a   : > { %v2343_v26 = vadd.f32 %v2066_v25, %v461_v24 }
 0x14b   : > { %v535_v27 = vpop.f32.mrf.mxu1 }
 0x14c   : > { %v2345_v28 = vadd.f32 %v535_v27, %v461_v24  ;;  %840 = vrot.lane.b32.xlu1 %v2343_v26, %s2213_s28  ;;  %2078 = vmatprep.subr.msk.mxu1 %vm640_vm1, %v2343_v26 }
 0x14d   : > { %2079 = vmatpush3.xpose.msk.msra.mxu1 %vm640_vm1, %v2343_v26 }
 0x14e   : > { %838 = vrot.lane.b32.xlu0 %v2345_v28, %s2213_s28  ;;  %2080 = vmatprep.subr.msk.mxu1 %vm640_vm1, %v2345_v28 }
 0x150   : > { %834 = vrot.lane.b32.xlu1 %v2339_v23, %s2213_s28 }
 0x151   : > { %2081 = vmatpush3.xpose.msk.msra.mxu1 %vm640_vm1, %v2345_v28 }
 0x152   : > { %836 = vrot.lane.b32.xlu0 %v2354_v29, %s2213_s28 }
 0x154   : > { %2083 = vmatmul.mubr.msk.f32.vlgmr.msra.gmra.mxu1 %vm640_vm1, %v2354_v29  ;;  %550 = vrot.lane.b32.xlu1 %v2269_v0, %s2214_s29 }
 0x156   : > { %548 = vrot.lane.b32.xlu0 %v2283_v2, %s2214_s29 }
 0x158   : > { %546 = vrot.lane.b32.xlu1 %v2274_v1, %s2214_s29 }
 0x15a   : > { %544 = vrot.lane.b32.xlu0 %v2288_v3, %s2214_s29 }
 0x1be   : > { %v841_v30 = vpop.permute.xlu1 %840 }
 0x1bf   : > { %2092 = vmatprep.subr.msk.mxu1 %vm640_vm1, %v841_v30 }
 0x1c0   : > { %v839_v31 = vpop.permute.xlu0 %838  ;;  %2093 = vmatpush3.xpose.msk.msra.mxu1 %vm640_vm1, %v841_v30 }
 0x1c1   : > { %2094 = vmatprep.subr.msk.mxu1 %vm640_vm1, %v839_v31 }
 0x1c2   : > { %v835_v32 = vpop.permute.xlu1 %834 }
 0x1c3   : > { %2096 = vmatprep.mubr.msk.f32.mxu1 %vm640_vm1, %v835_v32 }
 0x1c4   : > { %v837_v33 = vpop.permute.xlu0 %836  ;;  %2095 = vmatpush3.xpose.msk.msra.mxu1 %vm640_vm1, %v839_v31 }
 0x1c6   : > { %v551_v34 = vpop.permute.xlu1 %550 }
 0x1c7   : > { %2097 = vmatmul.mubr.msk.f32.vlgmr.msra.gmra.mxu1 %vm640_vm1, %v837_v33  ;;  %2067 = vmatprep.subr.mxu0 %v551_v34 }
 0x1c8   : > { %v549_v35 = vpop.permute.xlu0 %548  ;;  %2068 = vmatpush3.msra.mxu0 %v551_v34 }
 0x1c9   : > { %2069 = vmatprep.subr.mxu0 %v549_v35 }
 0x1ca   : > { %2070 = vmatpush3.msra.mxu0 %v549_v35  ;;  %v547_v36 = vpop.permute.xlu1 %546 }
 0x1cb   : > { %2071 = vmatprep.subr.mxu0 %v547_v36 }
 0x1cc   : > { %v545_v37 = vpop.permute.xlu0 %544  ;;  %2072 = vmatpush3.msra.mxu0 %v547_v36 }
 0x1cd   : > { %2073 = vmatprep.subr.mxu0 %v545_v37 }
 0x1ce   : > { %2074 = vmatpush3.msra.mxu0 %v545_v37 }
 0x1cf   : > { %2076 = vmatmul.mubr.msk.f32.vlgmr.msra.gmra.mxu0 %vm362_vm0, %v346_v17 }
 0x214   : > { %v2084_v38 = vpop.f32.mrf.mxu1 }
 0x215   : > { %v729_v39 = vmul.f32 0.35355338, %v2084_v38 }
 0x216   : > { %v719_v40 = vpop.f32.mrf.mxu1 }
 0x217   : > { %v728_v41 = vmul.f32 0.35355338, %v719_v40  ;;  %v734_v42 = vsel %vm730_vm2, %v729_v39, -inf }
 0x218   : > { %735 = vmax.xlane.f32.xlu0 %v734_v42 }
 0x219   : > { %v731_v43 = vsel %vm730_vm2, %v728_v41, -inf }
 0x21a   : > { %732 = vmax.xlane.f32.xlu1 %v731_v43 }
 0x287   : > { %v2098_v44 = vpop.f32.mrf.mxu1 }
 0x288   : > { %v926_v45 = vmul.f32 0.35355338, %v2098_v44 }
 0x289   : > { %v916_v46 = vpop.f32.mrf.mxu1 }
 0x28a   : > { %v925_v47 = vmul.f32 0.35355338, %v916_v46  ;;  %v930_v48 = vsel %vm730_vm2, %v926_v45, -inf }
 0x28b   : > { %931 = vmax.xlane.f32.xlu1 %v930_v48 }
 0x28c   : > { %v927_v49 = vsel %vm730_vm2, %v925_v47, -inf }
 0x28d   : > { %928 = vmax.xlane.f32.xlu0 %v927_v49 }
 0x28f   : > { %v2077_v61 = vpop.f32.mrf.mxu0 }
 0x291   : > { %v631_v6 = vpop.f32.mrf.mxu0 }
 0x2a1   : > { %v736_v50 = vpop.xlane.xlu0 %735 }
 0x2a2   : > { %v738_v51 = vsub.f32 %v729_v39, %v736_v50 }
 0x2a3   : > { %v733_v52 = vpop.xlane.xlu1 %732  ;;  %556 = vrot.lane.b32.xlu0 %v2324_v9, %s2214_s29 }
 0x2a4   : > { %v741_v53 = vmul.f32 1.442695, %v738_v51  ;;  %v737_v54 = vsub.f32 %v728_v41, %v733_v52 }
 0x2a6   : > { %2168 = vpow2.f32 %v741_v53  ;;  %v739_v55 = vmul.f32 1.442695, %v737_v54 }
 0x2a8   : > { %2170 = vpow2.f32 %v739_v55 }
 0x2b3   : > { %v2169_v56 = vpop.eup %2168 }
 0x2b4   : > { %v746_v57 = vsel %vm730_vm2, %v2169_v56, 0.0 }
 0x2b5   : > { %v2171_v58 = vpop.eup %2170  ;;  %747 = vadd.xlane.f32.xlu1 %v746_v57 }
 0x2b6   : > { %v743_v59 = vsel %vm730_vm2, %v2171_v58, 0.0 }
 0x2b9   : > { %744 = vadd.xlane.f32.xlu1 %v743_v59 }
 0x314   : > { %v932_v60 = vpop.xlane.xlu1 %931 }
 0x315   : > { %v934_v62 = vsub.f32 %v926_v45, %v932_v60 }
 0x316   : > { %v929_v63 = vpop.xlane.xlu0 %928 }
 0x317   : > { %v937_v4 = vmul.f32 1.442695, %v934_v62  ;;  %v933_v5 = vsub.f32 %v925_v47, %v929_v63 }
 0x319   : > { %2172 = vpow2.f32 %v937_v4  ;;  %v935_v10 = vmul.f32 1.442695, %v933_v5 }
 0x31a   : > { %v557_v11 = vpop.permute.xlu0 %556 }
 0x31b   : > { %2174 = vpow2.f32 %v935_v10  ;;  %v2391_v12 = vadd.f32 %v631_v6, %v557_v11  ;;  %v2393_v13 = vadd.f32 %v2077_v61, %v557_v11 }
 0x31d   : > { %951 = vrot.lane.b32.xlu0 %v2391_v12, %s2213_s28  ;;  %2085 = vmatprep.subr.mxu0 %v2393_v13 }
 0x31e   : > { %2086 = vmatpush3.msra.mxu0 %v2393_v13 }
 0x31f   : > { %2087 = vmatprep.subr.mxu0 %v2391_v12 }
 0x320   : > { %2088 = vmatpush3.msra.mxu0 %v2391_v12 }
 0x321   : > { %1038 = vrot.lane.b32.xlu0 %v2274_v1, %s2215_s30 }
 0x325   : > { %1212 = vrot.lane.b32.xlu0 %v2343_v26, %s2216_s8 }
 0x326   : > { %v2173_v14 = vpop.eup %2172 }
 0x327   : > { %v942_v15 = vsel %vm730_vm2, %v2173_v14, 0.0 }
 0x328   : > { %v2175_v16 = vpop.eup %2174  ;;  %943 = vadd.xlane.f32.xlu1 %v942_v15 }
 0x329   : > { %1210 = vrot.lane.b32.xlu0 %v2345_v28, %s2216_s8  ;;  %v939_v17 = vsel %vm730_vm2, %v2175_v16, 0.0 }
 0x32c   : > { %940 = vadd.xlane.f32.xlu1 %v939_v17 }
 0x32d   : > { %1208 = vrot.lane.b32.xlu0 %v2354_v29, %s2216_s8 }
 0x331   : > { %1498 = vrot.lane.b32.xlu0 %v2345_v28, %s2217_s9 }
 0x335   : > { %1496 = vrot.lane.b32.xlu0 %v2354_v29, %s2217_s9 }
 0x33d   : > { %953 = vrot.lane.b32.xlu1 %v2393_v13, %s2213_s28 }
 0x33e   : > { %v748_v1 = vpop.xlane.xlu1 %747 }
 0x33f   : > { %2176 = vrcp.f32 %v748_v1 }
 0x341   : > { %1206 = vrot.lane.b32.xlu1 %v2339_v23, %s2216_s8 }
 0x342   : > { %v745_v18 = vpop.xlane.xlu1 %744 }
 0x343   : > { %2178 = vrcp.f32 %v745_v18 }
 0x345   : > { %1500 = vrot.lane.b32.xlu1 %v2343_v26, %s2217_s9 }
 0x349   : > { %1494 = vrot.lane.b32.xlu1 %v2339_v23, %s2217_s9 }
 0x34c   : > { %v2177_v19 = vpop.eup %2176 }
 0x34d   : > { %v752_v22 = vmul.f32 %v2177_v19, %v2169_v56 }
 0x350   : > { %v2179_v20 = vpop.eup %2178 }
 0x351   : > { %v751_v21 = vmul.f32 %v2179_v20, %v2171_v58 }
 0x353   : > { %2089 = vmatprep.mubr.msk.f32.mxu0 %vm730_vm2, %v751_v21 }
 0x354   : > { %2090 = vmatmul.mubr.msk.f32.vlgmr.msra.gmra.mxu0 %vm730_vm2, %v752_v22 }
 0x38f   : > { %v952_v27 = vpop.permute.xlu0 %951 }
 0x393   : > { %v1039_v26 = vpop.permute.xlu0 %1038 }
 0x397   : > { %v1213_v32 = vpop.permute.xlu0 %1212 }
 0x39b   : > { %v1211_v37 = vpop.permute.xlu0 %1210 }
 0x39f   : > { %v1209_v40 = vpop.permute.xlu0 %1208 }
 0x3a3   : > { %v1499_v42 = vpop.permute.xlu0 %1498 }
 0x3a7   : > { %v1497_v43 = vpop.permute.xlu0 %1496 }
 0x3b1   : > { %v944_v24 = vpop.xlane.xlu1 %943 }
 0x3b2   : > { %2180 = vrcp.f32 %v944_v24 }
 0x3b5   : > { %v941_v25 = vpop.xlane.xlu1 %940 }
 0x3b6   : > { %2182 = vrcp.f32 %v941_v25 }
 0x3b9   : > { %v954_v28 = vpop.permute.xlu1 %953 }
 0x3ba   : > { %2099 = vmatprep.subr.mxu0 %v954_v28 }
 0x3bb   : > { %2100 = vmatpush3.msra.mxu0 %v954_v28 }
 0x3bc   : > { %2101 = vmatprep.subr.mxu0 %v952_v27 }
 0x3bd   : > { %2102 = vmatpush3.msra.mxu0 %v952_v27  ;;  %v1207_v35 = vpop.permute.xlu1 %1206 }
 0x3be   : > { %2106 = vmatprep.subr.mxu0 %v1039_v26 }
 0x3bf   : > { %v2181_v23 = vpop.eup %2180 }
 0x3c0   : > { %v948_v31 = vmul.f32 %v2181_v23, %v2173_v14 }
 0x3c1   : > { %v1501_v39 = vpop.permute.xlu1 %1500 }
 0x3c3   : > { %v2183_v29 = vpop.eup %2182 }
 0x3c4   : > { %v947_v30 = vmul.f32 %v2183_v29, %v2175_v16 }
 0x3c5   : > { %v1495_v41 = vpop.permute.xlu1 %1494 }
 0x3c6   : > { %2103 = vmatprep.mubr.msk.f32.mxu0 %vm730_vm2, %v947_v30 }
 0x3c7   : > { %2104 = vmatmul.mubr.msk.f32.vlgmr.msra.gmra.mxu0 %vm730_vm2, %v948_v31 }
 0x3c8   : > { %2107 = vmatpush3.msra.mxu0 %v1039_v26 }
 0x3c9   : > { %2116 = vmatprep.subr.msk.mxu0 %vm640_vm1, %v1213_v32 }
 0x414   : > { %v2428_v33 = vpop.f32.mrf.mxu0 }
 0x416   : > { %v825_v34 = vpop.f32.mrf.mxu0 }
 0x417   : > { %2113 = vmatprep.mubr.msk.f32.mxu1 %vm640_vm1, %v825_v34 }
 0x487   : > { %v2105_v36 = vpop.f32.mrf.mxu0 }
 0x489   : > { %v1029_v38 = vpop.f32.mrf.mxu0 }
 0x48a   : > { %2108 = vmatprep.mubr.msk.f32.mxu0 %vm640_vm1, %v1029_v38 }
 0x48b   : > { %2109 = vmatmul.mubr.msk.f32.vlgmr.msra.gmra.mxu0 %vm640_vm1, %v2105_v36 }
 0x48c   : > { %2117 = vmatpush3.xpose.msk.msra.mxu0 %vm640_vm1, %v1213_v32  ;;  %2120 = vmatprep.mubr.msk.f32.mxu0 %vm640_vm1, %v1207_v35 }
 0x48d   : > { %2118 = vmatprep.subr.msk.mxu0 %vm640_vm1, %v1211_v37 }
 0x490   : > { %2119 = vmatpush3.xpose.msk.msra.mxu0 %vm640_vm1, %v1211_v37 }
 0x491   : > { %2135 = vmatprep.subr.msk.mxu0 %vm640_vm1, %v1501_v39 }
 0x493   : > { %2121 = vmatmul.mubr.msk.f32.vlgmr.msra.gmra.mxu0 %vm640_vm1, %v1209_v40 }
 0x494   : > { %2136 = vmatpush3.xpose.msk.msra.mxu0 %vm640_vm1, %v1501_v39  ;;  %2139 = vmatprep.mubr.msk.f32.mxu0 %vm640_vm1, %v1495_v41 }
 0x495   : > { %2137 = vmatprep.subr.msk.mxu0 %vm640_vm1, %v1499_v42 }
 0x498   : > { %2138 = vmatpush3.xpose.msk.msra.mxu0 %vm640_vm1, %v1499_v42 }
 0x49b   : > { %2140 = vmatmul.mubr.msk.f32.vlgmr.msra.gmra.mxu0 %vm640_vm1, %v1497_v43 }
 0x54b   : > { %v2444_v44 = vpop.f32.mrf.mxu0 }
 0x54d   : > { %v2446_v45 = vpop.f32.mrf.mxu0 }
 0x553   : > { %v2122_v46 = vpop.f32.mrf.mxu0 }
 0x554   : > { %v1298_v47 = vmul.f32 0.35355338, %v2122_v46 }
 0x555   : > { %v1288_v48 = vpop.f32.mrf.mxu0 }
 0x556   : > { %v1297_v49 = vmul.f32 0.35355338, %v1288_v48  ;;  %v1302_v50 = vsel %vm730_vm2, %v1298_v47, -inf }
 0x557   : > { %1303 = vmax.xlane.f32.xlu0 %v1302_v50 }
 0x558   : > { %v1299_v51 = vsel %vm730_vm2, %v1297_v49, -inf }
 0x559   : > { %1300 = vmax.xlane.f32.xlu1 %v1299_v51 }
 0x55b   : > { %v2141_v62 = vpop.f32.mrf.mxu0 }
 0x55c   : > { %v1586_v5 = vmul.f32 0.35355338, %v2141_v62 }
 0x55d   : > { %v1576_v63 = vpop.f32.mrf.mxu0 }
 0x55e   : > { %v1585_v4 = vmul.f32 0.35355338, %v1576_v63  ;;  %v1590_v10 = vsel %vm730_vm2, %v1586_v5, -inf }
 0x560   : > { %v1587_v6 = vsel %vm730_vm2, %v1585_v4, -inf }
 0x5e0   : > { %v1304_v52 = vpop.xlane.xlu0 %1303 }
 0x5e1   : > { %v1306_v53 = vsub.f32 %v1298_v47, %v1304_v52 }
 0x5e2   : > { %v1301_v54 = vpop.xlane.xlu1 %1300 }
 0x5e3   : > { %v1309_v55 = vmul.f32 1.442695, %v1306_v53  ;;  %v1305_v56 = vsub.f32 %v1297_v49, %v1301_v54 }
 0x5e5   : > { %2184 = vpow2.f32 %v1309_v55  ;;  %v1307_v57 = vmul.f32 1.442695, %v1305_v56 }
 0x5e7   : > { %2186 = vpow2.f32 %v1307_v57 }
 0x5f2   : > { %v2185_v58 = vpop.eup %2184 }
 0x5f3   : > { %v1314_v59 = vsel %vm730_vm2, %v2185_v58, 0.0 }
 0x5f4   : > { %v2187_v60 = vpop.eup %2186  ;;  %1315 = vadd.xlane.f32.xlu1 %v1314_v59 }
 0x5f5   : > { %v1311_v61 = vsel %vm730_vm2, %v2187_v60, 0.0 }
 0x5f6   : > { %1312 = vadd.xlane.f32.xlu0 %v1311_v61 }
 0x605   : > { %1323 = vrot.lane.b32.xlu1 %v2393_v13, %s2216_s8 }
 0x609   : > { %1321 = vrot.lane.b32.xlu1 %v2391_v12, %s2216_s8 }
 0x60c   : > { %1122 = vrot.lane.b32.xlu0 %v2288_v3, %s2215_s30 }
 0x62b   : > { %1588 = vmax.xlane.f32.xlu0 %v1587_v6 }
 0x62d   : > { %1591 = vmax.xlane.f32.xlu1 %v1590_v10 }
 0x63e   : > { %1408 = vrot.lane.b32.xlu1 %v2283_v2, %s2215_s30 }
 0x642   : > { %1609 = vrot.lane.b32.xlu1 %v2391_v12, %s2217_s9 }
 0x646   : > { %1696 = vrot.lane.b32.xlu1 %v2269_v0, %s2215_s30 }
 0x67d   : > { %v1316_v3 = vpop.xlane.xlu1 %1315 }
 0x67e   : > { %2188 = vrcp.f32 %v1316_v3 }
 0x67f   : > { %v1313_v11 = vpop.xlane.xlu0 %1312 }
 0x680   : > { %2190 = vrcp.f32 %v1313_v11 }
 0x681   : > { %v1324_v14 = vpop.permute.xlu1 %1323 }
 0x683   : > { %v1123_v15 = vpop.permute.xlu0 %1122 }
 0x684   : > { %2111 = vmatprep.subr.mxu1 %v1123_v15 }
 0x685   : > { %2112 = vmatpush3.msra.mxu1 %v1123_v15  ;;  %v1322_v16 = vpop.permute.xlu1 %1321  ;;  %v1817_v15 = vlaneseq }
 0x686   : > { %2114 = vmatmul.mubr.msk.f32.vlgmr.msra.gmra.mxu1 %vm640_vm1, %v2428_v33  ;;  %2123 = vmatprep.subr.mxu1 %v1324_v14 }
 0x687   : > { %2124 = vmatpush3.msra.mxu1 %v1324_v14 }
 0x688   : > { %2125 = vmatprep.subr.mxu1 %v1322_v16 }
 0x689   : > { %2126 = vmatpush3.msra.mxu1 %v1322_v16 }
 0x68b   : > { %v2189_v2 = vpop.eup %2188 }
 0x68c   : > { %v1320_v0 = vmul.f32 %v2189_v2, %v2185_v58  ;;  %v1818_v2 = vshrl.u32 %v1817_v15, 7 }
 0x68d   : > { %v2191_v12 = vpop.eup %2190 }
 0x68e   : > { %v1319_v17 = vmul.f32 %v2191_v12, %v2187_v60  ;;  %v1819_v12 = vsub.s32 0, %v1818_v2 }
 0x690   : > { %2127 = vmatprep.mubr.msk.f32.mxu1 %vm730_vm2, %v1319_v17  ;;  %v1810_v17 = vld [vmem:[%s2508_s6] sm:$0x3] }
 0x691   : > { %2128 = vmatmul.mubr.msk.f32.vlgmr.msra.gmra.mxu1 %vm730_vm2, %v1320_v0  ;;  %v1825_v0 = vsub.s32 1, %v1818_v2 }
 0x6b4   : > { %v1589_v1 = vpop.xlane.xlu0 %1588 }
 0x6b5   : > { %v1593_v18 = vsub.f32 %v1585_v4, %v1589_v1  ;;  %v1820_v1 = vrot.slane %v1810_v17, %v1819_v12 }
 0x6b6   : > { %v1592_v19 = vpop.xlane.xlu1 %1591 }
 0x6b7   : > { %v1594_v20 = vsub.f32 %v1586_v5, %v1592_v19  ;;  %v1595_v21 = vmul.f32 1.442695, %v1593_v18  ;;  %v1826_v19 = vrot.slane %v1810_v17, %v1825_v0 }
 0x6b9   : > { %v1597_v22 = vmul.f32 1.442695, %v1594_v20 }
 0x6ba   : > { %v1409_v24 = vpop.permute.xlu1 %1408 }
 0x6bb   : > { %2192 = vpow2.f32 %v1597_v22  ;;  %2130 = vmatprep.subr.mxu1 %v1409_v24 }
 0x6bc   : > { %2131 = vmatpush3.msra.mxu1 %v1409_v24  ;;  %2194 = vpow2.f32 %v1595_v21 }
 0x6be   : > { %v1610_v35 = vpop.permute.xlu1 %1609 }
 0x6c2   : > { %v1697_v38 = vpop.permute.xlu1 %1696 }
 0x6c8   : > { %v2193_v25 = vpop.eup %2192 }
 0x6c9   : > { %v1602_v27 = vsel %vm730_vm2, %v2193_v25, 0.0  ;;  %v2195_v28 = vpop.eup %2194 }
 0x6ca   : > { %1603 = vadd.xlane.f32.xlu0 %v1602_v27  ;;  %v1599_v26 = vsel %vm730_vm2, %v2195_v28, 0.0 }
 0x6ce   : > { %1600 = vadd.xlane.f32.xlu0 %v1599_v26 }
 0x6e4   : > { %1611 = vrot.lane.b32.xlu0 %v2393_v13, %s2217_s9 }
 0x6e8   : > { %1784 = vrot.lane.b32.xlu0 %v2324_v9, %s2215_s30 }
 0x746   : > { %v2115_v23 = vpop.f32.mrf.mxu1 }
 0x747   : > { %v1203_v39 = vadd.f32 %v2115_v23, %v2444_v44 }
 0x748   : > { %v1197_v29 = vpop.f32.mrf.mxu1 }
 0x749   : > { %v1198_v41 = vadd.f32 %v1197_v29, %v2446_v45 }
 0x751   : > { %v2129_v30 = vpop.f32.mrf.mxu1 }
 0x753   : > { %v1399_v31 = vpop.f32.mrf.mxu1  ;;  %v1604_v32 = vpop.xlane.xlu0 %1603 }
 0x754   : > { %2132 = vmatprep.mubr.msk.f32.mxu1 %vm640_vm1, %v1399_v31  ;;  %2196 = vrcp.f32 %v1604_v32 }
 0x755   : > { %2133 = vmatmul.mubr.msk.f32.vlgmr.msra.gmra.mxu1 %vm640_vm1, %v2129_v30 }
 0x757   : > { %v1601_v33 = vpop.xlane.xlu0 %1600 }
 0x758   : > { %2198 = vrcp.f32 %v1601_v33 }
 0x75b   : > { %v1612_v34 = vpop.permute.xlu0 %1611 }
 0x75c   : > { %2142 = vmatprep.subr.mxu1 %v1612_v34 }
 0x75d   : > { %2143 = vmatpush3.msra.mxu1 %v1612_v34 }
 0x75e   : > { %2144 = vmatprep.subr.mxu1 %v1610_v35 }
 0x75f   : > { %2145 = vmatpush3.msra.mxu1 %v1610_v35  ;;  %v1785_v52 = vpop.permute.xlu0 %1784 }
 0x760   : > { %2149 = vmatprep.subr.mxu1 %v1697_v38 }
 0x761   : > { %v2197_v13 = vpop.eup %2196 }
 0x762   : > { %v1608_v37 = vmul.f32 %v2197_v13, %v2193_v25 }
 0x765   : > { %v2199_v9 = vpop.eup %2198 }
 0x766   : > { %v1607_v36 = vmul.f32 %v2199_v9, %v2195_v28 }
 0x768   : > { %2146 = vmatprep.mubr.msk.f32.mxu1 %vm730_vm2, %v1607_v36 }
 0x769   : > { %2147 = vmatmul.mubr.msk.f32.vlgmr.msra.gmra.mxu1 %vm730_vm2, %v1608_v37 }
 0x76a   : > { %2150 = vmatpush3.msra.mxu1 %v1697_v38 }
 0x815   : > { %v2134_v40 = vpop.f32.mrf.mxu1 }
 0x816   : > { %v1493_v42 = vadd.f32 %v2134_v40, %v1203_v39 }
 0x817   : > { %v1483_v43 = vpop.f32.mrf.mxu1 }
 0x818   : > { %v1492_v46 = vadd.f32 %v1483_v43, %v1198_v41 }
 0x829   : > { %v2148_v47 = vpop.f32.mrf.mxu1 }
 0x82b   : > { %v1687_v48 = vpop.f32.mrf.mxu1 }
 0x82c   : > { %2151 = vmatprep.mubr.msk.f32.mxu1 %vm640_vm1, %v1687_v48 }
 0x82d   : > { %2152 = vmatmul.mubr.msk.f32.vlgmr.msra.gmra.mxu1 %vm640_vm1, %v2148_v47 }
 0x8ed   : > { %v2153_v49 = vpop.f32.mrf.mxu1 }
 0x8ee   : > { %v1781_v50 = vadd.f32 %v2153_v49, %v1493_v42 }
 0x8ef   : > { %v1771_v51 = vpop.f32.mrf.mxu1 }
 0x8f0   : > { %v1783_v53 = vadd.f32 %v1781_v50, %v2319_v8  ;;  %v1780_v54 = vadd.f32 %v1771_v51, %v1492_v46 }
 0x8f2   : > { %v1782_v44 = vadd.f32 %v1780_v54, %v2317_v7  ;;  %v1788_v55 = vadd.f32 %v1785_v52, %v1783_v53 }
 0x8f4   : > { %v1787_v45 = vadd.f32 %v1785_v52, %v1782_v44  ;;  %v1792_v56 = vsel %vm362_vm0, %v1788_v55, 0.0 }
 0x8f5   : > { %1793 = vadd.xlane.f32.xlu0 %v1792_v56 }
 0x8f6   : > { %v1789_v57 = vsel %vm362_vm0, %v1787_v45, 0.0 }
 0x8f7   : > { %1790 = vadd.xlane.f32.xlu1 %v1789_v57 }
 0x97e   : > { %v1794_v58 = vpop.xlane.xlu0 %1793 }
 0x97f   : > { %v1797_v59 = vmul.f32 0.03125, %v1794_v58 }
 0x980   : > { %v1791_v60 = vpop.xlane.xlu1 %1790 }
 0x981   : > { %v1799_v61 = vsub.f32 %v1788_v55, %v1797_v59  ;;  %v1796_v62 = vmul.f32 0.03125, %v1791_v60 }
 0x983   : > { %v1798_v63 = vsub.f32 %v1787_v45, %v1796_v62  ;;  %v1801_v4 = vmul.f32 %v1799_v61, %v1799_v61 }
 0x985   : > { %v1805_v8 = vsel %vm362_vm0, %v1801_v4, 0.0  ;;  %v1800_v5 = vmul.f32 %v1798_v63, %v1798_v63 }
 0x986   : > { %1806 = vadd.xlane.f32.xlu1 %v1805_v8 }
 0x987   : > { %v1802_v7 = vsel %vm362_vm0, %v1800_v5, 0.0 }
 0x988   : > { %1803 = vadd.xlane.f32.xlu0 %v1802_v7 }
 0xa0f   : > { %v1807_v6 = vpop.xlane.xlu1 %1806 }
 0xa10   : > { %v1809_v10 = vmul.f32 0.03125, %v1807_v6 }
 0xa11   : > { %v1804_v3 = vpop.xlane.xlu0 %1803 }
 0xa12   : > { %v1812_v11 = vadd.f32 1e-05, %v1809_v10  ;;  %v1808_v14 = vmul.f32 0.03125, %v1804_v3 }
 0xa14   : > { %2200 = vrsqrt.f32 %v1812_v11  ;;  %v1811_v16 = vadd.f32 1e-05, %v1808_v14 }
 0xa16   : > { %2202 = vrsqrt.f32 %v1811_v16 }
 0xa21   : > { %v2201_v18 = vpop.eup %2200 }
 0xa22   : > { %v1816_v20 = vmul.f32 %v2201_v18, %v1799_v61 }
 0xa23   : > { %v2203_v21 = vpop.eup %2202 }
 0xa24   : > { %v1822_v22 = vmul.f32 %v1820_v1, %v1816_v20  ;;  %v1815_v24 = vmul.f32 %v2203_v21, %v1798_v63 }
 0xa26   : > { %v1828_v25 = vadd.f32 %v1826_v19, %v1822_v22  ;;  %v1821_v27 = vmul.f32 %v1820_v1, %v1815_v24 }
 0xa28   : > { %1830 = vst.msk [vmem:[%s338_s15 + $0x8] sm:$0xff] %vm362_vm0, %v1828_v25  ;;  %v1827_v28 = vadd.f32 %v1826_v19, %v1821_v27 }
 0xa2a   : > { %1829 = vst.msk [vmem:[%s338_s15] sm:$0xff] %vm362_vm0, %v1827_v28 }
 0xa2b PF: > { %s17_s24 = sadd.s32 1, %s2210_s24  }
 0xa2c   : > { %p14_p4 = scmp.ge.s32.totalorder %s17_s24, 4  }
 0xa2e   :  { %16 = sbr.rel (!%p14_p4) target bundleno = 1 (0x1), region = 87 }

// kernel: generator_inptrans_forward.11
= control target key start
LH: loop header
LB: loop body
LE: loop exit
PB: predicated region body
PF: predicated region fallthrough
CT: control target
= control target key end

     0   :  { %s2349_s27 = smov 0   ;;  %s2615_s0 = inlined_call_operand.vmem [shape: f32[2,16,32], index: 0, kind: input, shape index: {}]   ;;  %s2616_s1 = inlined_call_operand.vmem [shape: f32[2,16,32], index: 1, kind: input, shape index: {}]   ;;  %s2617_s2 = inlined_call_operand.vmem [shape: f32[2,16,32], index: 2, kind: input, shape index: {}]   ;;  %s2618_s3 = inlined_call_operand.vmem [shape: f32[2,16,32], index: 3, kind: input, shape index: {}]   ;;  %s2619_s4 = inlined_call_operand.vmem [shape: f32[32,128], index: 4, kind: input, shape index: {}]   ;;  %s2620_s5 = inlined_call_operand.vmem [shape: f32[1,128], index: 5, kind: input, shape index: {}]   ;;  %s2621_s6 = inlined_call_operand.vmem [shape: f32[2,32], index: 6, kind: input, shape index: {}]   ;;  %s2622_s7 = inlined_call_operand.vmem [shape: f32[2,16,32], index: 7, kind: output, shape index: {0}]   ;;  %s2623_s8 = inlined_call_operand.vmem [shape: f32[2,16,16], index: 8, kind: output, shape index: {1}]  }
   0x1 LB: > { %s2005_s28 = sadd.s32 4294967295, %s2296_s27   ;;  %p2009_p0 = scmp.ge.s32.totalorder %s2296_s27, 1  ;;  %s2296_s27 = sphi %s2349_s27, %s19_s27  }
   0x2   : > { %p295_p1 = scmp.lt.s32.totalorder %s2296_s27, 3 }
   0x4   : > { %p296_p2 = pnand %p2009_p0, %p295_p1 }
   0x5   : > { %p349_p3 = scmp.lt.s32.totalorder (!%p296_p2), %s2005_s28, 1  ;;  %s2298_s11 = smov (!%p296_p2), 96  }
   0x6   : > { %299 = sbr.rel (%p296_p2) target bundleno = 2603 (0xa2b), region = 48  ;;  %s2299_s10 = smov (!%p296_p2), 120  }
   0x7   : > { %s2301_s12 = smov (!%p296_p2), 32   ;;  %s2302_s13 = smov (!%p296_p2), 112  }
   0x8   : > { %s2303_s14 = smov (!%p296_p2), 104  }
   0xb   : > { %v2360_v0 = vld [vmem:[%s2619_s4 + $0x18] sm:$0xff]  ;;  %v2365_v1 = vld [vmem:[%s2619_s4 + $0x8] sm:$0xff]  ;;  %v2374_v2 = vld [vmem:[%s2619_s4 + $0x10] sm:$0xff]  ;;  %s2625_s28 = smov (!%p349_p3, %s2005_s28), 1  ;;  %vm402_vm0 = vcmask 261120   ;;  %vm680_vm1 = vcmask 64512  }
   0xc   : > { %494 = vrot.lane.b32.xlu0 %v2360_v0, %s2298_s11  ;;  %490 = vrot.lane.b32.xlu1 %v2365_v1, %s2298_s11  ;;  %v2379_v3 = vld [vmem:[%s2619_s4] sm:$0xff]  ;;  %s2384_s16 = sshll.u32 %s2625_s28, 4  ;;  %vm770_vm2 = vcmask 130048  }
   0xd   : > { %2131 = vmatprep.subr.mxu0 %v2360_v0  ;;  %s363_s19 = scalar_lea.vmem %s2617_s2, %s2384_s16  ;;  %s368_s22 = scalar_lea.vmem %s2618_s3, %s2384_s16  ;;  %v2415_v9 = vld [vmem:[%s2620_s5] ss:$0 sm:$0xff] }
   0xe   : > { %2132 = vmatpush3.msra.mxu0 %v2360_v0  ;;  %v385_v4 = vld [vmem:[%s363_s19] sm:$0xff]  ;;  %s353_s25 = scalar_lea.vmem %s2615_s0, %s2384_s16  ;;  %s358_s29 = scalar_lea.vmem %s2616_s1, %s2384_s16  ;;  %v386_v17 = vld [vmem:[%s363_s19 + $0x8] sm:$0xff] }
   0xf   : > { %2133 = vmatprep.subr.mxu0 %v2374_v2  ;;  %v387_v5 = vld [vmem:[%s368_s22] sm:$0xff]  ;;  %v2410_v8 = vld [vmem:[%s353_s25 + $0x8] sm:$0xff]  ;;  %s378_s18 = scalar_lea.vmem %s2623_s8, %s2384_s16  ;;  %s373_s23 = scalar_lea.vmem %s2622_s7, %s2384_s16 }
  0x10   : > { %492 = vrot.lane.b32.xlu0 %v2374_v2, %s2298_s11  ;;  %488 = vrot.lane.b32.xlu1 %v2379_v3, %s2298_s11  ;;  %v389_v6 = vadd.f32 %v387_v5, %v385_v4  ;;  %v2408_v7 = vld [vmem:[%s353_s25] sm:$0xff]  ;;  %v382_v11 = vld [vmem:[%s358_s29 + $0x8] sm:$0xff] }
  0x11   : > { %2134 = vmatpush3.msra.mxu0 %v2374_v2  ;;  %v381_v10 = vld [vmem:[%s358_s29] sm:$0xff]  ;;  %v384_v13 = vadd.f32 %v382_v11, %v2410_v8  ;;  %v388_v18 = vld [vmem:[%s368_s22 + $0x8] sm:$0xff] }
  0x12   : > { %2135 = vmatprep.subr.mxu0 %v2365_v1  ;;  %2150 = vmatprep.mubr.msk.f32.mxu1 %vm402_vm0, %v389_v6  ;;  %v383_v12 = vadd.f32 %v381_v10, %v2408_v7  ;;  %v390_v20 = vadd.f32 %v388_v18, %v386_v17 }
  0x13   : > { %2136 = vmatpush3.msra.mxu0 %v2365_v1 }
  0x14   : > { %2137 = vmatprep.subr.mxu0 %v2379_v3  ;;  %500 = vrot.lane.b32.xlu0 %v2415_v9, %s2298_s11  ;;  %s2300_s11 = smov 64  }
  0x15   : > { %2138 = vmatpush3.msra.mxu0 %v2379_v3  ;;  %2139 = vmatprep.mubr.msk.f32.mxu0 %vm402_vm0, %v383_v12 }
  0x16   : > { %2140 = vmatmul.mubr.msk.f32.vlgmr.msra.gmra.mxu0 %vm402_vm0, %v384_v13 }
  0x17   : > { %2161 = vmatprep.mubr.msk.f32.mxu0 %vm402_vm0, %v385_v4 }
  0x7e   : > { %v495_v14 = vpop.permute.xlu0 %494  ;;  %v491_v15 = vpop.permute.xlu1 %490 }
  0x7f   : > { %2142 = vmatprep.subr.mxu1 %v495_v14 }
  0x80   : > { %2143 = vmatpush3.msra.mxu1 %v495_v14 }
  0x82   : > { %v493_v16 = vpop.permute.xlu0 %492  ;;  %v489_v19 = vpop.permute.xlu1 %488 }
  0x83   : > { %2144 = vmatprep.subr.mxu1 %v493_v16 }
  0x84   : > { %2145 = vmatpush3.msra.mxu1 %v493_v16 }
  0x85   : > { %2146 = vmatprep.subr.mxu1 %v491_v15 }
  0x86   : > { %2147 = vmatpush3.msra.mxu1 %v491_v15  ;;  %v501_v24 = vpop.permute.xlu0 %500 }
  0x87   : > { %2148 = vmatprep.subr.mxu1 %v489_v19 }
  0x88   : > { %2149 = vmatpush3.msra.mxu1 %v489_v19 }
  0x89   : > { %2151 = vmatmul.mubr.msk.f32.vlgmr.msra.gmra.mxu1 %vm402_vm0, %v390_v20 }
  0xd6   : > { %v2141_v21 = vpop.f32.mrf.mxu0 }
  0xd7   : > { %v2445_v29 = vadd.f32 %v2141_v21, %v2415_v9 }
  0xd8   : > { %v475_v22 = vpop.f32.mrf.mxu0 }
  0xd9   : > { %v2430_v23 = vadd.f32 %v2415_v9, %v475_v22 }
  0xdb   : > { %2168 = vmatprep.mubr.msk.f32.mxu1 %vm680_vm1, %v2430_v23 }
 0x149   : > { %v2152_v25 = vpop.f32.mrf.mxu1 }
 0x14a   : > { %v2434_v26 = vadd.f32 %v2152_v25, %v501_v24 }
 0x14b   : > { %v575_v27 = vpop.f32.mrf.mxu1 }
 0x14c   : > { %v2436_v28 = vadd.f32 %v575_v27, %v501_v24  ;;  %880 = vrot.lane.b32.xlu1 %v2434_v26, %s2299_s10  ;;  %2164 = vmatprep.subr.msk.mxu1 %vm680_vm1, %v2434_v26 }
 0x14d   : > { %2165 = vmatpush3.xpose.msk.msra.mxu1 %vm680_vm1, %v2434_v26 }
 0x14e   : > { %878 = vrot.lane.b32.xlu0 %v2436_v28, %s2299_s10  ;;  %2166 = vmatprep.subr.msk.mxu1 %vm680_vm1, %v2436_v28 }
 0x150   : > { %874 = vrot.lane.b32.xlu1 %v2430_v23, %s2299_s10 }
 0x151   : > { %2167 = vmatpush3.xpose.msk.msra.mxu1 %vm680_vm1, %v2436_v28 }
 0x152   : > { %876 = vrot.lane.b32.xlu0 %v2445_v29, %s2299_s10 }
 0x154   : > { %2169 = vmatmul.mubr.msk.f32.vlgmr.msra.gmra.mxu1 %vm680_vm1, %v2445_v29  ;;  %590 = vrot.lane.b32.xlu1 %v2360_v0, %s2300_s11 }
 0x156   : > { %588 = vrot.lane.b32.xlu0 %v2374_v2, %s2300_s11 }
 0x158   : > { %586 = vrot.lane.b32.xlu1 %v2365_v1, %s2300_s11 }
 0x15a   : > { %584 = vrot.lane.b32.xlu0 %v2379_v3, %s2300_s11 }
 0x1be   : > { %v881_v30 = vpop.permute.xlu1 %880 }
 0x1bf   : > { %2178 = vmatprep.subr.msk.mxu1 %vm680_vm1, %v881_v30 }
 0x1c0   : > { %v879_v31 = vpop.permute.xlu0 %878  ;;  %2179 = vmatpush3.xpose.msk.msra.mxu1 %vm680_vm1, %v881_v30 }
 0x1c1   : > { %2180 = vmatprep.subr.msk.mxu1 %vm680_vm1, %v879_v31 }
 0x1c2   : > { %v875_v32 = vpop.permute.xlu1 %874 }
 0x1c3   : > { %2182 = vmatprep.mubr.msk.f32.mxu1 %vm680_vm1, %v875_v32 }
 0x1c4   : > { %v877_v33 = vpop.permute.xlu0 %876  ;;  %2181 = vmatpush3.xpose.msk.msra.mxu1 %vm680_vm1, %v879_v31 }
 0x1c6   : > { %v591_v34 = vpop.permute.xlu1 %590 }
 0x1c7   : > { %2183 = vmatmul.mubr.msk.f32.vlgmr.msra.gmra.mxu1 %vm680_vm1, %v877_v33  ;;  %2153 = vmatprep.subr.mxu0 %v591_v34 }
 0x1c8   : > { %v589_v35 = vpop.permute.xlu0 %588  ;;  %2154 = vmatpush3.msra.mxu0 %v591_v34 }
 0x1c9   : > { %2155 = vmatprep.subr.mxu0 %v589_v35 }
 0x1ca   : > { %2156 = vmatpush3.msra.mxu0 %v589_v35  ;;  %v587_v36 = vpop.permute.xlu1 %586 }
 0x1cb   : > { %2157 = vmatprep.subr.mxu0 %v587_v36 }
 0x1cc   : > { %v585_v37 = vpop.permute.xlu0 %584  ;;  %2158 = vmatpush3.msra.mxu0 %v587_v36 }
 0x1cd   : > { %2159 = vmatprep.subr.mxu0 %v585_v37 }
 0x1ce   : > { %2160 = vmatpush3.msra.mxu0 %v585_v37 }
 0x1cf   : > { %2162 = vmatmul.mubr.msk.f32.vlgmr.msra.gmra.mxu0 %vm402_vm0, %v386_v17 }
 0x214   : > { %v2170_v38 = vpop.f32.mrf.mxu1 }
 0x215   : > { %v769_v39 = vmul.f32 0.35355338, %v2170_v38 }
 0x216   : > { %v759_v40 = vpop.f32.mrf.mxu1 }
 0x217   : > { %v768_v41 = vmul.f32 0.35355338, %v759_v40  ;;  %v774_v42 = vsel %vm770_vm2, %v769_v39, -inf }
 0x218   : > { %775 = vmax.xlane.f32.xlu0 %v774_v42 }
 0x219   : > { %v771_v43 = vsel %vm770_vm2, %v768_v41, -inf }
 0x21a   : > { %772 = vmax.xlane.f32.xlu1 %v771_v43 }
 0x287   : > { %v2184_v44 = vpop.f32.mrf.mxu1 }
 0x288   : > { %v966_v45 = vmul.f32 0.35355338, %v2184_v44 }
 0x289   : > { %v956_v46 = vpop.f32.mrf.mxu1 }
 0x28a   : > { %v965_v47 = vmul.f32 0.35355338, %v956_v46  ;;  %v970_v48 = vsel %vm770_vm2, %v966_v45, -inf }
 0x28b   : > { %971 = vmax.xlane.f32.xlu1 %v970_v48 }
 0x28c   : > { %v967_v49 = vsel %vm770_vm2, %v965_v47, -inf }
 0x28d   : > { %968 = vmax.xlane.f32.xlu0 %v967_v49 }
 0x28f   : > { %v2163_v61 = vpop.f32.mrf.mxu0 }
 0x291   : > { %v671_v6 = vpop.f32.mrf.mxu0 }
 0x2a1   : > { %v776_v50 = vpop.xlane.xlu0 %775 }
 0x2a2   : > { %v778_v51 = vsub.f32 %v769_v39, %v776_v50 }
 0x2a3   : > { %v773_v52 = vpop.xlane.xlu1 %772  ;;  %596 = vrot.lane.b32.xlu0 %v2415_v9, %s2300_s11 }
 0x2a4   : > { %v781_v53 = vmul.f32 1.442695, %v778_v51  ;;  %v777_v54 = vsub.f32 %v768_v41, %v773_v52 }
 0x2a6   : > { %2254 = vpow2.f32 %v781_v53  ;;  %v779_v55 = vmul.f32 1.442695, %v777_v54 }
 0x2a8   : > { %2256 = vpow2.f32 %v779_v55 }
 0x2b3   : > { %v2255_v56 = vpop.eup %2254 }
 0x2b4   : > { %v786_v57 = vsel %vm770_vm2, %v2255_v56, 0.0 }
 0x2b5   : > { %v2257_v58 = vpop.eup %2256  ;;  %787 = vadd.xlane.f32.xlu1 %v786_v57 }
 0x2b6   : > { %v783_v59 = vsel %vm770_vm2, %v2257_v58, 0.0 }
 0x2b9   : > { %784 = vadd.xlane.f32.xlu1 %v783_v59 }
 0x314   : > { %v972_v60 = vpop.xlane.xlu1 %971 }
 0x315   : > { %v974_v62 = vsub.f32 %v966_v45, %v972_v60 }
 0x316   : > { %v969_v63 = vpop.xlane.xlu0 %968 }
 0x317   : > { %v977_v4 = vmul.f32 1.442695, %v974_v62  ;;  %v973_v5 = vsub.f32 %v965_v47, %v969_v63 }
 0x319   : > { %2258 = vpow2.f32 %v977_v4  ;;  %v975_v10 = vmul.f32 1.442695, %v973_v5 }
 0x31a   : > { %v597_v11 = vpop.permute.xlu0 %596 }
 0x31b   : > { %2260 = vpow2.f32 %v975_v10  ;;  %v2482_v12 = vadd.f32 %v671_v6, %v597_v11  ;;  %v2484_v13 = vadd.f32 %v2163_v61, %v597_v11 }
 0x31d   : > { %991 = vrot.lane.b32.xlu0 %v2482_v12, %s2299_s10  ;;  %2171 = vmatprep.subr.mxu0 %v2484_v13 }
 0x31e   : > { %2172 = vmatpush3.msra.mxu0 %v2484_v13 }
 0x31f   : > { %2173 = vmatprep.subr.mxu0 %v2482_v12 }
 0x320   : > { %2174 = vmatpush3.msra.mxu0 %v2482_v12 }
 0x321   : > { %1078 = vrot.lane.b32.xlu0 %v2365_v1, %s2301_s12 }
 0x325   : > { %1254 = vrot.lane.b32.xlu0 %v2434_v26, %s2302_s13 }
 0x326   : > { %v2259_v14 = vpop.eup %2258 }
 0x327   : > { %v982_v15 = vsel %vm770_vm2, %v2259_v14, 0.0 }
 0x328   : > { %v2261_v16 = vpop.eup %2260  ;;  %983 = vadd.xlane.f32.xlu1 %v982_v15 }
 0x329   : > { %1252 = vrot.lane.b32.xlu0 %v2436_v28, %s2302_s13  ;;  %v979_v17 = vsel %vm770_vm2, %v2261_v16, 0.0 }
 0x32c   : > { %980 = vadd.xlane.f32.xlu1 %v979_v17 }
 0x32d   : > { %1250 = vrot.lane.b32.xlu0 %v2445_v29, %s2302_s13 }
 0x331   : > { %1542 = vrot.lane.b32.xlu0 %v2436_v28, %s2303_s14 }
 0x335   : > { %1540 = vrot.lane.b32.xlu0 %v2445_v29, %s2303_s14 }
 0x33d   : > { %993 = vrot.lane.b32.xlu1 %v2484_v13, %s2299_s10 }
 0x33e   : > { %v788_v1 = vpop.xlane.xlu1 %787 }
 0x33f   : > { %2262 = vrcp.f32 %v788_v1 }
 0x341   : > { %1248 = vrot.lane.b32.xlu1 %v2430_v23, %s2302_s13 }
 0x342   : > { %v785_v18 = vpop.xlane.xlu1 %784 }
 0x343   : > { %2264 = vrcp.f32 %v785_v18 }
 0x345   : > { %1544 = vrot.lane.b32.xlu1 %v2434_v26, %s2303_s14 }
 0x349   : > { %1538 = vrot.lane.b32.xlu1 %v2430_v23, %s2303_s14 }
 0x34c   : > { %v2263_v19 = vpop.eup %2262 }
 0x34d   : > { %v2516_v22 = vmul.f32 %v2263_v19, %v2255_v56 }
 0x350   : > { %v2265_v20 = vpop.eup %2264 }
 0x351   : > { %v2514_v21 = vmul.f32 %v2265_v20, %v2257_v58 }
 0x353   : > { %2175 = vmatprep.mubr.msk.f32.mxu0 %vm770_vm2, %v2514_v21 }
 0x354   : > { %2176 = vmatmul.mubr.msk.f32.vlgmr.msra.gmra.mxu0 %vm770_vm2, %v2516_v22 }
 0x38f   : > { %v992_v26 = vpop.permute.xlu0 %991 }
 0x393   : > { %v1079_v23 = vpop.permute.xlu0 %1078 }
 0x397   : > { %v1255_v32 = vpop.permute.xlu0 %1254 }
 0x39b   : > { %v1253_v37 = vpop.permute.xlu0 %1252 }
 0x39f   : > { %v1251_v40 = vpop.permute.xlu0 %1250 }
 0x3a3   : > { %v1543_v42 = vpop.permute.xlu0 %1542 }
 0x3a7   : > { %v1541_v43 = vpop.permute.xlu0 %1540 }
 0x3b1   : > { %v984_v24 = vpop.xlane.xlu1 %983 }
 0x3b2   : > { %2266 = vrcp.f32 %v984_v24 }
 0x3b5   : > { %v981_v25 = vpop.xlane.xlu1 %980 }
 0x3b6   : > { %2268 = vrcp.f32 %v981_v25 }
 0x3b9   : > { %v994_v27 = vpop.permute.xlu1 %993 }
 0x3ba   : > { %2185 = vmatprep.subr.mxu0 %v994_v27 }
 0x3bb   : > { %2186 = vmatpush3.msra.mxu0 %v994_v27 }
 0x3bc   : > { %2187 = vmatprep.subr.mxu0 %v992_v26 }
 0x3bd   : > { %2188 = vmatpush3.msra.mxu0 %v992_v26  ;;  %v1249_v35 = vpop.permute.xlu1 %1248 }
 0x3be   : > { %2192 = vmatprep.subr.mxu0 %v1079_v23 }
 0x3bf   : > { %v2267_v28 = vpop.eup %2266 }
 0x3c0   : > { %v2524_v31 = vmul.f32 %v2267_v28, %v2259_v14 }
 0x3c1   : > { %v1545_v39 = vpop.permute.xlu1 %1544 }
 0x3c3   : > { %v2269_v29 = vpop.eup %2268 }
 0x3c4   : > { %v2522_v30 = vmul.f32 %v2269_v29, %v2261_v16 }
 0x3c5   : > { %v1539_v41 = vpop.permute.xlu1 %1538 }
 0x3c6   : > { %2189 = vmatprep.mubr.msk.f32.mxu0 %vm770_vm2, %v2522_v30  ;;  %v1246_v1 = vadd.f32 %v2522_v30, %v2514_v21 }
 0x3c7   : > { %2190 = vmatmul.mubr.msk.f32.vlgmr.msra.gmra.mxu0 %vm770_vm2, %v2524_v31 }
 0x3c8   : > { %2193 = vmatpush3.msra.mxu0 %v1079_v23 }
 0x3c9   : > { %2202 = vmatprep.subr.msk.mxu0 %vm680_vm1, %v1255_v32 }
 0x414   : > { %v2531_v33 = vpop.f32.mrf.mxu0 }
 0x416   : > { %v865_v34 = vpop.f32.mrf.mxu0 }
 0x417   : > { %2199 = vmatprep.mubr.msk.f32.mxu1 %vm680_vm1, %v865_v34 }
 0x487   : > { %v2191_v36 = vpop.f32.mrf.mxu0 }
 0x489   : > { %v1069_v38 = vpop.f32.mrf.mxu0 }
 0x48a   : > { %2194 = vmatprep.mubr.msk.f32.mxu0 %vm680_vm1, %v1069_v38 }
 0x48b   : > { %2195 = vmatmul.mubr.msk.f32.vlgmr.msra.gmra.mxu0 %vm680_vm1, %v2191_v36 }
 0x48c   : > { %2203 = vmatpush3.xpose.msk.msra.mxu0 %vm680_vm1, %v1255_v32  ;;  %2206 = vmatprep.mubr.msk.f32.mxu0 %vm680_vm1, %v1249_v35 }
 0x48d   : > { %2204 = vmatprep.subr.msk.mxu0 %vm680_vm1, %v1253_v37 }
 0x490   : > { %2205 = vmatpush3.xpose.msk.msra.mxu0 %vm680_vm1, %v1253_v37 }
 0x491   : > { %2221 = vmatprep.subr.msk.mxu0 %vm680_vm1, %v1545_v39 }
 0x493   : > { %2207 = vmatmul.mubr.msk.f32.vlgmr.msra.gmra.mxu0 %vm680_vm1, %v1251_v40 }
 0x494   : > { %2222 = vmatpush3.xpose.msk.msra.mxu0 %vm680_vm1, %v1545_v39  ;;  %2225 = vmatprep.mubr.msk.f32.mxu0 %vm680_vm1, %v1539_v41 }
 0x495   : > { %2223 = vmatprep.subr.msk.mxu0 %vm680_vm1, %v1543_v42 }
 0x498   : > { %2224 = vmatpush3.xpose.msk.msra.mxu0 %vm680_vm1, %v1543_v42 }
 0x49b   : > { %2226 = vmatmul.mubr.msk.f32.vlgmr.msra.gmra.mxu0 %vm680_vm1, %v1541_v43 }
 0x54b   : > { %v2547_v44 = vpop.f32.mrf.mxu0 }
 0x54d   : > { %v2549_v45 = vpop.f32.mrf.mxu0 }
 0x553   : > { %v2208_v46 = vpop.f32.mrf.mxu0 }
 0x554   : > { %v1340_v47 = vmul.f32 0.35355338, %v2208_v46 }
 0x555   : > { %v1330_v48 = vpop.f32.mrf.mxu0 }
 0x556   : > { %v1339_v49 = vmul.f32 0.35355338, %v1330_v48  ;;  %v1344_v50 = vsel %vm770_vm2, %v1340_v47, -inf }
 0x557   : > { %1345 = vmax.xlane.f32.xlu0 %v1344_v50 }
 0x558   : > { %v1341_v51 = vsel %vm770_vm2, %v1339_v49, -inf }
 0x559   : > { %1342 = vmax.xlane.f32.xlu1 %v1341_v51 }
 0x55b   : > { %v2227_v62 = vpop.f32.mrf.mxu0 }
 0x55c   : > { %v1630_v5 = vmul.f32 0.35355338, %v2227_v62 }
 0x55d   : > { %v1620_v63 = vpop.f32.mrf.mxu0 }
 0x55e   : > { %v1629_v4 = vmul.f32 0.35355338, %v1620_v63  ;;  %v1634_v10 = vsel %vm770_vm2, %v1630_v5, -inf }
 0x560   : > { %v1631_v6 = vsel %vm770_vm2, %v1629_v4, -inf }
 0x5e0   : > { %v1346_v52 = vpop.xlane.xlu0 %1345 }
 0x5e1   : > { %v1348_v53 = vsub.f32 %v1340_v47, %v1346_v52 }
 0x5e2   : > { %v1343_v54 = vpop.xlane.xlu1 %1342 }
 0x5e3   : > { %v1351_v55 = vmul.f32 1.442695, %v1348_v53  ;;  %v1347_v56 = vsub.f32 %v1339_v49, %v1343_v54 }
 0x5e5   : > { %2270 = vpow2.f32 %v1351_v55  ;;  %v1349_v57 = vmul.f32 1.442695, %v1347_v56 }
 0x5e7   : > { %2272 = vpow2.f32 %v1349_v57 }
 0x5f2   : > { %v2271_v58 = vpop.eup %2270 }
 0x5f3   : > { %v1356_v59 = vsel %vm770_vm2, %v2271_v58, 0.0 }
 0x5f4   : > { %v2273_v60 = vpop.eup %2272  ;;  %1357 = vadd.xlane.f32.xlu1 %v1356_v59 }
 0x5f5   : > { %v1353_v61 = vsel %vm770_vm2, %v2273_v60, 0.0 }
 0x5f6   : > { %1354 = vadd.xlane.f32.xlu0 %v1353_v61 }
 0x605   : > { %1365 = vrot.lane.b32.xlu1 %v2484_v13, %s2302_s13 }
 0x609   : > { %1363 = vrot.lane.b32.xlu1 %v2482_v12, %s2302_s13 }
 0x60c   : > { %1162 = vrot.lane.b32.xlu0 %v2379_v3, %s2301_s12 }
 0x62b   : > { %1632 = vmax.xlane.f32.xlu0 %v1631_v6 }
 0x62d   : > { %1635 = vmax.xlane.f32.xlu1 %v1634_v10 }
 0x63e   : > { %1450 = vrot.lane.b32.xlu1 %v2374_v2, %s2301_s12 }
 0x642   : > { %1653 = vrot.lane.b32.xlu1 %v2482_v12, %s2303_s14 }
 0x646   : > { %1740 = vrot.lane.b32.xlu1 %v2360_v0, %s2301_s12  ;;  %v1247_v0 = vadd.f32 %v2524_v31, %v2516_v22 }
 0x67d   : > { %v1358_v3 = vpop.xlane.xlu1 %1357 }
 0x67e   : > { %2274 = vrcp.f32 %v1358_v3 }
 0x67f   : > { %v1355_v11 = vpop.xlane.xlu0 %1354 }
 0x680   : > { %2276 = vrcp.f32 %v1355_v11 }
 0x681   : > { %v1366_v14 = vpop.permute.xlu1 %1365 }
 0x683   : > { %v1163_v15 = vpop.permute.xlu0 %1162 }
 0x684   : > { %2197 = vmatprep.subr.mxu1 %v1163_v15 }
 0x685   : > { %2198 = vmatpush3.msra.mxu1 %v1163_v15  ;;  %v1364_v16 = vpop.permute.xlu1 %1363 }
 0x686   : > { %2200 = vmatmul.mubr.msk.f32.vlgmr.msra.gmra.mxu1 %vm680_vm1, %v2531_v33  ;;  %2209 = vmatprep.subr.mxu1 %v1366_v14 }
 0x687   : > { %2210 = vmatpush3.msra.mxu1 %v1366_v14 }
 0x688   : > { %2211 = vmatprep.subr.mxu1 %v1364_v16 }
 0x689   : > { %2212 = vmatpush3.msra.mxu1 %v1364_v16 }
 0x68b   : > { %v2275_v2 = vpop.eup %2274 }
 0x68c   : > { %v1362_v12 = vmul.f32 %v2275_v2, %v2271_v58 }
 0x68d   : > { %v2277_v17 = vpop.eup %2276 }
 0x68e   : > { %v1361_v18 = vmul.f32 %v2277_v17, %v2273_v60  ;;  %v1537_v19 = vadd.f32 %v1362_v12, %v1247_v0 }
 0x690   : > { %2213 = vmatprep.mubr.msk.f32.mxu1 %vm770_vm2, %v1361_v18  ;;  %v1536_v20 = vadd.f32 %v1361_v18, %v1246_v1 }
 0x691   : > { %2214 = vmatmul.mubr.msk.f32.vlgmr.msra.gmra.mxu1 %vm770_vm2, %v1362_v12 }
 0x6b4   : > { %v1633_v24 = vpop.xlane.xlu0 %1632 }
 0x6b5   : > { %v1637_v25 = vsub.f32 %v1629_v4, %v1633_v24 }
 0x6b6   : > { %v1636_v26 = vpop.xlane.xlu1 %1635 }
 0x6b7   : > { %v1638_v27 = vsub.f32 %v1630_v5, %v1636_v26  ;;  %v1639_v23 = vmul.f32 1.442695, %v1637_v25  ;;  %v1856_v26 = vld [vmem:[%s2621_s6] sm:$0x3] }
 0x6b9   : > { %v1641_v28 = vmul.f32 1.442695, %v1638_v27 }
 0x6ba   : > { %v1451_v29 = vpop.permute.xlu1 %1450 }
 0x6bb   : > { %2278 = vpow2.f32 %v1641_v28  ;;  %2216 = vmatprep.subr.mxu1 %v1451_v29 }
 0x6bc   : > { %2217 = vmatpush3.msra.mxu1 %v1451_v29  ;;  %2280 = vpow2.f32 %v1639_v23 }
 0x6be   : > { %v1654_v39 = vpop.permute.xlu1 %1653 }
 0x6c2   : > { %v1741_v48 = vpop.permute.xlu1 %1740 }
 0x6c8   : > { %v2279_v22 = vpop.eup %2278 }
 0x6c9   : > { %v1646_v21 = vsel %vm770_vm2, %v2279_v22, 0.0  ;;  %v2281_v30 = vpop.eup %2280 }
 0x6ca   : > { %1647 = vadd.xlane.f32.xlu0 %v1646_v21  ;;  %v1643_v31 = vsel %vm770_vm2, %v2281_v30, 0.0 }
 0x6ce   : > { %1644 = vadd.xlane.f32.xlu0 %v1643_v31 }
 0x6e4   : > { %1655 = vrot.lane.b32.xlu0 %v2484_v13, %s2303_s14 }
 0x6e8   : > { %1830 = vrot.lane.b32.xlu0 %v2415_v9, %s2301_s12 }
 0x746   : > { %v2201_v32 = vpop.f32.mrf.mxu1 }
 0x747   : > { %v1243_v49 = vadd.f32 %v2201_v32, %v2547_v44 }
 0x748   : > { %v1237_v33 = vpop.f32.mrf.mxu1 }
 0x749   : > { %v1238_v51 = vadd.f32 %v1237_v33, %v2549_v45 }
 0x751   : > { %v2215_v34 = vpop.f32.mrf.mxu1 }
 0x753   : > { %v1441_v35 = vpop.f32.mrf.mxu1  ;;  %v1648_v36 = vpop.xlane.xlu0 %1647 }
 0x754   : > { %2282 = vrcp.f32 %v1648_v36  ;;  %2218 = vmatprep.mubr.msk.f32.mxu1 %vm680_vm1, %v1441_v35 }
 0x755   : > { %2219 = vmatmul.mubr.msk.f32.vlgmr.msra.gmra.mxu1 %vm680_vm1, %v2215_v34 }
 0x757   : > { %v1645_v37 = vpop.xlane.xlu0 %1644 }
 0x758   : > { %2284 = vrcp.f32 %v1645_v37 }
 0x75b   : > { %v1656_v38 = vpop.permute.xlu0 %1655 }
 0x75c   : > { %2228 = vmatprep.subr.mxu1 %v1656_v38 }
 0x75d   : > { %2229 = vmatpush3.msra.mxu1 %v1656_v38 }
 0x75e   : > { %2230 = vmatprep.subr.mxu1 %v1654_v39 }
 0x75f   : > { %2231 = vmatpush3.msra.mxu1 %v1654_v39  ;;  %v1831_v60 = vpop.permute.xlu0 %1830 }
 0x760   : > { %2235 = vmatprep.subr.mxu1 %v1741_v48 }
 0x761   : > { %v2283_v9 = vpop.eup %2282 }
 0x762   : > { %v1652_v13 = vmul.f32 %v2283_v9, %v2279_v22 }
 0x764   : > { %v1827_v40 = vadd.f32 %v1652_v13, %v1537_v19  ;;  %v1863_v19 = vlaneseq }
 0x765   : > { %v2285_v41 = vpop.eup %2284 }
 0x766   : > { %v1651_v42 = vmul.f32 %v2285_v41, %v2281_v30  ;;  %v1878_v43 = vmul.f32 0.25, %v1827_v40  ;;  %v1864_v24 = vshrl.u32 %v1863_v19, 7 }
 0x768   : > { %2232 = vmatprep.mubr.msk.f32.mxu1 %vm770_vm2, %v1651_v42  ;;  %v1826_v46 = vadd.f32 %v1651_v42, %v1536_v20  ;;  %1880 = vst.msk [vmem:[%s378_s18 + $0x8] sm:$0xff] %vm770_vm2, %v1878_v43  ;;  %v1865_v25 = vsub.s32 0, %v1864_v24  ;;  %v1871_v27 = vsub.s32 1, %v1864_v24 }
 0x769   : > { %2233 = vmatmul.mubr.msk.f32.vlgmr.msra.gmra.mxu1 %vm770_vm2, %v1652_v13 }
 0x76a   : > { %v1877_v47 = vmul.f32 0.25, %v1826_v46  ;;  %2236 = vmatpush3.msra.mxu1 %v1741_v48  ;;  %v1866_v23 = vrot.slane %v1856_v26, %v1865_v25  ;;  %v1872_v29 = vrot.slane %v1856_v26, %v1871_v27 }
 0x76c   : > { %1879 = vst.msk [vmem:[%s378_s18] sm:$0xff] %vm770_vm2, %v1877_v47 }
 0x815   : > { %v2220_v50 = vpop.f32.mrf.mxu1 }
 0x816   : > { %v1535_v52 = vadd.f32 %v2220_v50, %v1243_v49 }
 0x817   : > { %v1525_v53 = vpop.f32.mrf.mxu1 }
 0x818   : > { %v1534_v54 = vadd.f32 %v1525_v53, %v1238_v51 }
 0x829   : > { %v2234_v55 = vpop.f32.mrf.mxu1 }
 0x82b   : > { %v1731_v56 = vpop.f32.mrf.mxu1 }
 0x82c   : > { %2237 = vmatprep.mubr.msk.f32.mxu1 %vm680_vm1, %v1731_v56 }
 0x82d   : > { %2238 = vmatmul.mubr.msk.f32.vlgmr.msra.gmra.mxu1 %vm680_vm1, %v2234_v55 }
 0x8ed   : > { %v2239_v57 = vpop.f32.mrf.mxu1 }
 0x8ee   : > { %v1825_v58 = vadd.f32 %v2239_v57, %v1535_v52 }
 0x8ef   : > { %v1815_v59 = vpop.f32.mrf.mxu1 }
 0x8f0   : > { %v1829_v61 = vadd.f32 %v1825_v58, %v2410_v8  ;;  %v1824_v62 = vadd.f32 %v1815_v59, %v1534_v54 }
 0x8f2   : > { %v1828_v44 = vadd.f32 %v1824_v62, %v2408_v7  ;;  %v1834_v63 = vadd.f32 %v1831_v60, %v1829_v61 }
 0x8f4   : > { %v1833_v45 = vadd.f32 %v1831_v60, %v1828_v44  ;;  %v1838_v4 = vsel %vm402_vm0, %v1834_v63, 0.0 }
 0x8f5   : > { %1839 = vadd.xlane.f32.xlu0 %v1838_v4 }
 0x8f6   : > { %v1835_v5 = vsel %vm402_vm0, %v1833_v45, 0.0 }
 0x8f7   : > { %1836 = vadd.xlane.f32.xlu1 %v1835_v5 }
 0x97e   : > { %v1840_v6 = vpop.xlane.xlu0 %1839 }
 0x97f   : > { %v1843_v10 = vmul.f32 0.03125, %v1840_v6 }
 0x980   : > { %v1837_v3 = vpop.xlane.xlu1 %1836 }
 0x981   : > { %v1845_v11 = vsub.f32 %v1834_v63, %v1843_v10  ;;  %v1842_v14 = vmul.f32 0.03125, %v1837_v3 }
 0x983   : > { %v1844_v15 = vsub.f32 %v1833_v45, %v1842_v14  ;;  %v1847_v16 = vmul.f32 %v1845_v11, %v1845_v11 }
 0x985   : > { %v1851_v8 = vsel %vm402_vm0, %v1847_v16, 0.0  ;;  %v1846_v2 = vmul.f32 %v1844_v15, %v1844_v15 }
 0x986   : > { %1852 = vadd.xlane.f32.xlu1 %v1851_v8 }
 0x987   : > { %v1848_v7 = vsel %vm402_vm0, %v1846_v2, 0.0 }
 0x988   : > { %1849 = vadd.xlane.f32.xlu0 %v1848_v7 }
 0xa0f   : > { %v1853_v0 = vpop.xlane.xlu1 %1852 }
 0xa10   : > { %v1855_v12 = vmul.f32 0.03125, %v1853_v0 }
 0xa11   : > { %v1850_v17 = vpop.xlane.xlu0 %1849 }
 0xa12   : > { %v1858_v1 = vadd.f32 1e-05, %v1855_v12  ;;  %v1854_v18 = vmul.f32 0.03125, %v1850_v17 }
 0xa14   : > { %2286 = vrsqrt.f32 %v1858_v1  ;;  %v1857_v20 = vadd.f32 1e-05, %v1854_v18 }
 0xa16   : > { %2288 = vrsqrt.f32 %v1857_v20 }
 0xa21   : > { %v2287_v28 = vpop.eup %2286 }
 0xa22   : > { %v1862_v22 = vmul.f32 %v2287_v28, %v1845_v11 }
 0xa23   : > { %v2289_v21 = vpop.eup %2288 }
 0xa24   : > { %v1868_v30 = vmul.f32 %v1866_v23, %v1862_v22  ;;  %v1861_v31 = vmul.f32 %v2289_v21, %v1844_v15 }
 0xa26   : > { %v1874_v32 = vadd.f32 %v1872_v29, %v1868_v30  ;;  %v1867_v33 = vmul.f32 %v1866_v23, %v1861_v31 }
 0xa28   : > { %1876 = vst.msk [vmem:[%s373_s23 + $0x8] sm:$0xff] %vm402_vm0, %v1874_v32  ;;  %v1873_v34 = vadd.f32 %v1872_v29, %v1867_v33 }
 0xa2a   : > { %1875 = vst.msk [vmem:[%s373_s23] sm:$0xff] %vm402_vm0, %v1873_v34 }
 0xa2b PF: > { %s19_s27 = sadd.s32 1, %s2296_s27  }
 0xa2c   : > { %p16_p4 = scmp.ge.s32.totalorder %s19_s27, 4  }
 0xa2e   :  { %18 = sbr.rel (!%p16_p4) target bundleno = 1 (0x1), region = 99 }

// kernel: generator_inptrans_forward.13
= control target key start
LH: loop header
LB: loop body
LE: loop exit
PB: predicated region body
PF: predicated region fallthrough
CT: control target
= control target key end

     0   :  { %s639_s18 = smov 0   ;;  %s693_s0 = inlined_call_operand.vmem [shape: f32[2,16,32], index: 0, kind: input, shape index: {}]   ;;  %s694_s1 = inlined_call_operand.vmem [shape: f32[2,16,32], index: 1, kind: input, shape index: {}]   ;;  %s695_s2 = inlined_call_operand.vmem [shape: f32[2,16,16], index: 2, kind: input, shape index: {}]   ;;  %s696_s3 = inlined_call_operand.vmem [shape: f32[32,192], index: 3, kind: input, shape index: {}]   ;;  %s697_s4 = inlined_call_operand.vmem [shape: f32[1,192], index: 4, kind: input, shape index: {}]   ;;  %s698_s5 = inlined_call_operand.vmem [shape: f32[2,16,192], index: 5, kind: output, shape index: {}]  }
   0x1 LB: > { %s549_s19 = sadd.s32 4294967295, %s606_s18   ;;  %p553_p0 = scmp.ge.s32.totalorder %s606_s18, 1  ;;  %s606_s18 = sphi %s639_s18, %s15_s18  }
   0x2   : > { %p207_p1 = scmp.lt.s32.totalorder %s606_s18, 3 }
   0x4   : > { %p208_p2 = pnand %p553_p0, %p207_p1 }
   0x5   : > { %p245_p3 = scmp.lt.s32.totalorder (!%p208_p2), %s549_s19, 1 }
   0x6   : > { %211 = sbr.rel (%p208_p2) target bundleno = 435 (0x1b3), region = 40 }
   0xb   : > { %v364_v0 = vld [vmem:[%s696_s3 + $0x38] sm:$0xff]  ;;  %v363_v1 = vld [vmem:[%s696_s3 + $0x30] sm:$0xff]  ;;  %v362_v2 = vld [vmem:[%s696_s3 + $0x28] sm:$0xff]  ;;  %s700_s19 = smov (!%p245_p3, %s549_s19), 1  ;;  %vm273_vm0 = vcmask 130048   ;;  %v608_v16 = vmov 0.0   ;;  %v367_v21 = vlaneseq }
   0xc   : > { %408 = vmatprep.subr.mxu1 %v364_v0  ;;  %s568_s26 = sshll.u32 %s700_s19, 4  ;;  %v361_v11 = vld [vmem:[%s696_s3 + $0x20] sm:$0xff]  ;;  %v360_v12 = vld [vmem:[%s696_s3 + $0x18] sm:$0xff]  ;;  %v359_v13 = vld [vmem:[%s696_s3 + $0x10] sm:$0xff]  ;;  %448 = vmatprep.mubr.f32.mxu1 %v608_v16  ;;  %vm377_vm1 = vcmask 261120   ;;  %s571_s25 = sshll.u32 %s700_s19, 5 }
   0xd   : > { %409 = vmatpush1.msra.mxu1 %v363_v1  ;;  %s249_s29 = scalar_lea.vmem %s693_s0, %s568_s26  ;;  %s254_s7 = scalar_lea.vmem %s694_s1, %s568_s26  ;;  %v358_v14 = vld [vmem:[%s696_s3 + $0x8] sm:$0xff]  ;;  %v357_v15 = vld [vmem:[%s696_s3] sm:$0xff]  ;;  %v368_v22 = vshrl.u32 %v367_v21, 7  ;;  %vm466_vm2 = vcmask 523264  }
   0xe   : > { %410 = vmatprep.subr.mxu1 %v362_v2  ;;  %v266_v3 = vld [vmem:[%s249_s29 + $0x8] sm:$0xff]  ;;  %v265_v5 = vld [vmem:[%s249_s29] sm:$0xff]  ;;  %s259_s10 = scalar_lea.vmem %s695_s2, %s568_s26  ;;  %s264_s28 = scalar_lea.vmem %s698_s5, %s571_s25 }
   0xf   : > { %v268_v4 = vld [vmem:[%s254_s7 + $0x8] sm:$0xff]  ;;  %v267_v7 = vld [vmem:[%s254_s7] sm:$0xff]  ;;  %411 = vmatpush1.msra.mxu1 %v361_v11  ;;  %v369_v23 = vsub.s32 0, %v368_v22  ;;  %v373_v25 = vsub.s32 1, %v368_v22 }
  0x10   : > { %v270_v6 = vadd.f32 %v268_v4, %v266_v3  ;;  %v271_v8 = vld [vmem:[%s259_s10] sm:$0xff]  ;;  %v269_v9 = vadd.f32 %v267_v7, %v265_v5  ;;  %v272_v10 = vld [vmem:[%s259_s10 + $0x8] sm:$0xff]  ;;  %412 = vmatprep.subr.mxu1 %v360_v12 }
  0x11   : > { %580 = vmatprep.mubr.msk.f32.mxu0 %vm273_vm0, %v271_v8  ;;  %413 = vmatpush1.msra.mxu1 %v359_v13  ;;  %v365_v24 = vld [vmem:[%s697_s4] sm:$0x3] }
  0x12   : > { %576 = vmatprep.subr.mxu0 %v270_v6  ;;  %414 = vmatprep.subr.mxu1 %v358_v14  ;;  %v370_v26 = vrot.slane %v365_v24, %v369_v23  ;;  %v374_v27 = vrot.slane %v365_v24, %v373_v25 }
  0x13   : > { %577 = vmatpush3.msra.mxu0 %v270_v6  ;;  %415 = vmatpush1.msra.mxu1 %v357_v15 }
  0x14   : > { %578 = vmatprep.subr.mxu0 %v269_v9 }
  0x15   : > { %579 = vmatpush3.msra.mxu0 %v269_v9 }
  0x16   : > { %581 = vmatmul.mubr.msk.f32.vlgmr.msra.gmra.mxu0 %vm273_vm0, %v272_v10 }
  0xd6   : > { %v582_v17 = vpop.f32.mrf.mxu0 }
  0xd7   : > { %v356_v20 = vadd.f32 %v582_v17, %v270_v6 }
  0xd8   : > { %v346_v18 = vpop.f32.mrf.mxu0 }
  0xd9   : > { %v355_v19 = vadd.f32 %v346_v18, %v269_v9 }
  0xdb   : > { %564 = vmatmul.mubr.msk.f32.vlgmr.msra.gmra.mxu1 %vm377_vm1, %v355_v19 }
  0xdc   : > { %454 = vmatprep.mubr.f32.mxu1 %v608_v16 }
  0xdf   : > { %565 = vmatmul.mubr.msk.f32.gmra.mxu1 %vm377_vm1, %v356_v20 }
 0x19b   : > { %v450_v28 = vpop.f32.mrf.mxu1 }
 0x19c   : > { %v451_v29 = vadd.f32 %v450_v28, %v370_v26 }
 0x19d   : > { %v452_v30 = vpop.f32.mrf.mxu1 }
 0x19e   : > { %592 = vtanh.f32 %v451_v29  ;;  %v453_v31 = vadd.f32 %v452_v30, %v374_v27 }
 0x19f   : > { %v456_v32 = vpop.f32.mrf.mxu1 }
 0x1a0   : > { %594 = vtanh.f32 %v453_v31  ;;  %v457_v33 = vadd.f32 %v456_v32, %v370_v26 }
 0x1a1   : > { %v458_v34 = vpop.f32.mrf.mxu1 }
 0x1a2   : > { %596 = vtanh.f32 %v457_v33  ;;  %v459_v35 = vadd.f32 %v458_v34, %v374_v27 }
 0x1a4   : > { %598 = vtanh.f32 %v459_v35 }
 0x1ab   : > { %v593_v36 = vpop.eup %592 }
 0x1ac   : > { %465 = vst [vmem:[%s264_s28] sm:$0xff] %v593_v36 }
 0x1ad   : > { %v595_v37 = vpop.eup %594 }
 0x1ae   : > { %467 = vst.msk [vmem:[%s264_s28 + $0x8] sm:$0xff] %vm466_vm2, %v595_v37 }
 0x1af   : > { %v597_v38 = vpop.eup %596 }
 0x1b0   : > { %468 = vst [vmem:[%s264_s28 + $0x10] sm:$0xff] %v597_v38 }
 0x1b1   : > { %v599_v39 = vpop.eup %598 }
 0x1b2   : > { %469 = vst.msk [vmem:[%s264_s28 + $0x18] sm:$0xff] %vm466_vm2, %v599_v39 }
 0x1b3 PF: > { %s15_s18 = sadd.s32 1, %s606_s18  }
 0x1b4   : > { %p12_p4 = scmp.ge.s32.totalorder %s15_s18, 4  }
 0x1b6   :  { %14 = sbr.rel (!%p12_p4) target bundleno = 1 (0x1), region = 76 }

</bundles_post_ra>
